<compile_context>
chip_gen: v5e
topology: v5e:2x2
jax: 0.10.0
libtpu: 0.0.40
codegen_flags: <defaults>
</compile_context>

<pallas_src>
import functools

import jax
import jax.numpy as jnp
from jax import lax
from jax.experimental import pallas as pl
from jax.experimental.pallas import tpu as pltpu


# --------------------------------------------------------------------------- #
# Pallas kernel: folded depthwise 5x5 + ReLU + 1x1 conv + bias + residual      #
# (one batch element per grid step, lane-packed NHWC: (H, W/2, 2C) layout)     #
# --------------------------------------------------------------------------- #
def pdc_block_kernel(x_ref, wdw_ref, wpw_ref, b_ref, o_ref, xpk_ref, xsh_ref,
                     *, H, Wh, C, C2, K, pad, Hp, Whp):
    """x_ref  : (1, H, Wh, 2C)   lane-packed input tile
       wdw_ref: (K*K, 2C)        folded depthwise taps (duplicated per pixel half)
       wpw_ref: (2C, 2C)         block-diagonal 1x1 weight
       b_ref  : (1, 2C)          packed bias
       o_ref  : (1, H*Wh, 2C)    output tile (lane-dense)
       xpk_ref: (Hp, Whp, 2C)    zero-padded packed image (VMEM scratch)
       xsh_ref: (K, Hp, Wh, 2C)  the 5 kx-shifted copies (VMEM scratch)"""
    f32 = jnp.float32

    # ---- 1) zero-padded, lane-packed image in VMEM --------------------------
    # Only the border strips are zeroed (interior is overwritten right after);
    # every element is rewritten every step, so no cross-step staleness.
    xpk_ref[0:pad, :, :] = jnp.zeros((pad, Whp, C2), f32)
    xpk_ref[pad + H:Hp, :, :] = jnp.zeros((Hp - pad - H, Whp, C2), f32)
    xpk_ref[pad:pad + H, 0:1, :] = jnp.zeros((H, 1, C2), f32)
    xpk_ref[pad:pad + H, Whp - 1:Whp, :] = jnp.zeros((H, 1, C2), f32)
    xpk_ref[pad:pad + H, 1:1 + Wh, :] = x_ref[0].astype(f32)

    # ---- 2) the five kx-shifted copies, built ONCE per image ----------------
    # Even pixel shifts (kx = 0, 2, 4) are packed-column windows (only kx=2,4
    # touch an unaligned sublane offset -> 2 relayouts per image instead of the
    # 25 unaligned slices of the previous version).
    xsh_ref[0] = xpk_ref[:, 0:Wh, :]
    xsh_ref[2] = xpk_ref[:, 1:1 + Wh, :]
    xsh_ref[4] = xpk_ref[:, 2:2 + Wh, :]
    # Odd pixel shifts (kx = 1, 3): swap the two 64-lane pixel halves with a
    # lane roll by 64 (= half of 128 lanes, direction-agnostic, XLU slot) and
    # select the proper half from the neighbouring windows.
    lane = lax.broadcasted_iota(jnp.int32, (Hp, Wh, C2), 2)
    low = lane < C
    r0 = pltpu.roll(xsh_ref[0], C, axis=2)
    r1 = pltpu.roll(xsh_ref[2], C, axis=2)
    xsh_ref[1] = jnp.where(low, r0, r1)
    r2 = pltpu.roll(xsh_ref[4], C, axis=2)
    xsh_ref[3] = jnp.where(low, r1, r2)

    # ---- 3) folded depthwise 5x5 (cv+cd+ad+rd, /4 folded into the taps) -----
    # 25 aligned leading-dim loads + VPU FMAs; f32 accumulator = 16 dense vregs.
    acc = jnp.zeros((H, Wh, C2), f32)
    for ky in range(K):
        for kx in range(K):
            t = ky * K + kx
            patch = xsh_ref[kx, ky:ky + H, :, :]          # aligned (H, Wh, 2C)
            tap = wdw_ref[t:t + 1, :]                      # (1, 2C)
            acc = acc + patch * tap

    y = jnp.maximum(acc, 0.0)                              # fused ReLU

    # ---- 4) 1x1 conv (block-diag over the two packed pixels) + bias + res ---
    # (On v6e/v7x: cast ym / wpw to bf16 here for 2x MXU rate; kept f32 so the
    #  f32 reference check stays tight.)
    ym = y.reshape(H * Wh, C2)                             # free reshape
    out = jnp.dot(ym, wpw_ref[...], preferred_element_type=f32)
    out = out + b_ref[...]
    out = out + x_ref[0].reshape(H * Wh, C2).astype(f32)   # identity shortcut
    o_ref[0] = out.astype(o_ref.dtype)                     # lane-dense store


# --------------------------------------------------------------------------- #
# Weight folding: cv + cd + ad + rd (and the /4) -> one depthwise 5x5          #
# --------------------------------------------------------------------------- #
def fold_pdc_weights(w_cv, w_cd, w_ad, w_rd):
    """Inputs: (C, 1, 3, 3) depthwise weights.  Output: (C, 5, 5) effective kernel."""
    C = w_cv.shape[0]
    cv = w_cv[:, 0]                                                    # (C, 3, 3)

    # cd: y = conv3x3(x, w) - x * sum(w)  ==  conv3x3 with center tap reduced by sum(w)
    cd_flat = w_cd[:, 0].reshape(C, 9)
    center = jnp.zeros((9,), w_cd.dtype).at[4].set(1.0)
    cd = (cd_flat - cd_flat.sum(axis=1, keepdims=True) * center).reshape(C, 3, 3)

    # ad: w - w[clockwise-rotated neighbours]
    ad_flat = w_ad[:, 0].reshape(C, 9)
    perm = jnp.array([3, 0, 1, 6, 4, 2, 7, 8, 5])
    ad = (ad_flat - ad_flat[:, perm]).reshape(C, 3, 3)

    # rd: 3x3 weights scattered (+/-) onto a 5x5 ring, center zero, w[...,0] unused
    rd_flat = w_rd[:, 0].reshape(C, 9)
    rd = jnp.zeros((C, 25), w_rd.dtype)
    rd = rd.at[:, jnp.array([0, 2, 4, 10, 14, 20, 22, 24])].set(rd_flat[:, 1:])
    rd = rd.at[:, jnp.array([6, 7, 8, 11, 13, 16, 17, 18])].set(-rd_flat[:, 1:])
    rd = rd.reshape(C, 5, 5)

    # 3x3 branches (padding=1) embed at the center of the 5x5 (padding=2) kernel.
    w5 = jnp.zeros((C, 5, 5), w_cv.dtype).at[:, 1:4, 1:4].set(cv + cd + ad) + rd
    return w5 * 0.25                                                   # the /4


# --------------------------------------------------------------------------- #
# Wrapper around pallas_call                                                   #
# --------------------------------------------------------------------------- #
def pdc_block_forward(x_nchw, w_cv, w_cd, w_ad, w_rd, w_pw, b_pw):
    """PDCBlock.forward for stride == 1.  x: (N, C, H, W) NCHW."""
    # TODO(synk): stride > 1 variant (MaxPool2d 2x2 + 1x1-conv shortcut) not implemented.
    N, C, H, W = x_nchw.shape
    Cout = w_pw.shape[0]
    assert Cout == C, "identity shortcut (stride=1) requires inplane == ouplane"
    assert W % 2 == 0, "lane packing pairs adjacent W pixels"
    K, pad = 5, 2
    Hp = H + 2 * pad
    Wh = W // 2
    Whp = Wh + 2                      # one packed column of zero padding each side
    C2 = 2 * C

    # One-time weight prep (plain JAX, tiny).
    w5 = fold_pdc_weights(w_cv, w_cd, w_ad, w_rd)                   # (C, 5, 5)
    w_dw = jnp.transpose(w5, (1, 2, 0)).reshape(K * K, C)           # tap-major
    w_dw = jnp.concatenate([w_dw, w_dw], axis=1)                    # (25, 2C) packed
    w_mat = jnp.transpose(w_pw[:, :, 0, 0], (1, 0))                 # (C, Cout)
    w_blk = jnp.zeros((C2, 2 * Cout), x_nchw.dtype)
    w_blk = w_blk.at[:C, :Cout].set(w_mat).at[C:, Cout:].set(w_mat) # block-diag
    bias_row = jnp.concatenate([b_pw, b_pw]).reshape(1, 2 * Cout)

    # Layout plumbing (module contract is NCHW; kernel wants packed NHWC).
    # TODO(synk): keep activations NHWC/packed across the whole network so these
    # transposes are paid once at the network boundary, not per block.
    x_nhwc = jnp.transpose(x_nchw, (0, 2, 3, 1))                    # (N, H, W, C)
    x_pk = x_nhwc.reshape(N, H, Wh, C2)                             # free reshape

    kernel = functools.partial(pdc_block_kernel, H=H, Wh=Wh, C=C, C2=C2,
                               K=K, pad=pad, Hp=Hp, Whp=Whp)

    out_flat = pl.pallas_call(
        kernel,
        out_shape=jax.ShapeDtypeStruct((N, H * Wh, C2), x_nchw.dtype),
        grid_spec=pltpu.PrefetchScalarGridSpec(
            num_scalar_prefetch=0,
            grid=(N,),
            in_specs=[
                # One packed image per grid step.
                pl.BlockSpec((1, H, Wh, C2), lambda n: (n, 0, 0, 0)),
                # Weights/bias: full blocks, DMA'd once and resident across the grid.
                pl.BlockSpec((K * K, C2), lambda n: (0, 0)),
                pl.BlockSpec((C2, 2 * Cout), lambda n: (0, 0)),
                pl.BlockSpec((1, 2 * Cout), lambda n: (0, 0)),
            ],
            out_specs=pl.BlockSpec((1, H * Wh, C2), lambda n: (n, 0, 0)),
            scratch_shapes=[
                pltpu.VMEM((Hp, Whp, C2), jnp.float32),      # padded packed image
                pltpu.VMEM((K, Hp, Wh, C2), jnp.float32),    # 5 kx-shifted copies
            ],
        ),
        compiler_params=pltpu.CompilerParams(dimension_semantics=("parallel",)),
        cost_estimate=pl.CostEstimate(
            flops=2 * N * H * W * C * (K * K + Cout),
            transcendentals=0,
            bytes_accessed=2 * N * H * W * C * x_nchw.dtype.itemsize),
    )(x_pk, w_dw, w_blk, bias_row)

    out_nhwc = out_flat.reshape(N, H, W, Cout)                      # free reshape
    return jnp.transpose(out_nhwc, (0, 3, 1, 2))                    # back to NCHW


# --------------------------------------------------------------------------- #
# Pure-JAX reference (exact PDC)                                               #
# --------------------------------------------------------------------------- #
def _dwconv(x, w, padding):
    return jax.lax.conv_general_dilated(
        x, w, window_strides=(1, 1),
        padding=((padding, padding), (padding, padding)),
        dimension_numbers=("NCHW", "OIHW", "NCHW"),
        feature_group_count=x.shape[1])


def reference_forward(x, w_cv, w_cd, w_ad, w_rd, w_pw, b_pw):
    C = x.shape[1]
    y_cv = _dwconv(x, w_cv, 1)

    wc = w_cd.sum(axis=(2, 3), keepdims=True)
    y_cd = _dwconv(x, w_cd, 1) - _dwconv(x, wc, 0)

    flat = w_ad.reshape(C, 1, 9)
    perm = jnp.array([3, 0, 1, 6, 4, 2, 7, 8, 5])
    y_ad = _dwconv(x, (flat - flat[:, :, perm]).reshape(C, 1, 3, 3), 1)

    flat = w_rd.reshape(C, 1, 9)
    buf = jnp.zeros((C, 1, 25), x.dtype)
    buf = buf.at[:, :, jnp.array([0, 2, 4, 10, 14, 20, 22, 24])].set(flat[:, :, 1:])
    buf = buf.at[:, :, jnp.array([6, 7, 8, 11, 13, 16, 17, 18])].set(-flat[:, :, 1:])
    y_rd = _dwconv(x, buf.reshape(C, 1, 5, 5), 2)

    y = (y_cv + y_cd + y_ad + y_rd) / 4.0
    y = jnp.maximum(y, 0.0)
    y = jax.lax.conv_general_dilated(
        y, w_pw, (1, 1), ((0, 0), (0, 0)),
        dimension_numbers=("NCHW", "OIHW", "NCHW"))
    y = y + b_pw.reshape(1, -1, 1, 1)
    return y + x


if __name__ == "__main__":
    # pidinet-like stride=1 block: batch=2, channels=64 (inplane == ouplane), 16x16.
    N, C, H, W = 2, 64, 16, 16
    ouplane = C

    key = jax.random.PRNGKey(0)
    ks = jax.random.split(key, 7)
    x = jax.random.normal(ks[0], (N, C, H, W), dtype=jnp.float32)
    w_cv = jax.random.normal(ks[1], (C, 1, 3, 3), dtype=jnp.float32) * 0.2
    w_cd = jax.random.normal(ks[2], (C, 1, 3, 3), dtype=jnp.float32) * 0.2
    w_ad = jax.random.normal(ks[3], (C, 1, 3, 3), dtype=jnp.float32) * 0.2
    w_rd = jax.random.normal(ks[4], (C, 1, 3, 3), dtype=jnp.float32) * 0.2
    w_pw = jax.random.normal(ks[5], (ouplane, C, 1, 1), dtype=jnp.float32) * 0.1
    b_pw = jax.random.normal(ks[6], (ouplane,), dtype=jnp.float32) * 0.1

    out = pdc_block_forward(x, w_cv, w_cd, w_ad, w_rd, w_pw, b_pw)
    out = jax.block_until_ready(out)

    ref = reference_forward(x, w_cv, w_cd, w_ad, w_rd, w_pw, b_pw)
    assert out.shape == ref.shape == (N, ouplane, H, W)
    assert jnp.allclose(out, ref, atol=2e-3, rtol=2e-3), "mismatch vs. PDC reference"

    print("KERNEL_OK")
</pallas_src>

<mosaic_0001>
module attributes {stable_mosaic.version = 11 : i64} {
  func.func @pdc_block_kernel(%arg0: i32, %arg1: memref<1x16x8x128xf32, #tpu.memory_space<vmem>>, %arg2: memref<25x128xf32, #tpu.memory_space<vmem>>, %arg3: memref<128x128xf32, #tpu.memory_space<vmem>>, %arg4: memref<1x128xf32, #tpu.memory_space<vmem>>, %arg5: memref<1x128x128xf32, #tpu.memory_space<vmem>>, %arg6: memref<20x10x128xf32, #tpu.memory_space<vmem>>, %arg7: memref<5x20x8x128xf32, #tpu.memory_space<vmem>>) attributes {dimension_semantics = [#tpu.dimension_semantics<parallel>], iteration_bounds = array<i64: 2>, scalar_prefetch = 0 : i64, scratch_operands = 2 : i64, tpu.core_type = #tpu.core_type<tc>, window_params = [{transform_indices = @transform_0, window_bounds = array<i64: 1, 16, 8, 128>}, {pipeline_mode = #tpu.pipeline_mode<synchronous>, transform_indices = @transform_1, window_bounds = array<i64: 25, 128>}, {pipeline_mode = #tpu.pipeline_mode<synchronous>, transform_indices = @transform_2, window_bounds = array<i64: 128, 128>}, {pipeline_mode = #tpu.pipeline_mode<synchronous>, transform_indices = @transform_3, window_bounds = array<i64: 1, 128>}, {transform_indices = @transform_4, window_bounds = array<i64: 1, 128, 128>}]} {
    %cst = arith.constant 0.000000e+00 : f32
    %0 = vector.broadcast %cst : f32 to vector<2x10x128xf32>
    %c0 = arith.constant 0 : index
    %c0_0 = arith.constant 0 : index
    %c0_1 = arith.constant 0 : index
    %1 = vector.load %arg6[%c0, %c0_0, %c0_1] : memref<20x10x128xf32, #tpu.memory_space<vmem>>, vector<2x10x128xf32>
    tpu.vector_store %arg6[%c0, %c0_0, %c0_1], %0 {strides = array<i32>} : memref<20x10x128xf32, #tpu.memory_space<vmem>>, vector<2x10x128xf32>,
    %cst_2 = arith.constant 0.000000e+00 : f32
    %2 = vector.broadcast %cst_2 : f32 to vector<2x10x128xf32>
    %c18 = arith.constant 18 : index
    %c0_3 = arith.constant 0 : index
    %c0_4 = arith.constant 0 : index
    %3 = vector.load %arg6[%c18, %c0_3, %c0_4] : memref<20x10x128xf32, #tpu.memory_space<vmem>>, vector<2x10x128xf32>
    tpu.vector_store %arg6[%c18, %c0_3, %c0_4], %2 {strides = array<i32>} : memref<20x10x128xf32, #tpu.memory_space<vmem>>, vector<2x10x128xf32>,
    %cst_5 = arith.constant 0.000000e+00 : f32
    %4 = vector.broadcast %cst_5 : f32 to vector<16x1x128xf32>
    %c2 = arith.constant 2 : index
    %c0_6 = arith.constant 0 : index
    %c0_7 = arith.constant 0 : index
    %5 = vector.load %arg6[%c2, %c0_6, %c0_7] : memref<20x10x128xf32, #tpu.memory_space<vmem>>, vector<16x1x128xf32>
    tpu.vector_store %arg6[%c2, %c0_6, %c0_7], %4 {strides = array<i32>} : memref<20x10x128xf32, #tpu.memory_space<vmem>>, vector<16x1x128xf32>,
    %cst_8 = arith.constant 0.000000e+00 : f32
    %6 = vector.broadcast %cst_8 : f32 to vector<16x1x128xf32>
    %c2_9 = arith.constant 2 : index
    %c9 = arith.constant 9 : index
    %c0_10 = arith.constant 0 : index
    %7 = vector.load %arg6[%c2_9, %c9, %c0_10] : memref<20x10x128xf32, #tpu.memory_space<vmem>>, vector<16x1x128xf32>
    tpu.vector_store %arg6[%c2_9, %c9, %c0_10], %6 {strides = array<i32>} : memref<20x10x128xf32, #tpu.memory_space<vmem>>, vector<16x1x128xf32>,
    %c0_11 = arith.constant 0 : index
    %c0_12 = arith.constant 0 : index
    %c0_13 = arith.constant 0 : index
    %c0_14 = arith.constant 0 : index
    %8 = vector.load %arg1[%c0_11, %c0_12, %c0_13, %c0_14] : memref<1x16x8x128xf32, #tpu.memory_space<vmem>>, vector<1x16x8x128xf32>
    %9 = vector.shape_cast %8 : vector<1x16x8x128xf32> to vector<16x8x128xf32>
    %c2_15 = arith.constant 2 : index
    %c1 = arith.constant 1 : index
    %c0_16 = arith.constant 0 : index
    %10 = vector.load %arg6[%c2_15, %c1, %c0_16] : memref<20x10x128xf32, #tpu.memory_space<vmem>>, vector<16x8x128xf32>
    tpu.vector_store %arg6[%c2_15, %c1, %c0_16], %9 {strides = array<i32>} : memref<20x10x128xf32, #tpu.memory_space<vmem>>, vector<16x8x128xf32>,
    %c0_17 = arith.constant 0 : index
    %c0_18 = arith.constant 0 : index
    %c0_19 = arith.constant 0 : index
    %11 = vector.load %arg6[%c0_17, %c0_18, %c0_19] : memref<20x10x128xf32, #tpu.memory_space<vmem>>, vector<20x8x128xf32>
    %c0_20 = arith.constant 0 : index
    %c0_21 = arith.constant 0 : index
    %c0_22 = arith.constant 0 : index
    %c0_23 = arith.constant 0 : index
    %12 = vector.load %arg7[%c0_20, %c0_21, %c0_22, %c0_23] : memref<5x20x8x128xf32, #tpu.memory_space<vmem>>, vector<1x20x8x128xf32>
    %13 = vector.shape_cast %12 : vector<1x20x8x128xf32> to vector<20x8x128xf32>
    %14 = vector.shape_cast %11 : vector<20x8x128xf32> to vector<1x20x8x128xf32>
    tpu.vector_store %arg7[%c0_20, %c0_21, %c0_22, %c0_23], %14 {strides = array<i32>} : memref<5x20x8x128xf32, #tpu.memory_space<vmem>>, vector<1x20x8x128xf32>,
    %c0_24 = arith.constant 0 : index
    %c1_25 = arith.constant 1 : index
    %c0_26 = arith.constant 0 : index
    %15 = vector.load %arg6[%c0_24, %c1_25, %c0_26] : memref<20x10x128xf32, #tpu.memory_space<vmem>>, vector<20x8x128xf32>
    %c2_27 = arith.constant 2 : index
    %c0_28 = arith.constant 0 : index
    %c0_29 = arith.constant 0 : index
    %c0_30 = arith.constant 0 : index
    %16 = vector.load %arg7[%c2_27, %c0_28, %c0_29, %c0_30] : memref<5x20x8x128xf32, #tpu.memory_space<vmem>>, vector<1x20x8x128xf32>
    %17 = vector.shape_cast %16 : vector<1x20x8x128xf32> to vector<20x8x128xf32>
    %18 = vector.shape_cast %15 : vector<20x8x128xf32> to vector<1x20x8x128xf32>
    tpu.vector_store %arg7[%c2_27, %c0_28, %c0_29, %c0_30], %18 {strides = array<i32>} : memref<5x20x8x128xf32, #tpu.memory_space<vmem>>, vector<1x20x8x128xf32>,
    %c0_31 = arith.constant 0 : index
    %c2_32 = arith.constant 2 : index
    %c0_33 = arith.constant 0 : index
    %19 = vector.load %arg6[%c0_31, %c2_32, %c0_33] : memref<20x10x128xf32, #tpu.memory_space<vmem>>, vector<20x8x128xf32>
    %c4 = arith.constant 4 : index
    %c0_34 = arith.constant 0 : index
    %c0_35 = arith.constant 0 : index
    %c0_36 = arith.constant 0 : index
    %20 = vector.load %arg7[%c4, %c0_34, %c0_35, %c0_36] : memref<5x20x8x128xf32, #tpu.memory_space<vmem>>, vector<1x20x8x128xf32>
    %21 = vector.shape_cast %20 : vector<1x20x8x128xf32> to vector<20x8x128xf32>
    %22 = vector.shape_cast %19 : vector<20x8x128xf32> to vector<1x20x8x128xf32>
    tpu.vector_store %arg7[%c4, %c0_34, %c0_35, %c0_36], %22 {strides = array<i32>} : memref<5x20x8x128xf32, #tpu.memory_space<vmem>>, vector<1x20x8x128xf32>,
    %23 = tpu.iota {dimensions = array<i32: 2>} : vector<20x8x128xi32>
    %c64_i32 = arith.constant 64 : i32
    %24 = vector.broadcast %c64_i32 : i32 to vector<20x8x128xi32>
    %25 = arith.cmpi slt, %23, %24 : vector<20x8x128xi32>
    %c0_37 = arith.constant 0 : index
    %c0_38 = arith.constant 0 : index
    %c0_39 = arith.constant 0 : index
    %c0_40 = arith.constant 0 : index
    %26 = vector.load %arg7[%c0_37, %c0_38, %c0_39, %c0_40] : memref<5x20x8x128xf32, #tpu.memory_space<vmem>>, vector<1x20x8x128xf32>
    %27 = vector.shape_cast %26 : vector<1x20x8x128xf32> to vector<20x8x128xf32>
    %c64_i32_41 = arith.constant 64 : i32
    %28 = tpu.dynamic_rotate %27 by %c64_i32_41 dim 2 : vector<20x8x128xf32>, i32 -> vector<20x8x128xf32>
    %c2_42 = arith.constant 2 : index
    %c0_43 = arith.constant 0 : index
    %c0_44 = arith.constant 0 : index
    %c0_45 = arith.constant 0 : index
    %29 = vector.load %arg7[%c2_42, %c0_43, %c0_44, %c0_45] : memref<5x20x8x128xf32, #tpu.memory_space<vmem>>, vector<1x20x8x128xf32>
    %30 = vector.shape_cast %29 : vector<1x20x8x128xf32> to vector<20x8x128xf32>
    %c64_i32_46 = arith.constant 64 : i32
    %31 = tpu.dynamic_rotate %30 by %c64_i32_46 dim 2 : vector<20x8x128xf32>, i32 -> vector<20x8x128xf32>
    %32 = arith.select %25, %28, %31 : vector<20x8x128xi1>, vector<20x8x128xf32>
    %c1_47 = arith.constant 1 : index
    %c0_48 = arith.constant 0 : index
    %c0_49 = arith.constant 0 : index
    %c0_50 = arith.constant 0 : index
    %33 = vector.load %arg7[%c1_47, %c0_48, %c0_49, %c0_50] : memref<5x20x8x128xf32, #tpu.memory_space<vmem>>, vector<1x20x8x128xf32>
    %34 = vector.shape_cast %33 : vector<1x20x8x128xf32> to vector<20x8x128xf32>
    %35 = vector.shape_cast %32 : vector<20x8x128xf32> to vector<1x20x8x128xf32>
    tpu.vector_store %arg7[%c1_47, %c0_48, %c0_49, %c0_50], %35 {strides = array<i32>} : memref<5x20x8x128xf32, #tpu.memory_space<vmem>>, vector<1x20x8x128xf32>,
    %c4_51 = arith.constant 4 : index
    %c0_52 = arith.constant 0 : index
    %c0_53 = arith.constant 0 : index
    %c0_54 = arith.constant 0 : index
    %36 = vector.load %arg7[%c4_51, %c0_52, %c0_53, %c0_54] : memref<5x20x8x128xf32, #tpu.memory_space<vmem>>, vector<1x20x8x128xf32>
    %37 = vector.shape_cast %36 : vector<1x20x8x128xf32> to vector<20x8x128xf32>
    %c64_i32_55 = arith.constant 64 : i32
    %38 = tpu.dynamic_rotate %37 by %c64_i32_55 dim 2 : vector<20x8x128xf32>, i32 -> vector<20x8x128xf32>
    %39 = arith.select %25, %31, %38 : vector<20x8x128xi1>, vector<20x8x128xf32>
    %c3 = arith.constant 3 : index
    %c0_56 = arith.constant 0 : index
    %c0_57 = arith.constant 0 : index
    %c0_58 = arith.constant 0 : index
    %40 = vector.load %arg7[%c3, %c0_56, %c0_57, %c0_58] : memref<5x20x8x128xf32, #tpu.memory_space<vmem>>, vector<1x20x8x128xf32>
    %41 = vector.shape_cast %40 : vector<1x20x8x128xf32> to vector<20x8x128xf32>
    %42 = vector.shape_cast %39 : vector<20x8x128xf32> to vector<1x20x8x128xf32>
    tpu.vector_store %arg7[%c3, %c0_56, %c0_57, %c0_58], %42 {strides = array<i32>} : memref<5x20x8x128xf32, #tpu.memory_space<vmem>>, vector<1x20x8x128xf32>,
    %cst_59 = arith.constant 0.000000e+00 : f32
    %43 = vector.broadcast %cst_59 : f32 to vector<16x8x128xf32>
    %c0_60 = arith.constant 0 : index
    %c0_61 = arith.constant 0 : index
    %c0_62 = arith.constant 0 : index
    %c0_63 = arith.constant 0 : index
    %44 = vector.load %arg7[%c0_60, %c0_61, %c0_62, %c0_63] : memref<5x20x8x128xf32, #tpu.memory_space<vmem>>, vector<1x16x8x128xf32>
    %45 = vector.shape_cast %44 : vector<1x16x8x128xf32> to vector<16x8x128xf32>
    %c0_64 = arith.constant 0 : index
    %c0_65 = arith.constant 0 : index
    %46 = vector.load %arg2[%c0_64, %c0_65] : memref<25x128xf32, #tpu.memory_space<vmem>>, vector<1x128xf32>
    %47 = vector.shape_cast %46 : vector<1x128xf32> to vector<1x1x128xf32>
    %48 = vector.broadcast %47 : vector<1x1x128xf32> to vector<16x8x128xf32>
    %49 = arith.mulf %45, %48 : vector<16x8x128xf32>
    %50 = arith.addf %43, %49 : vector<16x8x128xf32>
    %c1_66 = arith.constant 1 : index
    %c0_67 = arith.constant 0 : index
    %c0_68 = arith.constant 0 : index
    %c0_69 = arith.constant 0 : index
    %51 = vector.load %arg7[%c1_66, %c0_67, %c0_68, %c0_69] : memref<5x20x8x128xf32, #tpu.memory_space<vmem>>, vector<1x16x8x128xf32>
    %52 = vector.shape_cast %51 : vector<1x16x8x128xf32> to vector<16x8x128xf32>
    %c1_70 = arith.constant 1 : index
    %c0_71 = arith.constant 0 : index
    %53 = vector.load %arg2[%c1_70, %c0_71] : memref<25x128xf32, #tpu.memory_space<vmem>>, vector<1x128xf32>
    %54 = vector.shape_cast %53 : vector<1x128xf32> to vector<1x1x128xf32>
    %55 = vector.broadcast %54 : vector<1x1x128xf32> to vector<16x8x128xf32>
    %56 = arith.mulf %52, %55 : vector<16x8x128xf32>
    %57 = arith.addf %50, %56 : vector<16x8x128xf32>
    %c2_72 = arith.constant 2 : index
    %c0_73 = arith.constant 0 : index
    %c0_74 = arith.constant 0 : index
    %c0_75 = arith.constant 0 : index
    %58 = vector.load %arg7[%c2_72, %c0_73, %c0_74, %c0_75] : memref<5x20x8x128xf32, #tpu.memory_space<vmem>>, vector<1x16x8x128xf32>
    %59 = vector.shape_cast %58 : vector<1x16x8x128xf32> to vector<16x8x128xf32>
    %c2_76 = arith.constant 2 : index
    %c0_77 = arith.constant 0 : index
    %60 = vector.load %arg2[%c2_76, %c0_77] : memref<25x128xf32, #tpu.memory_space<vmem>>, vector<1x128xf32>
    %61 = vector.shape_cast %60 : vector<1x128xf32> to vector<1x1x128xf32>
    %62 = vector.broadcast %61 : vector<1x1x128xf32> to vector<16x8x128xf32>
    %63 = arith.mulf %59, %62 : vector<16x8x128xf32>
    %64 = arith.addf %57, %63 : vector<16x8x128xf32>
    %c3_78 = arith.constant 3 : index
    %c0_79 = arith.constant 0 : index
    %c0_80 = arith.constant 0 : index
    %c0_81 = arith.constant 0 : index
    %65 = vector.load %arg7[%c3_78, %c0_79, %c0_80, %c0_81] : memref<5x20x8x128xf32, #tpu.memory_space<vmem>>, vector<1x16x8x128xf32>
    %66 = vector.shape_cast %65 : vector<1x16x8x128xf32> to vector<16x8x128xf32>
    %c3_82 = arith.constant 3 : index
    %c0_83 = arith.constant 0 : index
    %67 = vector.load %arg2[%c3_82, %c0_83] : memref<25x128xf32, #tpu.memory_space<vmem>>, vector<1x128xf32>
    %68 = vector.shape_cast %67 : vector<1x128xf32> to vector<1x1x128xf32>
    %69 = vector.broadcast %68 : vector<1x1x128xf32> to vector<16x8x128xf32>
    %70 = arith.mulf %66, %69 : vector<16x8x128xf32>
    %71 = arith.addf %64, %70 : vector<16x8x128xf32>
    %c4_84 = arith.constant 4 : index
    %c0_85 = arith.constant 0 : index
    %c0_86 = arith.constant 0 : index
    %c0_87 = arith.constant 0 : index
    %72 = vector.load %arg7[%c4_84, %c0_85, %c0_86, %c0_87] : memref<5x20x8x128xf32, #tpu.memory_space<vmem>>, vector<1x16x8x128xf32>
    %73 = vector.shape_cast %72 : vector<1x16x8x128xf32> to vector<16x8x128xf32>
    %c4_88 = arith.constant 4 : index
    %c0_89 = arith.constant 0 : index
    %74 = vector.load %arg2[%c4_88, %c0_89] : memref<25x128xf32, #tpu.memory_space<vmem>>, vector<1x128xf32>
    %75 = vector.shape_cast %74 : vector<1x128xf32> to vector<1x1x128xf32>
    %76 = vector.broadcast %75 : vector<1x1x128xf32> to vector<16x8x128xf32>
    %77 = arith.mulf %73, %76 : vector<16x8x128xf32>
    %78 = arith.addf %71, %77 : vector<16x8x128xf32>
    %c0_90 = arith.constant 0 : index
    %c1_91 = arith.constant 1 : index
    %c0_92 = arith.constant 0 : index
    %c0_93 = arith.constant 0 : index
    %79 = vector.load %arg7[%c0_90, %c1_91, %c0_92, %c0_93] : memref<5x20x8x128xf32, #tpu.memory_space<vmem>>, vector<1x16x8x128xf32>
    %80 = vector.shape_cast %79 : vector<1x16x8x128xf32> to vector<16x8x128xf32>
    %c5 = arith.constant 5 : index
    %c0_94 = arith.constant 0 : index
    %81 = vector.load %arg2[%c5, %c0_94] : memref<25x128xf32, #tpu.memory_space<vmem>>, vector<1x128xf32>
    %82 = vector.shape_cast %81 : vector<1x128xf32> to vector<1x1x128xf32>
    %83 = vector.broadcast %82 : vector<1x1x128xf32> to vector<16x8x128xf32>
    %84 = arith.mulf %80, %83 : vector<16x8x128xf32>
    %85 = arith.addf %78, %84 : vector<16x8x128xf32>
    %c1_95 = arith.constant 1 : index
    %c1_96 = arith.constant 1 : index
    %c0_97 = arith.constant 0 : index
    %c0_98 = arith.constant 0 : index
    %86 = vector.load %arg7[%c1_95, %c1_96, %c0_97, %c0_98] : memref<5x20x8x128xf32, #tpu.memory_space<vmem>>, vector<1x16x8x128xf32>
    %87 = vector.shape_cast %86 : vector<1x16x8x128xf32> to vector<16x8x128xf32>
    %c6 = arith.constant 6 : index
    %c0_99 = arith.constant 0 : index
    %88 = vector.load %arg2[%c6, %c0_99] : memref<25x128xf32, #tpu.memory_space<vmem>>, vector<1x128xf32>
    %89 = vector.shape_cast %88 : vector<1x128xf32> to vector<1x1x128xf32>
    %90 = vector.broadcast %89 : vector<1x1x128xf32> to vector<16x8x128xf32>
    %91 = arith.mulf %87, %90 : vector<16x8x128xf32>
    %92 = arith.addf %85, %91 : vector<16x8x128xf32>
    %c2_100 = arith.constant 2 : index
    %c1_101 = arith.constant 1 : index
    %c0_102 = arith.constant 0 : index
    %c0_103 = arith.constant 0 : index
    %93 = vector.load %arg7[%c2_100, %c1_101, %c0_102, %c0_103] : memref<5x20x8x128xf32, #tpu.memory_space<vmem>>, vector<1x16x8x128xf32>
    %94 = vector.shape_cast %93 : vector<1x16x8x128xf32> to vector<16x8x128xf32>
    %c7 = arith.constant 7 : index
    %c0_104 = arith.constant 0 : index
    %95 = vector.load %arg2[%c7, %c0_104] : memref<25x128xf32, #tpu.memory_space<vmem>>, vector<1x128xf32>
    %96 = vector.shape_cast %95 : vector<1x128xf32> to vector<1x1x128xf32>
    %97 = vector.broadcast %96 : vector<1x1x128xf32> to vector<16x8x128xf32>
    %98 = arith.mulf %94, %97 : vector<16x8x128xf32>
    %99 = arith.addf %92, %98 : vector<16x8x128xf32>
    %c3_105 = arith.constant 3 : index
    %c1_106 = arith.constant 1 : index
    %c0_107 = arith.constant 0 : index
    %c0_108 = arith.constant 0 : index
    %100 = vector.load %arg7[%c3_105, %c1_106, %c0_107, %c0_108] : memref<5x20x8x128xf32, #tpu.memory_space<vmem>>, vector<1x16x8x128xf32>
    %101 = vector.shape_cast %100 : vector<1x16x8x128xf32> to vector<16x8x128xf32>
    %c8 = arith.constant 8 : index
    %c0_109 = arith.constant 0 : index
    %102 = vector.load %arg2[%c8, %c0_109] : memref<25x128xf32, #tpu.memory_space<vmem>>, vector<1x128xf32>
    %103 = vector.shape_cast %102 : vector<1x128xf32> to vector<1x1x128xf32>
    %104 = vector.broadcast %103 : vector<1x1x128xf32> to vector<16x8x128xf32>
    %105 = arith.mulf %101, %104 : vector<16x8x128xf32>
    %106 = arith.addf %99, %105 : vector<16x8x128xf32>
    %c4_110 = arith.constant 4 : index
    %c1_111 = arith.constant 1 : index
    %c0_112 = arith.constant 0 : index
    %c0_113 = arith.constant 0 : index
    %107 = vector.load %arg7[%c4_110, %c1_111, %c0_112, %c0_113] : memref<5x20x8x128xf32, #tpu.memory_space<vmem>>, vector<1x16x8x128xf32>
    %108 = vector.shape_cast %107 : vector<1x16x8x128xf32> to vector<16x8x128xf32>
    %c9_114 = arith.constant 9 : index
    %c0_115 = arith.constant 0 : index
    %109 = vector.load %arg2[%c9_114, %c0_115] : memref<25x128xf32, #tpu.memory_space<vmem>>, vector<1x128xf32>
    %110 = vector.shape_cast %109 : vector<1x128xf32> to vector<1x1x128xf32>
    %111 = vector.broadcast %110 : vector<1x1x128xf32> to vector<16x8x128xf32>
    %112 = arith.mulf %108, %111 : vector<16x8x128xf32>
    %113 = arith.addf %106, %112 : vector<16x8x128xf32>
    %c0_116 = arith.constant 0 : index
    %c2_117 = arith.constant 2 : index
    %c0_118 = arith.constant 0 : index
    %c0_119 = arith.constant 0 : index
    %114 = vector.load %arg7[%c0_116, %c2_117, %c0_118, %c0_119] : memref<5x20x8x128xf32, #tpu.memory_space<vmem>>, vector<1x16x8x128xf32>
    %115 = vector.shape_cast %114 : vector<1x16x8x128xf32> to vector<16x8x128xf32>
    %c10 = arith.constant 10 : index
    %c0_120 = arith.constant 0 : index
    %116 = vector.load %arg2[%c10, %c0_120] : memref<25x128xf32, #tpu.memory_space<vmem>>, vector<1x128xf32>
    %117 = vector.shape_cast %116 : vector<1x128xf32> to vector<1x1x128xf32>
    %118 = vector.broadcast %117 : vector<1x1x128xf32> to vector<16x8x128xf32>
    %119 = arith.mulf %115, %118 : vector<16x8x128xf32>
    %120 = arith.addf %113, %119 : vector<16x8x128xf32>
    %c1_121 = arith.constant 1 : index
    %c2_122 = arith.constant 2 : index
    %c0_123 = arith.constant 0 : index
    %c0_124 = arith.constant 0 : index
    %121 = vector.load %arg7[%c1_121, %c2_122, %c0_123, %c0_124] : memref<5x20x8x128xf32, #tpu.memory_space<vmem>>, vector<1x16x8x128xf32>
    %122 = vector.shape_cast %121 : vector<1x16x8x128xf32> to vector<16x8x128xf32>
    %c11 = arith.constant 11 : index
    %c0_125 = arith.constant 0 : index
    %123 = vector.load %arg2[%c11, %c0_125] : memref<25x128xf32, #tpu.memory_space<vmem>>, vector<1x128xf32>
    %124 = vector.shape_cast %123 : vector<1x128xf32> to vector<1x1x128xf32>
    %125 = vector.broadcast %124 : vector<1x1x128xf32> to vector<16x8x128xf32>
    %126 = arith.mulf %122, %125 : vector<16x8x128xf32>
    %127 = arith.addf %120, %126 : vector<16x8x128xf32>
    %c2_126 = arith.constant 2 : index
    %c2_127 = arith.constant 2 : index
    %c0_128 = arith.constant 0 : index
    %c0_129 = arith.constant 0 : index
    %128 = vector.load %arg7[%c2_126, %c2_127, %c0_128, %c0_129] : memref<5x20x8x128xf32, #tpu.memory_space<vmem>>, vector<1x16x8x128xf32>
    %129 = vector.shape_cast %128 : vector<1x16x8x128xf32> to vector<16x8x128xf32>
    %c12 = arith.constant 12 : index
    %c0_130 = arith.constant 0 : index
    %130 = vector.load %arg2[%c12, %c0_130] : memref<25x128xf32, #tpu.memory_space<vmem>>, vector<1x128xf32>
    %131 = vector.shape_cast %130 : vector<1x128xf32> to vector<1x1x128xf32>
    %132 = vector.broadcast %131 : vector<1x1x128xf32> to vector<16x8x128xf32>
    %133 = arith.mulf %129, %132 : vector<16x8x128xf32>
    %134 = arith.addf %127, %133 : vector<16x8x128xf32>
    %c3_131 = arith.constant 3 : index
    %c2_132 = arith.constant 2 : index
    %c0_133 = arith.constant 0 : index
    %c0_134 = arith.constant 0 : index
    %135 = vector.load %arg7[%c3_131, %c2_132, %c0_133, %c0_134] : memref<5x20x8x128xf32, #tpu.memory_space<vmem>>, vector<1x16x8x128xf32>
    %136 = vector.shape_cast %135 : vector<1x16x8x128xf32> to vector<16x8x128xf32>
    %c13 = arith.constant 13 : index
    %c0_135 = arith.constant 0 : index
    %137 = vector.load %arg2[%c13, %c0_135] : memref<25x128xf32, #tpu.memory_space<vmem>>, vector<1x128xf32>
    %138 = vector.shape_cast %137 : vector<1x128xf32> to vector<1x1x128xf32>
    %139 = vector.broadcast %138 : vector<1x1x128xf32> to vector<16x8x128xf32>
    %140 = arith.mulf %136, %139 : vector<16x8x128xf32>
    %141 = arith.addf %134, %140 : vector<16x8x128xf32>
    %c4_136 = arith.constant 4 : index
    %c2_137 = arith.constant 2 : index
    %c0_138 = arith.constant 0 : index
    %c0_139 = arith.constant 0 : index
    %142 = vector.load %arg7[%c4_136, %c2_137, %c0_138, %c0_139] : memref<5x20x8x128xf32, #tpu.memory_space<vmem>>, vector<1x16x8x128xf32>
    %143 = vector.shape_cast %142 : vector<1x16x8x128xf32> to vector<16x8x128xf32>
    %c14 = arith.constant 14 : index
    %c0_140 = arith.constant 0 : index
    %144 = vector.load %arg2[%c14, %c0_140] : memref<25x128xf32, #tpu.memory_space<vmem>>, vector<1x128xf32>
    %145 = vector.shape_cast %144 : vector<1x128xf32> to vector<1x1x128xf32>
    %146 = vector.broadcast %145 : vector<1x1x128xf32> to vector<16x8x128xf32>
    %147 = arith.mulf %143, %146 : vector<16x8x128xf32>
    %148 = arith.addf %141, %147 : vector<16x8x128xf32>
    %c0_141 = arith.constant 0 : index
    %c3_142 = arith.constant 3 : index
    %c0_143 = arith.constant 0 : index
    %c0_144 = arith.constant 0 : index
    %149 = vector.load %arg7[%c0_141, %c3_142, %c0_143, %c0_144] : memref<5x20x8x128xf32, #tpu.memory_space<vmem>>, vector<1x16x8x128xf32>
    %150 = vector.shape_cast %149 : vector<1x16x8x128xf32> to vector<16x8x128xf32>
    %c15 = arith.constant 15 : index
    %c0_145 = arith.constant 0 : index
    %151 = vector.load %arg2[%c15, %c0_145] : memref<25x128xf32, #tpu.memory_space<vmem>>, vector<1x128xf32>
    %152 = vector.shape_cast %151 : vector<1x128xf32> to vector<1x1x128xf32>
    %153 = vector.broadcast %152 : vector<1x1x128xf32> to vector<16x8x128xf32>
    %154 = arith.mulf %150, %153 : vector<16x8x128xf32>
    %155 = arith.addf %148, %154 : vector<16x8x128xf32>
    %c1_146 = arith.constant 1 : index
    %c3_147 = arith.constant 3 : index
    %c0_148 = arith.constant 0 : index
    %c0_149 = arith.constant 0 : index
    %156 = vector.load %arg7[%c1_146, %c3_147, %c0_148, %c0_149] : memref<5x20x8x128xf32, #tpu.memory_space<vmem>>, vector<1x16x8x128xf32>
    %157 = vector.shape_cast %156 : vector<1x16x8x128xf32> to vector<16x8x128xf32>
    %c16 = arith.constant 16 : index
    %c0_150 = arith.constant 0 : index
    %158 = vector.load %arg2[%c16, %c0_150] : memref<25x128xf32, #tpu.memory_space<vmem>>, vector<1x128xf32>
    %159 = vector.shape_cast %158 : vector<1x128xf32> to vector<1x1x128xf32>
    %160 = vector.broadcast %159 : vector<1x1x128xf32> to vector<16x8x128xf32>
    %161 = arith.mulf %157, %160 : vector<16x8x128xf32>
    %162 = arith.addf %155, %161 : vector<16x8x128xf32>
    %c2_151 = arith.constant 2 : index
    %c3_152 = arith.constant 3 : index
    %c0_153 = arith.constant 0 : index
    %c0_154 = arith.constant 0 : index
    %163 = vector.load %arg7[%c2_151, %c3_152, %c0_153, %c0_154] : memref<5x20x8x128xf32, #tpu.memory_space<vmem>>, vector<1x16x8x128xf32>
    %164 = vector.shape_cast %163 : vector<1x16x8x128xf32> to vector<16x8x128xf32>
    %c17 = arith.constant 17 : index
    %c0_155 = arith.constant 0 : index
    %165 = vector.load %arg2[%c17, %c0_155] : memref<25x128xf32, #tpu.memory_space<vmem>>, vector<1x128xf32>
    %166 = vector.shape_cast %165 : vector<1x128xf32> to vector<1x1x128xf32>
    %167 = vector.broadcast %166 : vector<1x1x128xf32> to vector<16x8x128xf32>
    %168 = arith.mulf %164, %167 : vector<16x8x128xf32>
    %169 = arith.addf %162, %168 : vector<16x8x128xf32>
    %c3_156 = arith.constant 3 : index
    %c3_157 = arith.constant 3 : index
    %c0_158 = arith.constant 0 : index
    %c0_159 = arith.constant 0 : index
    %170 = vector.load %arg7[%c3_156, %c3_157, %c0_158, %c0_159] : memref<5x20x8x128xf32, #tpu.memory_space<vmem>>, vector<1x16x8x128xf32>
    %171 = vector.shape_cast %170 : vector<1x16x8x128xf32> to vector<16x8x128xf32>
    %c18_160 = arith.constant 18 : index
    %c0_161 = arith.constant 0 : index
    %172 = vector.load %arg2[%c18_160, %c0_161] : memref<25x128xf32, #tpu.memory_space<vmem>>, vector<1x128xf32>
    %173 = vector.shape_cast %172 : vector<1x128xf32> to vector<1x1x128xf32>
    %174 = vector.broadcast %173 : vector<1x1x128xf32> to vector<16x8x128xf32>
    %175 = arith.mulf %171, %174 : vector<16x8x128xf32>
    %176 = arith.addf %169, %175 : vector<16x8x128xf32>
    %c4_162 = arith.constant 4 : index
    %c3_163 = arith.constant 3 : index
    %c0_164 = arith.constant 0 : index
    %c0_165 = arith.constant 0 : index
    %177 = vector.load %arg7[%c4_162, %c3_163, %c0_164, %c0_165] : memref<5x20x8x128xf32, #tpu.memory_space<vmem>>, vector<1x16x8x128xf32>
    %178 = vector.shape_cast %177 : vector<1x16x8x128xf32> to vector<16x8x128xf32>
    %c19 = arith.constant 19 : index
    %c0_166 = arith.constant 0 : index
    %179 = vector.load %arg2[%c19, %c0_166] : memref<25x128xf32, #tpu.memory_space<vmem>>, vector<1x128xf32>
    %180 = vector.shape_cast %179 : vector<1x128xf32> to vector<1x1x128xf32>
    %181 = vector.broadcast %180 : vector<1x1x128xf32> to vector<16x8x128xf32>
    %182 = arith.mulf %178, %181 : vector<16x8x128xf32>
    %183 = arith.addf %176, %182 : vector<16x8x128xf32>
    %c0_167 = arith.constant 0 : index
    %c4_168 = arith.constant 4 : index
    %c0_169 = arith.constant 0 : index
    %c0_170 = arith.constant 0 : index
    %184 = vector.load %arg7[%c0_167, %c4_168, %c0_169, %c0_170] : memref<5x20x8x128xf32, #tpu.memory_space<vmem>>, vector<1x16x8x128xf32>
    %185 = vector.shape_cast %184 : vector<1x16x8x128xf32> to vector<16x8x128xf32>
    %c20 = arith.constant 20 : index
    %c0_171 = arith.constant 0 : index
    %186 = vector.load %arg2[%c20, %c0_171] : memref<25x128xf32, #tpu.memory_space<vmem>>, vector<1x128xf32>
    %187 = vector.shape_cast %186 : vector<1x128xf32> to vector<1x1x128xf32>
    %188 = vector.broadcast %187 : vector<1x1x128xf32> to vector<16x8x128xf32>
    %189 = arith.mulf %185, %188 : vector<16x8x128xf32>
    %190 = arith.addf %183, %189 : vector<16x8x128xf32>
    %c1_172 = arith.constant 1 : index
    %c4_173 = arith.constant 4 : index
    %c0_174 = arith.constant 0 : index
    %c0_175 = arith.constant 0 : index
    %191 = vector.load %arg7[%c1_172, %c4_173, %c0_174, %c0_175] : memref<5x20x8x128xf32, #tpu.memory_space<vmem>>, vector<1x16x8x128xf32>
    %192 = vector.shape_cast %191 : vector<1x16x8x128xf32> to vector<16x8x128xf32>
    %c21 = arith.constant 21 : index
    %c0_176 = arith.constant 0 : index
    %193 = vector.load %arg2[%c21, %c0_176] : memref<25x128xf32, #tpu.memory_space<vmem>>, vector<1x128xf32>
    %194 = vector.shape_cast %193 : vector<1x128xf32> to vector<1x1x128xf32>
    %195 = vector.broadcast %194 : vector<1x1x128xf32> to vector<16x8x128xf32>
    %196 = arith.mulf %192, %195 : vector<16x8x128xf32>
    %197 = arith.addf %190, %196 : vector<16x8x128xf32>
    %c2_177 = arith.constant 2 : index
    %c4_178 = arith.constant 4 : index
    %c0_179 = arith.constant 0 : index
    %c0_180 = arith.constant 0 : index
    %198 = vector.load %arg7[%c2_177, %c4_178, %c0_179, %c0_180] : memref<5x20x8x128xf32, #tpu.memory_space<vmem>>, vector<1x16x8x128xf32>
    %199 = vector.shape_cast %198 : vector<1x16x8x128xf32> to vector<16x8x128xf32>
    %c22 = arith.constant 22 : index
    %c0_181 = arith.constant 0 : index
    %200 = vector.load %arg2[%c22, %c0_181] : memref<25x128xf32, #tpu.memory_space<vmem>>, vector<1x128xf32>
    %201 = vector.shape_cast %200 : vector<1x128xf32> to vector<1x1x128xf32>
    %202 = vector.broadcast %201 : vector<1x1x128xf32> to vector<16x8x128xf32>
    %203 = arith.mulf %199, %202 : vector<16x8x128xf32>
    %204 = arith.addf %197, %203 : vector<16x8x128xf32>
    %c3_182 = arith.constant 3 : index
    %c4_183 = arith.constant 4 : index
    %c0_184 = arith.constant 0 : index
    %c0_185 = arith.constant 0 : index
    %205 = vector.load %arg7[%c3_182, %c4_183, %c0_184, %c0_185] : memref<5x20x8x128xf32, #tpu.memory_space<vmem>>, vector<1x16x8x128xf32>
    %206 = vector.shape_cast %205 : vector<1x16x8x128xf32> to vector<16x8x128xf32>
    %c23 = arith.constant 23 : index
    %c0_186 = arith.constant 0 : index
    %207 = vector.load %arg2[%c23, %c0_186] : memref<25x128xf32, #tpu.memory_space<vmem>>, vector<1x128xf32>
    %208 = vector.shape_cast %207 : vector<1x128xf32> to vector<1x1x128xf32>
    %209 = vector.broadcast %208 : vector<1x1x128xf32> to vector<16x8x128xf32>
    %210 = arith.mulf %206, %209 : vector<16x8x128xf32>
    %211 = arith.addf %204, %210 : vector<16x8x128xf32>
    %c4_187 = arith.constant 4 : index
    %c4_188 = arith.constant 4 : index
    %c0_189 = arith.constant 0 : index
    %c0_190 = arith.constant 0 : index
    %212 = vector.load %arg7[%c4_187, %c4_188, %c0_189, %c0_190] : memref<5x20x8x128xf32, #tpu.memory_space<vmem>>, vector<1x16x8x128xf32>
    %213 = vector.shape_cast %212 : vector<1x16x8x128xf32> to vector<16x8x128xf32>
    %c24 = arith.constant 24 : index
    %c0_191 = arith.constant 0 : index
    %214 = vector.load %arg2[%c24, %c0_191] : memref<25x128xf32, #tpu.memory_space<vmem>>, vector<1x128xf32>
    %215 = vector.shape_cast %214 : vector<1x128xf32> to vector<1x1x128xf32>
    %216 = vector.broadcast %215 : vector<1x1x128xf32> to vector<16x8x128xf32>
    %217 = arith.mulf %213, %216 : vector<16x8x128xf32>
    %218 = arith.addf %211, %217 : vector<16x8x128xf32>
    %cst_192 = arith.constant 0.000000e+00 : f32
    %219 = vector.broadcast %cst_192 : f32 to vector<16x8x128xf32>
    %220 = arith.maximumf %218, %219 : vector<16x8x128xf32>
    %221 = vector.shape_cast %220 : vector<16x8x128xf32> to vector<128x128xf32>
    %c0_193 = arith.constant 0 : index
    %c0_194 = arith.constant 0 : index
    %222 = vector.load %arg3[%c0_193, %c0_194] : memref<128x128xf32, #tpu.memory_space<vmem>>, vector<128x128xf32>
    %cst_195 = arith.constant dense<0.000000e+00> : vector<128x128xf32>
    %223 = tpu.matmul %221, %222, %cst_195 {dimension_numbers = #tpu.dot_dimension_numbers<[1], [0], [0], [1], [0, 0, 1, 1], [], []>} : vector<128x128xf32>, vector<128x128xf32>, vector<128x128xf32> -> vector<128x128xf32>
    %c0_196 = arith.constant 0 : index
    %c0_197 = arith.constant 0 : index
    %224 = vector.load %arg4[%c0_196, %c0_197] : memref<1x128xf32, #tpu.memory_space<vmem>>, vector<1x128xf32>
    %225 = vector.broadcast %224 : vector<1x128xf32> to vector<128x128xf32>
    %226 = arith.addf %223, %225 : vector<128x128xf32>
    %c0_198 = arith.constant 0 : index
    %c0_199 = arith.constant 0 : index
    %c0_200 = arith.constant 0 : index
    %c0_201 = arith.constant 0 : index
    %227 = vector.load %arg1[%c0_198, %c0_199, %c0_200, %c0_201] : memref<1x16x8x128xf32, #tpu.memory_space<vmem>>, vector<1x16x8x128xf32>
    %228 = vector.shape_cast %227 : vector<1x16x8x128xf32> to vector<16x8x128xf32>
    %229 = vector.shape_cast %228 : vector<16x8x128xf32> to vector<128x128xf32>
    %230 = arith.addf %226, %229 : vector<128x128xf32>
    %c0_202 = arith.constant 0 : index
    %c0_203 = arith.constant 0 : index
    %c0_204 = arith.constant 0 : index
    %231 = vector.load %arg5[%c0_202, %c0_203, %c0_204] : memref<1x128x128xf32, #tpu.memory_space<vmem>>, vector<1x128x128xf32>
    %232 = vector.shape_cast %231 : vector<1x128x128xf32> to vector<128x128xf32>
    %233 = vector.shape_cast %230 : vector<128x128xf32> to vector<1x128x128xf32>
    tpu.vector_store %arg5[%c0_202, %c0_203, %c0_204], %233 {strides = array<i32>} : memref<1x128x128xf32, #tpu.memory_space<vmem>>, vector<1x128x128xf32>,
    return
  }
  func.func @transform_0(%arg0: i32) -> (i32, i32, i32, i32) {
    %c0_i32 = arith.constant 0 : i32
    %c0_i32_0 = arith.constant 0 : i32
    %c0_i32_1 = arith.constant 0 : i32
    %c0_i32_2 = arith.constant 0 : i32
    return %arg0, %c0_i32, %c0_i32_0, %c0_i32_1 : i32, i32, i32, i32
  }
  func.func @transform_1(%arg0: i32) -> (i32, i32) {
    %c0_i32 = arith.constant 0 : i32
    %c0_i32_0 = arith.constant 0 : i32
    %c0_i32_1 = arith.constant 0 : i32
    return %c0_i32, %c0_i32_0 : i32, i32
  }
  func.func @transform_2(%arg0: i32) -> (i32, i32) {
    %c0_i32 = arith.constant 0 : i32
    %c0_i32_0 = arith.constant 0 : i32
    %c0_i32_1 = arith.constant 0 : i32
    return %c0_i32, %c0_i32_0 : i32, i32
  }
  func.func @transform_3(%arg0: i32) -> (i32, i32) {
    %c0_i32 = arith.constant 0 : i32
    %c0_i32_0 = arith.constant 0 : i32
    %c0_i32_1 = arith.constant 0 : i32
    return %c0_i32, %c0_i32_0 : i32, i32
  }
  func.func @transform_4(%arg0: i32) -> (i32, i32, i32) {
    %c0_i32 = arith.constant 0 : i32
    %c0_i32_0 = arith.constant 0 : i32
    %c0_i32_1 = arith.constant 0 : i32
    return %arg0, %c0_i32, %c0_i32_0 : i32, i32, i32
  }
}

</mosaic_0001>

<bundles_post_ra>
// kernel: tpu_custom_call.1
= control target key start
LH: loop header
LB: loop body
LE: loop exit
PB: predicated region body
PF: predicated region fallthrough
CT: control target
= control target key end

     0   :  { %9 = vsyncpa [#allocation5], 0  ;;  %s4924_s0 = inlined_call_operand.hbm [shape: f32[2,16,8,128], index: 0, kind: input, shape index: {}]   ;;  %s4925_s1 = inlined_call_operand.hbm [shape: f32[25,128], index: 1, kind: input, shape index: {}]   ;;  %s4926_s2 = inlined_call_operand.hbm [shape: f32[128,128], index: 2, kind: input, shape index: {}]   ;;  %s4927_s3 = inlined_call_operand.vmem [shape: f32[1,128], index: 3, kind: input, shape index: {}]   ;;  %s4928_s4 = inlined_call_operand.hbm [shape: f32[2,128,128], index: 4, kind: output, shape index: {}]  }
   0x1   :  { %11 = vsyncpa [#allocation5 + $0x1], 0 }
   0x2   :  { %12 = vsyncpa [#allocation8], 0 }
   0x3   :  { %13 = vsyncpa [#allocation6], 0 }
   0x4   :  { %15 = vsyncpa [#allocation6 + $0x1], 0  ;;  %s2669_s15 = smov 0   ;;  %s2671_s16 = smov 0  }
   0x5   :  { %s2673_s17 = smov 0   ;;  %s2675_s18 = smov 0  }
   0x6 LB: > { %s2690_s19 = sadd.s32 4294967295, %s2634_s18   ;;  %s2239_s20 = sadd.s32 4294967294, %s2634_s18   ;;  %s2634_s18 = sphi %s2675_s18, %s5401_s18   ;;  %s2630_s17 = sphi %s2673_s17, %s5400_s17   ;;  %s2626_s16 = sphi %s2671_s16, %s5399_s16   ;;  %s2622_s15 = sphi %s2669_s15, %s5398_s15  }
   0x7   : > { %p41_p0 = scmp.ne.s32.totalorder %s2626_s16, %s2622_s15  ;;  %p42_p1 = scmp.eq.s32.totalorder %s2690_s19, 0 }
   0x8   : > { %p128_p2 = scmp.eq.s32.totalorder %s2690_s19, 1  ;;  %p134_p3 = scmp.eq.s32.totalorder %s2239_s20, 1 }
   0x9   : > { %p2699_p4 = por %p42_p1, %p41_p0  ;;  %p2240_p5 = scmp.ge.s32.totalorder %s2634_s18, 1 }
   0xa   : > { %p2704_p6 = por %p134_p3, %p41_p0  ;;  %p141_p7 = scmp.lt.s32.totalorder %s2634_s18, 3 }
   0xb   : > { %s152_s25 = sshll.u32 %s4925_s1, 4  ;;  %s2636_s27 = smov [#allocation7]   ;;  %s153_s25 = int_to_ptr.hbm [resolvable:$true] %s152_s25 }
   0xc   : > { %p2712_p8 = pnand %p2240_p5, %p141_p7  ;;  %s154_s28 = sshll.u32 %s2636_s27, 4  ;;  %s155_s28 = int_to_ptr.vmem [resolvable:$true] %s154_s28 }
   0xd   : > { %s166_s5 = sshll.u32 %s4926_s2, 4  ;;  %s2637_s6 = smov 128   ;;  %s167_s5 = int_to_ptr.hbm [resolvable:$true] %s166_s5 }
   0xe   : > { %p2319_p9 = pneg %p2712_p8  ;;  %s2638_s7 = smov 8  }
   0xf   : > { %s2639_s8 = smov [#allocation9]   ;;  %s2731_s10 = sadd.s32 1, %s2634_s18  }
  0x10   : > { %p2320_p10 = pnand %p2319_p9, %p42_p1  ;;  %s168_s9 = sshll.u32 %s2639_s8, 4  ;;  %s169_s9 = int_to_ptr.vmem [resolvable:$true] %s168_s9 }
  0x11   : > { %s28_s11 = sadd.s32 1, %s2630_s17  ;;  %s25_s12 = ssub.s32 %s2634_s18, %s2731_s10 }
  0x12   : > { %2322 = dma.hbm_to_vmem [thread:$0]  (!%p2320_p10), %s153_s25, 512, %s155_s28, [#allocation8], %s2637_s6, %s2637_s6, %s2638_s7  }
  0x13   : > { %2325 = dma.hbm_to_vmem [thread:$0]  (!%p2320_p10), %s167_s5, 2048, %s169_s9, [#allocation8], %s2637_s6, %s2637_s6, %s2638_s7  }
  0x14   : > { %p35_p12 = scmp.ne.s32.totalorder %s2630_s17, %s2626_s16  ;;  %p26_p13 = scmp.eq.s32.totalorder %s25_s12, 0 }
  0x15   : > { %p36_p0 = scmp.eq.s32.totalorder %s2634_s18, 0  ;;  %p2336_p5 = scmp.lt.s32.totalorder %s2634_s18, 2 }
  0x16   : > { %p2741_p3 = por %p128_p2, %p35_p12  ;;  %s185_s20 = sand.u32 1, %s2630_s17  }
  0x17   : > { %s2747_s14 = scalar_select %p26_p13, %s2630_s17, %s28_s11  }
  0x18   : > { %p37_p7 = por %p36_p0, %p35_p12  ;;  %s2244_s23 = sshll.u32 %s185_s20, 7 }
  0x19   : > { %s2257_s24 = sshll.u32 %s2634_s18, 7  ;;  %s189_s29 = scalar_lea.vmem [#allocation4], %s2244_s23 }
  0x1a   : > { %s194_s28 = scalar_lea.hbm %s4924_s0, %s2257_s24  ;;  %s197_s30 = sshll.u32 %s189_s29, 4  ;;  %s198_s30 = int_to_ptr.vmem [resolvable:$true] %s197_s30 }
  0x1b   : > { %s195_s5 = sshll.u32 %s194_s28, 4  ;;  %p2754_p2 = pnand %p2336_p5, %p37_p7  ;;  %s196_s5 = int_to_ptr.hbm [resolvable:$true] %s195_s5 }
  0x1c   : > { %s186_s9 = scalar_lea.sflag [#allocation5], %s185_s20  ;;  %s2534_s11 = sshra.s32 %s196_s5, 4  ;;  %s2535_s11 = int_to_ptr.hbm [resolvable:$true] %s2534_s11 }
  0x1d   : > { %s2536_s12 = scalar_lea.hbm %s2535_s11, 128  ;;  %p2538_p10 = pneg %p2754_p2 }
  0x1e   : > { %p2537_p9 = scmp.ne.s32.totalorder %s2535_s11, %s2536_s12  ;;  %s2541_s25 = scalar_lea.hbm %s4924_s0, 256 }
  0x1f   : > { %p2542_p0 = scmp.lt.s32.totalorder %s2535_s11, %s4924_s0  ;;  %p2543_p5 = scmp.lt.s32.totalorder %s2541_s25, %s2536_s12 }
  0x20   : > { %p2539_p12 = pnand %p2538_p10, %p2537_p9 }
  0x21   : > { %p2544_p7 = por %p2543_p5, %p2542_p0 }
  0x22   : > { %p2540_p13 = pneg %p2539_p12 }
  0x24   : > { %p2545_p11 = pnand %p2544_p7, %p2540_p13 }
  0x26   : > { %2548 = shalt.err (!%p2545_p11)
}
  0x27   : > { %2329 = dma.hbm_to_vmem [thread:$0]  (!%p2754_p2), %s196_s5, 2048, %s198_s30, %s186_s9, %s2637_s6, %s2637_s6, %s2638_s7  }
  0x28   : > { %209 = sbr.rel (%p2712_p8) target bundleno = 609 (0x261), region = 36 }
  0x2d   : > { %s2774_s20 = sand.u32 1, %s2626_s16  }
  0x2e   : > { %s2248_s29 = sshll.u32 %s2774_s20, 7  ;;  %s212_s11 = scalar_lea.sflag [#allocation5], %s2774_s20 }
  0x2f   : > { %s2780_s12 = scalar_lea.vmem [#allocation4], %s2248_s29 }
  0x30   : > { %2609 = dma.done.wait (%p2699_p4), %s212_s11, 2048  }
  0x31   : > { %2611 = vsyncadd (%p2699_p4), %s212_s11, 4294965248 }
  0x32   : > { %2613 = dma.done.wait (%p42_p1), [#allocation8], 2560  }
  0x33   : > { %2615 = vsyncadd (%p42_p1), [#allocation8], 4294964736  ;;  %v4929_v0 = vmov 0.0   ;;  %s2641_s26 = smov 64   ;;  %v2800_v1 = vld [vmem:[%s2780_s12 + $0x30] sm:$0xff]  ;;  %v2851_v5 = vld [vmem:[%s2780_s12 + $0x58] sm:$0xff]  ;;  %v447_v38 = vlaneseq }
  0x34   : > { %251 = vst [vmem:[#allocation2] sm:$0xff] %v4929_v0  ;;  %470 = vrot.lane.b32.xlu0 %v4929_v0, %s2641_s26  ;;  %546 = vrot.lane.b32.xlu1 %v2800_v1, %s2641_s26  ;;  %v2818_v3 = vld [vmem:[%s2780_s12 + $0x50] sm:$0xff]  ;;  %v2855_v6 = vld [vmem:[%s2780_s12 + $0x38] sm:$0xff]  ;;  %v2989_v37 = vld [vmem:[#allocation7] ss:$0 sm:$0xff]  ;;  %s4842_s7 = scalar_lea.vmem [#allocation10], %s2248_s29 }
  0x35   : > { %252 = vst [vmem:[#allocation2 + $0x8] sm:$0x3] %v4929_v0  ;;  %v2847_v4 = vld [vmem:[%s2780_s12 + $0x10] sm:$0xff]  ;;  %v2865_v9 = vld [vmem:[%s2780_s12 + $0x18] sm:$0xff]  ;;  %v2883_v14 = vld [vmem:[%s2780_s12 + $0x40] sm:$0xff]  ;;  %v2997_v40 = vand.u32 127, %v447_v38 }
  0x36   : > { %253 = vst [vmem:[#allocation2 + $0x10] sm:$0xff] %v4929_v0  ;;  %v2901_v16 = vld [vmem:[%s2780_s12 + $0x60] sm:$0xff]  ;;  %v2939_v26 = vld [vmem:[%s2780_s12 + $0x48] sm:$0xff]  ;;  %v307_v43 = vld [vmem:[%s2780_s12 + $0x70] sm:$0xff]  ;;  %v3005_v45 = vmul.f32 0.0, %v2989_v37  ;;  %s2258_s30 = sshll.u32 %s2690_s19, 7 }
  0x37   : > { %254 = vst [vmem:[#allocation2 + $0x18] sm:$0x3] %v4929_v0  ;;  %v2921_v22 = vld [vmem:[%s2780_s12] sm:$0xff]  ;;  %v2957_v28 = vld [vmem:[%s2780_s12 + $0x68] sm:$0xff]  ;;  %vm449_vm0 = vcmp.lt.s32.totalorder %v2997_v40, 64  ;;  %v3040_v56 = vld [vmem:[%s2780_s12 + $0x78] sm:$0xff]  ;;  %s2143_s9 = scalar_lea.hbm %s4928_s4, %s2258_s30 }
  0x38   : > { %256 = vst [vmem:[#allocation2 + $0x120] sm:$0xff] %v4929_v0  ;;  %v2924_v23 = vld [vmem:[%s2780_s12 + $0x20] sm:$0xff]  ;;  %v294_v34 = vld [vmem:[%s2780_s12 + $0x8] sm:$0xff]  ;;  %s2144_s24 = sshll.u32 %s4842_s7, 4  ;;  %s2146_s23 = sshll.u32 %s2143_s9, 4  ;;  %s2145_s24 = int_to_ptr.vmem [resolvable:$true] %s2144_s24  ;;  %s2147_s23 = int_to_ptr.hbm [resolvable:$true] %s2146_s23 }
  0x39   : > { %257 = vst [vmem:[#allocation2 + $0x128] sm:$0x3] %v4929_v0  ;;  %v2978_v35 = vld [vmem:[%s2780_s12 + $0x28] sm:$0xff]  ;;  %v2999_v41 = vld [vmem:[#allocation7 + $0x1] ss:$0 sm:$0xff]  ;;  %s2132_s19 = scalar_lea.sflag [#allocation6], %s2774_s20 }
  0x3a   : > { %258 = vst [vmem:[#allocation2 + $0x130] sm:$0xff] %v4929_v0  ;;  %v3002_v44 = vld [vmem:[#allocation7 + $0x2] ss:$0 sm:$0xff]  ;;  %s2578_s25 = sshra.s32 %s2147_s23, 4  ;;  %s2584_s11 = scalar_lea.hbm %s4928_s4, 256  ;;  %s2579_s25 = int_to_ptr.hbm [resolvable:$true] %s2578_s25 }
  0x3b   : > { %259 = vst [vmem:[#allocation2 + $0x138] sm:$0x3] %v4929_v0  ;;  %s2580_s27 = scalar_lea.hbm %s2579_s25, 128  ;;  %p2585_p11 = scmp.lt.s32.totalorder %s2579_s25, %s4928_s4 }
  0x3c   : > { %261 = vst [vmem:[#allocation2 + $0x20] sm:$0x1] %v4929_v0  ;;  %v2806_v2 = vld [vmem:[#allocation2 + $0x1] sm:$0xff]  ;;  %554 = vrot.lane.b32.xlu1 %v2818_v3, %s2641_s26  ;;  %p2581_p1 = scmp.ne.s32.totalorder %s2579_s25, %s2580_s27  ;;  %p2586_p2 = scmp.lt.s32.totalorder %s2584_s11, %s2580_s27 }
  0x3d   : > { %262 = vst [vmem:[#allocation2 + $0x30] sm:$0x1] %v4929_v0  ;;  %530 = vrot.lane.b32.xlu2 %v2806_v2, %s2641_s26  ;;  %v2904_v17 = vld [vmem:[#allocation2 + $0x2] sm:$0xff]  ;;  %v830_v49 = vmul.f32 %v3002_v44, %v2806_v2 }
  0x3e   : > { %263 = vst [vmem:[#allocation2 + $0x40] sm:$0x1] %v4929_v0  ;;  %v2934_v24 = vld [vmem:[#allocation2 + $0x11] sm:$0xff]  ;;  %p2582_p4 = pnand %p2581_p1, %p2741_p3  ;;  %p2587_p9 = por %p2586_p2, %p2585_p11 }
  0x3f   : > { %264 = vst [vmem:[#allocation2 + $0x50] sm:$0x1] %v4929_v0  ;;  %v2960_v29 = vld [vmem:[#allocation2 + $0x12] sm:$0xff] }
  0x40   : > { %265 = vst [vmem:[#allocation2 + $0x60] sm:$0x1] %v4929_v0  ;;  %p2583_p8 = pneg %p2582_p4 }
  0x41   : > { %266 = vst [vmem:[#allocation2 + $0x70] sm:$0x1] %v4929_v0 }
  0x42   : > { %267 = vst [vmem:[#allocation2 + $0x80] sm:$0x1] %v4929_v0  ;;  %p2588_p10 = pnand %p2587_p9, %p2583_p8 }
  0x43   : > { %268 = vst [vmem:[#allocation2 + $0x90] sm:$0x1] %v4929_v0 }
  0x44   : > { %269 = vst [vmem:[#allocation2 + $0xa0] sm:$0x1] %v4929_v0 }
  0x45   : > { %270 = vst [vmem:[#allocation2 + $0xb0] sm:$0x1] %v4929_v0 }
  0x46   : > { %271 = vst [vmem:[#allocation2 + $0xc0] sm:$0x1] %v4929_v0 }
  0x47   : > { %272 = vst [vmem:[#allocation2 + $0xd0] sm:$0x1] %v4929_v0 }
  0x48   : > { %273 = vst [vmem:[#allocation2 + $0xe0] sm:$0x1] %v4929_v0 }
  0x49   : > { %274 = vst [vmem:[#allocation2 + $0xf0] sm:$0x1] %v4929_v0 }
  0x4a   : > { %275 = vst [vmem:[#allocation2 + $0x100] sm:$0x1] %v4929_v0 }
  0x4b   : > { %276 = vst [vmem:[#allocation2 + $0x110] sm:$0x1] %v4929_v0 }
  0x4c   : > { %277 = vst [vmem:[#allocation2 + $0x29] sm:$0x1] %v4929_v0 }
  0x4d   : > { %278 = vst [vmem:[#allocation2 + $0x39] sm:$0x1] %v4929_v0 }
  0x4e   : > { %279 = vst [vmem:[#allocation2 + $0x49] sm:$0x1] %v4929_v0 }
  0x4f   : > { %280 = vst [vmem:[#allocation2 + $0x59] sm:$0x1] %v4929_v0 }
  0x50   : > { %281 = vst [vmem:[#allocation2 + $0x69] sm:$0x1] %v4929_v0 }
  0x51   : > { %282 = vst [vmem:[#allocation2 + $0x79] sm:$0x1] %v4929_v0 }
  0x52   : > { %283 = vst [vmem:[#allocation2 + $0x89] sm:$0x1] %v4929_v0 }
  0x53   : > { %284 = vst [vmem:[#allocation2 + $0x99] sm:$0x1] %v4929_v0 }
  0x54   : > { %285 = vst [vmem:[#allocation2 + $0xa9] sm:$0x1] %v4929_v0 }
  0x55   : > { %286 = vst [vmem:[#allocation2 + $0xb9] sm:$0x1] %v4929_v0 }
  0x56   : > { %287 = vst [vmem:[#allocation2 + $0xc9] sm:$0x1] %v4929_v0 }
  0x57   : > { %288 = vst [vmem:[#allocation2 + $0xd9] sm:$0x1] %v4929_v0 }
  0x58   : > { %289 = vst [vmem:[#allocation2 + $0xe9] sm:$0x1] %v4929_v0 }
  0x59   : > { %290 = vst [vmem:[#allocation2 + $0xf9] sm:$0x1] %v4929_v0 }
  0x5a   : > { %291 = vst [vmem:[#allocation2 + $0x109] sm:$0x1] %v4929_v0 }
  0x5b   : > { %292 = vst [vmem:[#allocation2 + $0x119] sm:$0x1] %v4929_v0 }
  0x5c   : > { %315 = vst [vmem:[#allocation2 + $0x81] sm:$0xff] %v2800_v1 }
  0x5d   : > { %319 = vst [vmem:[#allocation2 + $0xc1] sm:$0xff] %v2818_v3 }
  0x5e   : > { %311 = vst [vmem:[#allocation2 + $0x41] sm:$0xff] %v2847_v4 }
  0x5f   : > { %320 = vst [vmem:[#allocation2 + $0xd1] sm:$0xff] %v2851_v5 }
  0x60   : > { %316 = vst [vmem:[#allocation2 + $0x91] sm:$0xff] %v2855_v6 }
  0x61   : > { %5021 = vst [vmem:[#allocation14_spill] sm:$0xff] %v2865_v9 }
  0x62   : > { %312 = vst [vmem:[#allocation2 + $0x51] sm:$0xff] %v2865_v9 }
  0x63   : > { %v2860_v7 = vld [vmem:[#allocation2 + $0x80] sm:$0xff]  ;;  %5022 = vst [vmem:[#allocation15_spill] sm:$0xff] %v2883_v14 }
  0x64   : > { %v2862_v8 = vld [vmem:[#allocation2 + $0x82] sm:$0xff]  ;;  %486 = vrot.lane.b32.xlu0 %v2860_v7, %s2641_s26  ;;  %317 = vst [vmem:[#allocation2 + $0xa1] sm:$0xff] %v2883_v14 }
  0x65   : > { %647 = vrot.lane.b32.xlu2 %v2862_v8, %s2641_s26  ;;  %v2872_v10 = vld [vmem:[#allocation2 + $0x40] sm:$0xff]  ;;  %5023 = vst [vmem:[#allocation16_spill] sm:$0xff] %v2901_v16 }
  0x66   : > { %478 = vrot.lane.b32.xlu1 %v2872_v10, %s2641_s26  ;;  %v2876_v11 = vld [vmem:[#allocation2 + $0xc0] sm:$0xff]  ;;  %v2892_v15 = vld [vmem:[#allocation2 + $0xd0] sm:$0xff]  ;;  %321 = vst [vmem:[#allocation2 + $0xe1] sm:$0xff] %v2901_v16 }
  0x67   : > { %v2878_v12 = vld [vmem:[#allocation2 + $0xc2] sm:$0xff]  ;;  %v2880_v13 = vld [vmem:[#allocation2 + $0x90] sm:$0xff]  ;;  %5024 = vst [vmem:[#allocation17_spill] sm:$0xff] %v2924_v23 }
  0x68   : > { %v2906_v18 = vld [vmem:[#allocation2 + $0x92] sm:$0xff]  ;;  %v2914_v19 = vld [vmem:[#allocation2 + $0x42] sm:$0xff]  ;;  %309 = vst [vmem:[#allocation2 + $0x21] sm:$0xff] %v2921_v22 }
  0x69   : > { %v2916_v20 = vld [vmem:[#allocation2 + $0xd2] sm:$0xff]  ;;  %313 = vst [vmem:[#allocation2 + $0x61] sm:$0xff] %v2924_v23 }
  0x6a   : > { %v2918_v21 = vld [vmem:[#allocation2 + $0x50] sm:$0xff]  ;;  %5025 = vst [vmem:[#allocation18_spill] sm:$0xff] %v2939_v26 }
  0x6b   : > { %v2936_v25 = vld [vmem:[#allocation2 + $0xa0] sm:$0xff]  ;;  %318 = vst [vmem:[#allocation2 + $0xb1] sm:$0xff] %v2939_v26  ;;  %v2970_v31 = vld [vmem:[#allocation2 + $0x52] sm:$0xff] }
  0x6c   : > { %494 = vrot.lane.b32.xlu0 %v2876_v11, %s2641_s26  ;;  %5026 = vst [vmem:[#allocation19_spill] sm:$0xff] %v2957_v28  ;;  %v2962_v30 = vld [vmem:[#allocation2 + $0xa2] sm:$0xff] }
  0x6d   : > { %655 = vrot.lane.b32.xlu2 %v2878_v12, %s2641_s26  ;;  %v2948_v27 = vld [vmem:[#allocation2 + $0xe0] sm:$0xff]  ;;  %322 = vst [vmem:[#allocation2 + $0xf1] sm:$0xff] %v2957_v28 }
  0x6e   : > { %488 = vrot.lane.b32.xlu1 %v2880_v13, %s2641_s26  ;;  %5027 = vst [vmem:[#allocation20_spill] sm:$0xff] %v2962_v30  ;;  %v2972_v32 = vld [vmem:[#allocation2 + $0xe2] sm:$0xff] }
  0x6f   : > { %5028 = vst [vmem:[#allocation21_spill] sm:$0xff] %v2970_v31  ;;  %v2987_v36 = vld [vmem:[#allocation2 + $0x20] sm:$0xff] }
  0x70   : > { %5029 = vst [vmem:[#allocation22_spill] sm:$0xff] %v2972_v32  ;;  %v2974_v33 = vld [vmem:[#allocation2 + $0x60] sm:$0xff] }
  0x71   : > { %5030 = vst [vmem:[#allocation23_spill] sm:$0xff] %v2974_v33  ;;  %v3029_v53 = vld [vmem:[#allocation2 + $0x22] sm:$0xff] }
  0x72   : > { %310 = vst [vmem:[#allocation2 + $0x31] sm:$0xff] %v294_v34  ;;  %v2991_v39 = vld [vmem:[#allocation2 + $0xb0] sm:$0xff]  ;;  %v3050_v59 = vld [vmem:[#allocation2 + $0x62] sm:$0xff] }
  0x73   : > { %314 = vst [vmem:[#allocation2 + $0x71] sm:$0xff] %v2978_v35  ;;  %v3033_v55 = vld [vmem:[#allocation2 + $0xb2] sm:$0xff] }
  0x74   : > { %538 = vrot.lane.b32.xlu0 %v2847_v4, %s2641_s26  ;;  %5031 = vst [vmem:[#allocation24_spill] sm:$0xff] %v2991_v39  ;;  %v3018_v50 = vld [vmem:[#allocation2 + $0xf0] sm:$0xff] }
  0x75   : > { %496 = vrot.lane.b32.xlu2 %v2892_v15, %s2641_s26  ;;  %5032 = vst [vmem:[#allocation25_spill] sm:$0xff] %v3002_v44  ;;  %v3052_v60 = vld [vmem:[#allocation2 + $0xf2] sm:$0xff] }
  0x76   : > { %556 = vrot.lane.b32.xlu1 %v2851_v5, %s2641_s26  ;;  %323 = vst [vmem:[#allocation2 + $0x101] sm:$0xff] %v307_v43 }
  0x77   : > { %5033 = vst [vmem:[#allocation26_spill] sm:$0xff] %v3005_v45 }
  0x78   : > { %5034 = vst [vmem:[#allocation27_spill] sm:$0xff] %v3018_v50 }
  0x79   : > { %5035 = vst [vmem:[#allocation28_spill] sm:$0xff] %v3033_v55  ;;  %v3069_v38 = vld [vmem:[#allocation2 + $0x30] sm:$0xff] }
  0x7a   : > { %324 = vst [vmem:[#allocation2 + $0x111] sm:$0xff] %v3040_v56  ;;  %v3054_v61 = vld [vmem:[#allocation2 + $0x70] sm:$0xff] }
  0x7b   : > { %5037 = vst [vmem:[#allocation30_spill] sm:$0xff] %v3050_v59 }
  0x7c   : > { %548 = vrot.lane.b32.xlu0 %v2855_v6, %s2641_s26  ;;  %5038 = vst [vmem:[#allocation31_spill] sm:$0xff] %v3052_v60 }
  0x7d   : > { %631 = vrot.lane.b32.xlu2 %v2904_v17, %s2641_s26  ;;  %5039 = vst [vmem:[#allocation32_spill] sm:$0xff] %v3054_v61 }
  0x7e   : > { %649 = vrot.lane.b32.xlu1 %v2906_v18, %s2641_s26  ;;  %5040 = vst [vmem:[#allocation33_spill] sm:$0xff] %v3069_v38 }
  0x84   : > { %639 = vrot.lane.b32.xlu0 %v2914_v19, %s2641_s26 }
  0x85   : > { %657 = vrot.lane.b32.xlu2 %v2916_v20, %s2641_s26 }
  0x86   : > { %480 = vrot.lane.b32.xlu1 %v2918_v21, %s2641_s26 }
  0x8c   : > { %472 = vrot.lane.b32.xlu0 %v4929_v0, %s2641_s26 }
  0x8d   : > { %532 = vrot.lane.b32.xlu2 %v2934_v24, %s2641_s26 }
  0x8e   : > { %490 = vrot.lane.b32.xlu1 %v2936_v25, %s2641_s26 }
  0x94   : > { %540 = vrot.lane.b32.xlu0 %v2865_v9, %s2641_s26 }
  0x95   : > { %498 = vrot.lane.b32.xlu2 %v2948_v27, %s2641_s26 }
  0x96   : > { %558 = vrot.lane.b32.xlu1 %v2901_v16, %s2641_s26 }
  0x97   : > { %v3007_v46 = vpop.permute.xlu2 %530 }
  0x9c   : > { %550 = vrot.lane.b32.xlu0 %v2883_v14, %s2641_s26 }
  0x9d   : > { %633 = vrot.lane.b32.xlu2 %v2960_v29, %s2641_s26 }
  0x9e   : > { %651 = vrot.lane.b32.xlu1 %v2962_v30, %s2641_s26  ;;  %v422_v30 = vld [vmem:[#allocation2 + $0x102] sm:$0xff] }
  0xa4   : > { %641 = vrot.lane.b32.xlu0 %v2970_v31, %s2641_s26 }
  0xa5   : > { %659 = vrot.lane.b32.xlu2 %v2972_v32, %s2641_s26 }
  0xa6   : > { %482 = vrot.lane.b32.xlu1 %v2974_v33, %s2641_s26  ;;  %v471_v42 = vpop.permute.xlu0 %470  ;;  %v3031_v54 = vpop.permute.xlu1 %546 }
  0xa7   : > { %v570_v47 = vsel %vm449_vm0, %v471_v42, %v3007_v46  ;;  %v3071_v42 = vld [vmem:[#allocation2 + $0x100] sm:$0xff] }
  0xa8   : > { %v780_v48 = vmul.f32 %v2999_v41, %v570_v47  ;;  %5041 = vst [vmem:[#allocation34_spill] sm:$0xff] %v3071_v42 }
  0xaa   : > { %v796_v51 = vadd.f32 %v780_v48, %v3005_v45  ;;  %v3080_v48 = vld [vmem:[#allocation7 + $0x7] ss:$0 sm:$0xff]  ;;  %v743_v45 = vmul.f32 %v2989_v37, %v2892_v15 }
  0xab   : > { %5042 = vst [vmem:[#allocation35_spill] sm:$0xff] %v3080_v48 }
  0xac   : > { %474 = vrot.lane.b32.xlu0 %v2987_v36, %s2641_s26  ;;  %v3025_v52 = vadd.f32 %v830_v49, %v796_v51  ;;  %v3082_v49 = vld [vmem:[#allocation7 + $0xc] ss:$0 sm:$0xff]  ;;  %v3084_v51 = vld [vmem:[#allocation7 + $0x11] ss:$0 sm:$0xff] }
  0xad   : > { %534 = vrot.lane.b32.xlu2 %v2921_v22, %s2641_s26  ;;  %5043 = vst [vmem:[#allocation36_spill] sm:$0xff] %v3082_v49  ;;  %v3098_v0 = vmul.f32 %v3084_v51, %v2800_v1  ;;  %v3225_v14 = vmul.f32 %v3082_v49, %v2865_v9 }
  0xae   : > { %492 = vrot.lane.b32.xlu1 %v2991_v39, %s2641_s26  ;;  %v3060_v62 = vpop.permute.xlu1 %554  ;;  %5044 = vst [vmem:[#allocation37_spill] sm:$0xff] %v3084_v51 }
  0xaf   : > { %5048 = vst [vmem:[#allocation41_spill] sm:$0xff] %v3098_v0  ;;  %v3118_v0 = vld [vmem:[#allocation7 + $0x9] ss:$0 sm:$0xff] }
  0xb0   : > { %5054 = vst [vmem:[#allocation47_spill] sm:$0xff] %v3118_v0 }
  0xb1   : > { %5078 = vst [vmem:[#allocation71_spill] sm:$0xff] %v3225_v14 }
  0xb4   : > { %542 = vrot.lane.b32.xlu0 %v2924_v23, %s2641_s26 }
  0xb5   : > { %500 = vrot.lane.b32.xlu2 %v3018_v50, %s2641_s26 }
  0xb6   : > { %560 = vrot.lane.b32.xlu1 %v2957_v28, %s2641_s26 }
  0xbc   : > { %552 = vrot.lane.b32.xlu0 %v2939_v26, %s2641_s26  ;;  %v3145_v26 = vmul.f32 %v3082_v49, %v2851_v5 }
  0xbd   : > { %635 = vrot.lane.b32.xlu2 %v3029_v53, %s2641_s26 }
  0xbe   : > { %653 = vrot.lane.b32.xlu1 %v3033_v55, %s2641_s26  ;;  %v3120_v55 = vld [vmem:[#allocation7 + $0xe] ss:$0 sm:$0xff]  ;;  %5060 = vst [vmem:[#allocation53_spill] sm:$0xff] %v3145_v26  ;;  %v3169_v26 = vld [vmem:[#allocation7 + $0xf] ss:$0 sm:$0xff] }
  0xbf   : > { %v648_v57 = vpop.permute.xlu2 %647  ;;  %5055 = vst [vmem:[#allocation48_spill] sm:$0xff] %v3120_v55  ;;  %v3202_v39 = vmul.f32 %v3169_v26, %v2880_v13 }
  0xc0   : > { %v3048_v58 = vsel %vm449_vm0, %v3031_v54, %v648_v57  ;;  %v3086_v57 = vld [vmem:[#allocation7 + $0x4] ss:$0 sm:$0xff]  ;;  %5067 = vst [vmem:[#allocation60_spill] sm:$0xff] %v3169_v26 }
  0xc1   : > { %5036 = vst [vmem:[#allocation29_spill] sm:$0xff] %v3048_v58 }
  0xc2   : > { %5045 = vst [vmem:[#allocation38_spill] sm:$0xff] %v3086_v57 }
  0xc3   : > { %5073 = vst [vmem:[#allocation66_spill] sm:$0xff] %v3202_v39  ;;  %v3221_v39 = vmul.f32 %v3120_v55, %v2916_v20 }
  0xc4   : > { %643 = vrot.lane.b32.xlu0 %v3050_v59, %s2641_s26 }
  0xc5   : > { %661 = vrot.lane.b32.xlu2 %v3052_v60, %s2641_s26  ;;  %v3110_v60 = vmul.f32 %v3084_v51, %v2818_v3  ;;  %5077 = vst [vmem:[#allocation70_spill] sm:$0xff] %v3221_v39  ;;  %v3245_v39 = vmul.f32 %v3084_v51, %v2901_v16 }
  0xc6   : > { %484 = vrot.lane.b32.xlu1 %v3054_v61, %s2641_s26  ;;  %v3102_v61 = vmul.f32 %v3080_v48, %v2818_v3 }
  0xc7   : > { %v656_v63 = vpop.permute.xlu2 %655  ;;  %5051 = vst [vmem:[#allocation44_spill] sm:$0xff] %v3110_v60  ;;  %v3132_v60 = vmul.f32 %v3082_v49, %v2855_v6 }
  0xc8   : > { %v3067_v2 = vsel %vm449_vm0, %v3060_v62, %v656_v63  ;;  %v3090_v63 = vmul.f32 %v3080_v48, %v2800_v1  ;;  %5049 = vst [vmem:[#allocation42_spill] sm:$0xff] %v3102_v61  ;;  %v3124_v61 = vmul.f32 %v3082_v49, %v2847_v4 }
  0xc9   : > { %5058 = vst [vmem:[#allocation51_spill] sm:$0xff] %v3132_v60  ;;  %v3161_v60 = vmul.f32 %v3118_v0, %v2878_v12 }
  0xca   : > { %5046 = vst [vmem:[#allocation39_spill] sm:$0xff] %v3090_v63  ;;  %v3114_v63 = vmul.f32 %v3080_v48, %v2847_v4 }
  0xcb   : > { %5056 = vst [vmem:[#allocation49_spill] sm:$0xff] %v3124_v61  ;;  %v930_v61 = vmul.f32 %v3086_v57, %v2904_v17  ;;  %v3165_v17 = vmul.f32 %v3120_v55, %v2878_v12 }
  0xcc   : > { %476 = vrot.lane.b32.xlu0 %v3069_v38, %s2641_s26  ;;  %5052 = vst [vmem:[#allocation45_spill] sm:$0xff] %v3114_v63  ;;  %v413_v38 = vld [vmem:[#allocation2 + $0x72] sm:$0xff]  ;;  %v3139_v63 = vmul.f32 %v3084_v51, %v2855_v6 }
  0xcd   : > { %536 = vrot.lane.b32.xlu2 %v294_v34, %s2641_s26  ;;  %v3094_v34 = vmul.f32 %v3082_v49, %v2800_v1  ;;  %5064 = vst [vmem:[#allocation57_spill] sm:$0xff] %v3161_v60 }
  0xce   : > { %502 = vrot.lane.b32.xlu1 %v3071_v42, %s2641_s26  ;;  %v3106_v42 = vmul.f32 %v3082_v49, %v2818_v3  ;;  %5059 = vst [vmem:[#allocation52_spill] sm:$0xff] %v3139_v63  ;;  %v3167_v63 = vld [vmem:[#allocation7 + $0xa] ss:$0 sm:$0xff] }
  0xcf   : > { %v3076_v47 = vpop.permute.xlu2 %496  ;;  %5047 = vst [vmem:[#allocation40_spill] sm:$0xff] %v3094_v34  ;;  %v3116_v34 = vld [vmem:[#allocation7 + $0x5] ss:$0 sm:$0xff] }
  0xd0   : > { %5050 = vst [vmem:[#allocation43_spill] sm:$0xff] %v3106_v42  ;;  %v3128_v42 = vmul.f32 %v3084_v51, %v2847_v4  ;;  %v3181_v60 = vmul.f32 0.0, %v3116_v34 }
  0xd1   : > { %5053 = vst [vmem:[#allocation46_spill] sm:$0xff] %v3116_v34 }
  0xd2   : > { %5057 = vst [vmem:[#allocation50_spill] sm:$0xff] %v3128_v42  ;;  %v3149_v42 = vmul.f32 %v3084_v51, %v2851_v5 }
  0xd3   : > { %5065 = vst [vmem:[#allocation58_spill] sm:$0xff] %v3165_v17  ;;  %v3183_v17 = vld [vmem:[#allocation7 + $0x3] ss:$0 sm:$0xff] }
  0xd4   : > { %544 = vrot.lane.b32.xlu0 %v2978_v35, %s2641_s26  ;;  %5061 = vst [vmem:[#allocation54_spill] sm:$0xff] %v3149_v42  ;;  %v3153_v35 = vmul.f32 %v3118_v0, %v2862_v8 }
  0xd5   : > { %562 = vrot.lane.b32.xlu2 %v307_v43, %s2641_s26  ;;  %v3157_v43 = vmul.f32 %v3120_v55, %v2862_v8  ;;  %5066 = vst [vmem:[#allocation59_spill] sm:$0xff] %v3167_v63 }
  0xd6   : > { %5062 = vst [vmem:[#allocation55_spill] sm:$0xff] %v3153_v35  ;;  %v487_v42 = vpop.permute.xlu0 %486  ;;  %645 = vrot.lane.b32.xlu1 %v413_v38, %s2641_s26  ;;  %v3174_v35 = vmul.f32 %v3118_v0, %v2914_v19  ;;  %v3190_v38 = vmul.f32 %v3167_v63, %v2892_v15 }
  0xd7   : > { %5063 = vst [vmem:[#allocation56_spill] sm:$0xff] %v3157_v43  ;;  %v632_v59 = vpop.permute.xlu2 %631  ;;  %v3178_v43 = vmul.f32 %v3120_v55, %v2914_v19 }
  0xd8   : > { %5068 = vst [vmem:[#allocation61_spill] sm:$0xff] %v3174_v35  ;;  %v671_v28 = vsel %vm449_vm0, %v3007_v46, %v632_v59  ;;  %v3194_v35 = vmul.f32 %v3169_v26, %v2892_v15  ;;  %v3204_v50 = vpop.permute.xlu1 %478  ;;  %v3208_v46 = vmul.f32 %v3120_v55, %v2906_v18  ;;  %v3212_v59 = vmul.f32 %v3167_v63, %v2918_v21 }
  0xd9   : > { %5069 = vst [vmem:[#allocation62_spill] sm:$0xff] %v3178_v43  ;;  %v3198_v43 = vmul.f32 %v3167_v63, %v2880_v13 }
  0xda   : > { %5070 = vst [vmem:[#allocation63_spill] sm:$0xff] %v3190_v38  ;;  %v409_v38 = vld [vmem:[#allocation2 + $0x32] sm:$0xff] }
  0xdb   : > { %5071 = vst [vmem:[#allocation64_spill] sm:$0xff] %v3194_v35  ;;  %v3216_v35 = vmul.f32 %v3169_v26, %v2918_v21 }
  0xdc   : > { %5072 = vst [vmem:[#allocation65_spill] sm:$0xff] %v3198_v43  ;;  %v880_v43 = vmul.f32 %v3183_v17, %v671_v28  ;;  %v3237_v28 = vmul.f32 %v3002_v44, %v2934_v24  ;;  %637 = vrot.lane.b32.xlu0 %v409_v38, %s2641_s26 }
  0xdd   : > { %5074 = vst [vmem:[#allocation67_spill] sm:$0xff] %v3208_v46  ;;  %v3229_v46 = vmul.f32 %v3084_v51, %v2865_v9  ;;  %663 = vrot.lane.b32.xlu2 %v422_v30, %s2641_s26  ;;  %v3283_v30 = vmul.f32 %v3167_v63, %v2987_v36 }
  0xde   : > { %5075 = vst [vmem:[#allocation68_spill] sm:$0xff] %v3212_v59  ;;  %v3233_v59 = vmul.f32 %v3169_v26, %v2936_v25  ;;  %v896_v14 = vadd.f32 %v880_v43, %v3025_v52  ;;  %v3269_v52 = vmul.f32 %v3118_v0, %v2960_v29  ;;  %v3273_v43 = vmul.f32 %v2989_v37, %v2987_v36  ;;  %v495_v38 = vpop.permute.xlu0 %494 }
  0xdf   : > { %5076 = vst [vmem:[#allocation69_spill] sm:$0xff] %v3216_v35  ;;  %v3241_v35 = vmul.f32 %v3080_v48, %v2934_v24  ;;  %v3265_v24 = vmul.f32 %v3086_v57, %v2960_v29  ;;  %v742_v29 = vmul.f32 %v2989_v37, %v2876_v11  ;;  %564 = vrot.lane.b32.xlu1 %v3040_v56, %s2641_s26 }
  0xe0   : > { %5079 = vst [vmem:[#allocation72_spill] sm:$0xff] %v3229_v46  ;;  %v3250_v46 = vmul.f32 %v3169_v26, %v2948_v27 }
  0xe1   : > { %5080 = vst [vmem:[#allocation73_spill] sm:$0xff] %v3233_v59  ;;  %v3254_v59 = vmul.f32 %v3120_v55, %v2970_v31  ;;  %v383_v31 = vld [vmem:[#allocation2 + $0x121] sm:$0xff] }
  0xe2   : > { %5081 = vst [vmem:[#allocation74_spill] sm:$0xff] %v3237_v28  ;;  %v3259_v28 = vsel %vm449_vm0, %v487_v42, %v3031_v54  ;;  %v3279_v54 = vmul.f32 %v3116_v34, %v2987_v36  ;;  %v3287_v42 = vmul.f32 %v3169_v26, %v2974_v33  ;;  %v3301_v36 = vld [vmem:[#allocation7 + $0xd] ss:$0 sm:$0xff]  ;;  %v3344_v33 = vld [vmem:[#allocation2 + $0x112] sm:$0xff]  ;;  %v3471_v16 = vmul.f32 %v3084_v51, %v383_v31 }
  0xe3   : > { %5082 = vst [vmem:[#allocation75_spill] sm:$0xff] %v3241_v35  ;;  %v788_v11 = vmul.f32 %v2999_v41, %v3259_v28 }
  0xe4   : > { %5083 = vst [vmem:[#allocation76_spill] sm:$0xff] %v3245_v39  ;;  %v3291_v39 = vpop.permute.xlu2 %657 }
  0xe5   : > { %5084 = vst [vmem:[#allocation77_spill] sm:$0xff] %v3250_v46  ;;  %v3303_v46 = vld [vmem:[#allocation7 + $0x12] ss:$0 sm:$0xff]  ;;  %665 = vrot.lane.b32.xlu2 %v3344_v33, %s2641_s26 }
  0xe6   : > { %5085 = vst [vmem:[#allocation78_spill] sm:$0xff] %v3254_v59  ;;  %v3275_v59 = vadd.f32 %v930_v61, %v896_v14  ;;  %v3297_v14 = vmul.f32 %v3084_v51, %v2924_v23  ;;  %v3299_v61 = vld [vmem:[#allocation7 + $0x8] ss:$0 sm:$0xff]  ;;  %v3320_v23 = vmul.f32 %v3080_v48, %v2921_v22 }
  0xe7   : > { %5086 = vst [vmem:[#allocation79_spill] sm:$0xff] %v3265_v24  ;;  %566 = vrot.lane.b32.xlu1 %v383_v31, %s2641_s26  ;;  %v5369_v40 = vld [vmem:[#allocation72_spill] sm:$0xff] }
  0xe8   : > { %5087 = vst [vmem:[#allocation80_spill] sm:$0xff] %v3269_v52  ;;  %v888_v52 = vmul.f32 %v3183_v17, %v3048_v58 }
  0xe9   : > { %5088 = vst [vmem:[#allocation81_spill] sm:$0xff] %v3273_v43  ;;  %v3312_v43 = vsel %vm449_vm0, %v495_v38, %v3060_v62  ;;  %v3330_v62 = vmul.f32 %v3082_v49, %v2921_v22  ;;  %v3334_v38 = vmul.f32 %v3086_v57, %v3029_v53 }
  0xea   : > { %5089 = vst [vmem:[#allocation82_spill] sm:$0xff] %v3279_v54  ;;  %v3326_v54 = vpop.permute.xlu1 %488 }
  0xeb   : > { %5090 = vst [vmem:[#allocation83_spill] sm:$0xff] %v3283_v30  ;;  %v842_v30 = vmul.f32 %v3002_v44, %v2818_v3  ;;  %v3342_v3 = vmul.f32 %v3120_v55, %v3029_v53 }
  0xec   : > { %5091 = vst [vmem:[#allocation84_spill] sm:$0xff] %v3287_v42  ;;  %v738_v42 = vmul.f32 %v2989_v37, %v2860_v7  ;;  %v792_v7 = vmul.f32 %v2999_v41, %v3312_v43 }
  0xed   : > { %5092 = vst [vmem:[#allocation85_spill] sm:$0xff] %v3297_v14  ;;  %v3316_v14 = vmul.f32 %v3002_v44, %v2921_v22  ;;  %v838_v22 = vmul.f32 %v3002_v44, %v2800_v1  ;;  %v892_v1 = vmul.f32 %v3183_v17, %v3067_v2 }
  0xee   : > { %5094 = vst [vmem:[#allocation87_spill] sm:$0xff] %v3320_v23  ;;  %v342_v23 = vld [vmem:[#allocation2 + $0x110] sm:$0xff]  ;;  %v804_v24 = vadd.f32 %v788_v11, %v738_v42  ;;  %v3381_v42 = vmul.f32 %v3301_v36, %v3067_v2  ;;  %v942_v11 = vmul.f32 %v3086_v57, %v2878_v12 }
  0xef   : > { %5093 = vst [vmem:[#allocation86_spill] sm:$0xff] %v3316_v14  ;;  %v3338_v14 = vmul.f32 %v3118_v0, %v3029_v53  ;;  %v3360_v53 = vmul.f32 %v3301_v36, %v3048_v58  ;;  %504 = vrot.lane.b32.xlu0 %v342_v23, %s2641_s26 }
  0xf0   : > { %5095 = vst [vmem:[#allocation88_spill] sm:$0xff] %v3330_v62  ;;  %v808_v62 = vadd.f32 %v792_v7, %v742_v29  ;;  %v3377_v7 = vmul.f32 %v3299_v61, %v3067_v2  ;;  %v854_v12 = vadd.f32 %v838_v22, %v804_v24  ;;  %v3428_v22 = vmul.f32 %v3169_v26, %v342_v23 }
  0xf1   : > { %5096 = vst [vmem:[#allocation89_spill] sm:$0xff] %v3334_v38  ;;  %v3352_v38 = vmul.f32 %v3086_v57, %v2862_v8  ;;  %v3371_v8 = vmul.f32 %v3116_v34, %v2880_v13 }
  0xf2   : > { %5097 = vst [vmem:[#allocation90_spill] sm:$0xff] %v3338_v14  ;;  %v3356_v14 = vmul.f32 %v3299_v61, %v3048_v58  ;;  %v858_v29 = vadd.f32 %v842_v30, %v808_v62  ;;  %v3385_v30 = vmul.f32 %v2989_v37, %v2872_v10  ;;  %v3391_v62 = vmul.f32 %v3303_v46, %v3067_v2  ;;  %v557_v35 = vpop.permute.xlu1 %556 }
  0xf3   : > { %5098 = vst [vmem:[#allocation91_spill] sm:$0xff] %v3342_v3  ;;  %v3364_v3 = vmul.f32 %v3303_v46, %v3048_v58  ;;  %v3393_v58 = vpop.permute.xlu0 %538  ;;  %v993_v10 = vmul.f32 %v3116_v34, %v2892_v15  ;;  %v1095_v15 = vmul.f32 %v3080_v48, %v2851_v5 }
  0xf4   : > { %5099 = vst [vmem:[#allocation92_spill] sm:$0xff] %v3356_v14  ;;  %v3399_v14 = vld [vmem:[#allocation7 + $0x16] ss:$0 sm:$0xff] }
  0xf5   : > { %5100 = vst [vmem:[#allocation93_spill] sm:$0xff] %v3360_v53  ;;  %v3397_v53 = vmul.f32 %v3082_v49, %v3040_v56  ;;  %v3425_v24 = vmul.f32 %v3399_v14, %v3040_v56  ;;  %v3468_v49 = vmul.f32 %v3118_v0, %v2916_v20 }
  0xf6   : > { %5101 = vst [vmem:[#allocation94_spill] sm:$0xff] %v3364_v3  ;;  %v908_v3 = vadd.f32 %v892_v1, %v858_v29  ;;  %v3410_v1 = vsel %vm449_vm0, %v3204_v50, %v3393_v58  ;;  %v3414_v29 = vmul.f32 %v3084_v51, %v3040_v56  ;;  %v3432_v50 = vmul.f32 %v2989_v37, %v2880_v13  ;;  %v3450_v13 = vld [vmem:[#allocation7 + $0x10] ss:$0 sm:$0xff] }
  0xf7   : > { %5102 = vst [vmem:[#allocation95_spill] sm:$0xff] %v3377_v7  ;;  %v3421_v7 = vld [vmem:[#allocation7 + $0x6] ss:$0 sm:$0xff]  ;;  %v3446_v56 = vsel %vm449_vm0, %v3076_v47, %v557_v35  ;;  %v3554_v51 = vmul.f32 %v3116_v34, %v2936_v25 }
  0xf8   : > { %5103 = vst [vmem:[#allocation96_spill] sm:$0xff] %v3381_v42  ;;  %v3401_v42 = vpop.permute.xlu2 %532  ;;  %v3462_v47 = vld [vmem:[#allocation2 + $0x122] sm:$0xff] }
  0xf9   : > { %5104 = vst [vmem:[#allocation97_spill] sm:$0xff] %v3391_v62  ;;  %v3419_v62 = vld [vmem:[#allocation7 + $0x14] ss:$0 sm:$0xff]  ;;  %667 = vrot.lane.b32.xlu2 %v3462_v47, %s2641_s26 }
  0xfa   : > { %5105 = vst [vmem:[#allocation98_spill] sm:$0xff] %v3397_v53  ;;  %v3417_v53 = vmul.f32 %v3167_v63, %v342_v23  ;;  %v3480_v9 = vmul.f32 0.0, %v3419_v62 }
  0xfb   : > { %5106 = vst [vmem:[#allocation99_spill] sm:$0xff] %v3401_v42  ;;  %v384_v42 = vld [vmem:[#allocation2 + $0x131] sm:$0xff] }
  0xfc   : > { %5107 = vst [vmem:[#allocation100_spill] sm:$0xff] %v3414_v29  ;;  %v3436_v29 = vmul.f32 %v3002_v44, %v2847_v4  ;;  %v843_v4 = vmul.f32 %v3002_v44, %v2851_v5  ;;  %v3477_v5 = vmul.f32 0.0, %v3169_v26  ;;  %568 = vrot.lane.b32.xlu1 %v384_v42, %s2641_s26  ;;  %v3558_v26 = vmul.f32 %v3167_v63, %v2936_v25 }
  0xfd   : > { %5108 = vst [vmem:[#allocation101_spill] sm:$0xff] %v3417_v53  ;;  %v3439_v53 = vmul.f32 %v3419_v62, %v342_v23  ;;  %v3456_v23 = vmul.f32 %v3086_v57, %v2916_v20  ;;  %v3486_v20 = vmul.f32 %v3086_v57, %v2914_v19  ;;  %v3504_v19 = vmul.f32 %v3421_v7, %v3259_v28 }
  0xfe   : > { %5109 = vst [vmem:[#allocation102_spill] sm:$0xff] %v3419_v62  ;;  %v784_v62 = vmul.f32 %v2999_v41, %v3410_v1 }
  0xff   : > { %5110 = vst [vmem:[#allocation103_spill] sm:$0xff] %v3425_v24  ;;  %v958_v24 = vadd.f32 %v942_v11, %v908_v3  ;;  %v3464_v3 = vld [vmem:[#allocation7 + $0x15] ss:$0 sm:$0xff]  ;;  %v904_v11 = vadd.f32 %v888_v52, %v854_v12  ;;  %v5119_v52 = vmov 0.0   ;;  %v793_v12 = vmul.f32 %v2999_v41, %v3446_v56 }
 0x100   : > { %5111 = vst [vmem:[#allocation104_spill] sm:$0xff] %v3428_v22  ;;  %v3448_v22 = vld [vmem:[#allocation7 + $0xb] ss:$0 sm:$0xff]  ;;  %506 = vrot.lane.b32.xlu0 %v5119_v52, %s2641_s26 }
 0x101   : > { %5112 = vst [vmem:[#allocation105_spill] sm:$0xff] %v3439_v53  ;;  %v1044_v53 = vmul.f32 %v3421_v7, %v3446_v56  ;;  %v1009_v32 = vadd.f32 %v993_v10, %v958_v24  ;;  %v3488_v10 = vld [vmem:[#allocation7 + $0x17] ss:$0 sm:$0xff]  ;;  %v3494_v24 = vmul.f32 %v3002_v44, %v2855_v6 }
 0x102   : > { %5113 = vst [vmem:[#allocation106_spill] sm:$0xff] %v3456_v23  ;;  %v3474_v23 = vmul.f32 %v3399_v14, %v383_v31 }
 0x103   : > { %5114 = vst [vmem:[#allocation107_spill] sm:$0xff] %v3464_v3  ;;  %v1060_v31 = vadd.f32 %v1044_v53, %v1009_v32  ;;  %v3512_v32 = vmul.f32 %v3450_v13, %v3259_v28  ;;  %v549_v53 = vpop.permute.xlu0 %548 }
 0x104   : > { %5115 = vst [vmem:[#allocation108_spill] sm:$0xff] %v3471_v16  ;;  %v3514_v16 = vpop.permute.xlu2 %498 }
 0x105   : > { %5116 = vst [vmem:[#allocation109_spill] sm:$0xff] %v3474_v23  ;;  %v3498_v23 = vmul.f32 %v3080_v48, %v2855_v6  ;;  %v3519_v6 = vmul.f32 %v3488_v10, %v3067_v2  ;;  %v3538_v2 = vmul.f32 %v3086_v57, %v2906_v18 }
 0x106   : > { %5117 = vst [vmem:[#allocation110_spill] sm:$0xff] %v3477_v5  ;;  %v3523_v5 = vmul.f32 %v3464_v3, %v3259_v28 }
 0x107   : > { %5118 = vst [vmem:[#allocation111_spill] sm:$0xff] %v3480_v9  ;;  %v3508_v9 = vmul.f32 %v3448_v22, %v3259_v28  ;;  %v3542_v28 = vmul.f32 %v3118_v0, %v2906_v18  ;;  %v3562_v18 = vmul.f32 %v3421_v7, %v3312_v43 }
 0x108   : > { %5120 = vst [vmem:[#allocation112_spill] sm:$0xff] %v3504_v19  ;;  %v954_v19 = vadd.f32 %v3352_v38, %v904_v11  ;;  %v650_v38 = vpop.permute.xlu1 %649  ;;  %v3546_v11 = vmul.f32 %v3116_v34, %v2918_v21  ;;  %508 = vrot.lane.b32.xlu0 %v5119_v52, %s2641_s26  ;;  %v3615_v52 = vmul.f32 %v3448_v22, %v3446_v56 }
 0x109   : > { %5121 = vst [vmem:[#allocation113_spill] sm:$0xff] %v3508_v9  ;;  %v3528_v9 = vmul.f32 %v3116_v34, %v2948_v27 }
 0x10a   : > { %5122 = vst [vmem:[#allocation114_spill] sm:$0xff] %v3512_v32  ;;  %v3532_v32 = vmul.f32 %v3167_v63, %v2948_v27  ;;  %v3586_v63 = vld [vmem:[#allocation2 + $0x132] sm:$0xff] }
 0x10b   : > { %5123 = vst [vmem:[#allocation115_spill] sm:$0xff] %v3514_v16  ;;  %v3566_v16 = vmul.f32 %v3448_v22, %v3312_v43  ;;  %669 = vrot.lane.b32.xlu2 %v3586_v63, %s2641_s26 }
 0x10c   : > { %5124 = vst [vmem:[#allocation116_spill] sm:$0xff] %v3519_v6  ;;  %v3550_v6 = vadd.f32 %v3181_v60, %v3275_v59  ;;  %v579_v60 = vsel %vm449_vm0, %v3326_v54, %v549_v53  ;;  %v3577_v59 = vmul.f32 %v3464_v3, %v3312_v43  ;;  %v3591_v54 = vmul.f32 %v3421_v7, %v3410_v1 }
 0x10d   : > { %5125 = vst [vmem:[#allocation117_spill] sm:$0xff] %v3523_v5  ;;  %v809_v5 = vadd.f32 %v793_v12, %v743_v45  ;;  %v3570_v45 = vmul.f32 %v3450_v13, %v3312_v43  ;;  %v1005_v12 = vadd.f32 %v3371_v8, %v954_v19  ;;  %v3595_v43 = vmul.f32 %v3448_v22, %v3410_v1 }
 0x10e   : > { %5126 = vst [vmem:[#allocation118_spill] sm:$0xff] %v3562_v18  ;;  %v684_v18 = vsel %vm449_vm0, %v557_v35, %v3291_v39  ;;  %v3599_v8 = vmul.f32 %v3450_v13, %v3410_v1  ;;  %v3605_v39 = vmul.f32 %v3464_v3, %v3410_v1  ;;  %v789_v35 = vmul.f32 %v2999_v41, %v579_v60  ;;  %v634_v1 = vpop.permute.xlu2 %633 }
 0x10f   : > { %5127 = vst [vmem:[#allocation119_spill] sm:$0xff] %v3566_v16  ;;  %v3584_v16 = vmul.f32 %v3399_v14, %v384_v42  ;;  %v1040_v14 = vmul.f32 %v3421_v7, %v579_v60  ;;  %v859_v42 = vadd.f32 %v843_v4, %v809_v5  ;;  %v1146_v19 = vmul.f32 %v3299_v61, %v684_v18 }
 0x110   : > { %5128 = vst [vmem:[#allocation120_spill] sm:$0xff] %v3570_v45  ;;  %v800_v45 = vadd.f32 %v784_v62, %v3385_v30  ;;  %v893_v30 = vmul.f32 %v3183_v17, %v684_v18  ;;  %v1111_v62 = vadd.f32 %v1095_v15, %v1060_v31  ;;  %v3622_v4 = vmul.f32 %v3450_v13, %v3446_v56 }
 0x111   : > { %5129 = vst [vmem:[#allocation121_spill] sm:$0xff] %v3577_v59  ;;  %v3625_v5 = vmul.f32 %v3303_v46, %v684_v18  ;;  %v3634_v31 = vmul.f32 %v3464_v3, %v3446_v56  ;;  %v3650_v56 = vmul.f32 %v3120_v55, %v3344_v33 }
 0x112   : > { %5130 = vst [vmem:[#allocation122_spill] sm:$0xff] %v3584_v16  ;;  %v640_v16 = vpop.permute.xlu0 %639  ;;  %v850_v59 = vadd.f32 %v3436_v29, %v800_v45  ;;  %v1162_v29 = vadd.f32 %v1146_v19, %v1111_v62 }
 0x113   : > { %5131 = vst [vmem:[#allocation123_spill] sm:$0xff] %v3591_v54  ;;  %v3630_v15 = vsel %vm449_vm0, %v3393_v58, %v640_v16  ;;  %v805_v16 = vadd.f32 %v789_v35, %v3432_v50  ;;  %v1056_v58 = vadd.f32 %v1040_v14, %v1005_v12  ;;  %v3666_v12 = vmul.f32 %v2989_v37, %v2936_v25  ;;  %v5144_v35 = vld [vmem:[#allocation14_spill] sm:$0xff] }
 0x114   : > { %5132 = vst [vmem:[#allocation124_spill] sm:$0xff] %v3595_v43  ;;  %v909_v43 = vadd.f32 %v893_v30, %v859_v42  ;;  %v3683_v14 = vmul.f32 %v3488_v10, %v684_v18  ;;  %v3686_v25 = vmul.f32 %v3464_v3, %v579_v60  ;;  %v5149_v42 = vld [vmem:[#allocation106_spill] sm:$0xff] }
 0x115   : > { %5133 = vst [vmem:[#allocation125_spill] sm:$0xff] %v3599_v8  ;;  %v3643_v8 = vpop.permute.xlu1 %480  ;;  %v855_v62 = vadd.f32 %v3494_v24, %v805_v16  ;;  %v1107_v19 = vadd.f32 %v3498_v23, %v1056_v58  ;;  %v5153_v23 = vld [vmem:[#allocation99_spill] sm:$0xff] }
 0x116   : > { %5134 = vst [vmem:[#allocation126_spill] sm:$0xff] %v3605_v39  ;;  %v3618_v39 = vmul.f32 %v3301_v36, %v684_v18  ;;  %v959_v30 = vadd.f32 %v5149_v42, %v909_v43  ;;  %v672_v16 = vsel %vm449_vm0, %v5153_v23, %v634_v1 }
 0x117   : > { %5135 = vst [vmem:[#allocation127_spill] sm:$0xff] %v3615_v52  ;;  %v5158_v52 = vld [vmem:[#allocation74_spill] sm:$0xff] }
 0x118   : > { %5136 = vst [vmem:[#allocation128_spill] sm:$0xff] %v3618_v39  ;;  %v884_v39 = vmul.f32 %v3183_v17, %v3630_v15  ;;  %v1010_v54 = vadd.f32 %v3528_v9, %v959_v30  ;;  %v5163_v9 = vld [vmem:[#allocation21_spill] sm:$0xff] }
 0x119   : > { %5137 = vst [vmem:[#allocation129_spill] sm:$0xff] %v3622_v4  ;;  %v3641_v4 = vsel %vm449_vm0, %v549_v53, %v650_v38  ;;  %v3658_v53 = vmul.f32 %v2989_v37, %v2918_v21  ;;  %v3676_v21 = vmul.f32 %v3450_v13, %v579_v60 }
 0x11a   : > { %5138 = vst [vmem:[#allocation130_spill] sm:$0xff] %v3625_v5  ;;  %v3645_v5 = vld [vmem:[#allocation7 + $0x13] ss:$0 sm:$0xff]  ;;  %v900_v45 = vadd.f32 %v884_v39, %v850_v59  ;;  %v889_v38 = vmul.f32 %v3183_v17, %v3641_v4  ;;  %v1142_v50 = vmul.f32 %v3299_v61, %v3641_v4  ;;  %v3670_v59 = vmul.f32 %v3002_v44, %v5144_v35  ;;  %v473_v18 = vpop.permute.xlu0 %472 }
 0x11b   : > { %5139 = vst [vmem:[#allocation131_spill] sm:$0xff] %v3634_v31  ;;  %v3654_v31 = vmul.f32 %v3645_v5, %v3344_v33  ;;  %v3673_v33 = vmul.f32 %v3448_v22, %v579_v60  ;;  %v3680_v39 = vmul.f32 %v3080_v48, %v5144_v35  ;;  %v3698_v35 = vmul.f32 %v3303_v46, %v3641_v4 }
 0x11c   : > { %5140 = vst [vmem:[#allocation132_spill] sm:$0xff] %v3641_v4  ;;  %v3704_v60 = vmul.f32 %v3645_v5, %v3462_v47  ;;  %v905_v24 = vadd.f32 %v889_v38, %v855_v62  ;;  %v1158_v43 = vadd.f32 %v1142_v50, %v1107_v19  ;;  %v744_v47 = vmul.f32 %v2989_v37, %v2948_v27  ;;  %v5155_v50 = vld [vmem:[#allocation22_spill] sm:$0xff] }
 0x11d   : > { %5141 = vst [vmem:[#allocation133_spill] sm:$0xff] %v3645_v5  ;;  %v3714_v42 = vpop.permute.xlu1 %490  ;;  %v3724_v62 = vmul.f32 %v3086_v57, %v5155_v50  ;;  %v3732_v19 = vmul.f32 %v3118_v0, %v5155_v50  ;;  %v5157_v27 = vld [vmem:[#allocation26_spill] sm:$0xff]  ;;  %v5174_v5 = vld [vmem:[#allocation60_spill] sm:$0xff] }
 0x11e   : > { %5142 = vst [vmem:[#allocation134_spill] sm:$0xff] %v3650_v56  ;;  %v3700_v56 = vpop.permute.xlu2 %659 }
 0x11f   : > { %5143 = vst [vmem:[#allocation135_spill] sm:$0xff] %v3654_v31  ;;  %v1213_v31 = vadd.f32 %v3468_v49, %v1162_v29  ;;  %v571_v49 = vsel %vm449_vm0, %v473_v18, %v5153_v23  ;;  %v5156_v18 = vld [vmem:[#allocation36_spill] sm:$0xff] }
 0x120   : > { %5145 = vst [vmem:[#allocation14_spill] sm:$0xff] %v3673_v33  ;;  %v781_v58 = vmul.f32 %v2999_v41, %v571_v49  ;;  %v1032_v29 = vmul.f32 %v3421_v7, %v571_v49  ;;  %v1209_v33 = vadd.f32 %v3542_v28, %v1158_v43  ;;  %v3763_v28 = vmul.f32 %v3303_v46, %v3630_v15 }
 0x121   : > { %5146 = vst [vmem:[#allocation136_spill] sm:$0xff] %v3676_v21  ;;  %v3694_v21 = vmul.f32 %v3301_v36, %v3641_v4  ;;  %v881_v4 = vmul.f32 %v3183_v17, %v672_v16 }
 0x122   : > { %5147 = vst [vmem:[#allocation137_spill] sm:$0xff] %v3683_v14  ;;  %v797_v49 = vadd.f32 %v781_v58, %v5157_v27  ;;  %v3746_v14 = vmul.f32 %v3120_v55, %v5155_v50  ;;  %v5159_v27 = vld [vmem:[#allocation75_spill] sm:$0xff]  ;;  %v3769_v30 = vpop.permute.xlu0 %540 }
 0x123   : > { %5148 = vst [vmem:[#allocation138_spill] sm:$0xff] %v3686_v25  ;;  %v1134_v25 = vmul.f32 %v3299_v61, %v672_v16  ;;  %v3755_v16 = vmul.f32 %v3299_v61, %v3630_v15  ;;  %v3785_v43 = vsel %vm449_vm0, %v3643_v8, %v3769_v30  ;;  %v5169_v8 = vld [vmem:[#allocation115_spill] sm:$0xff] }
 0x124   : > { %5150 = vst [vmem:[#allocation106_spill] sm:$0xff] %v3694_v21  ;;  %v5154_v21 = vld [vmem:[#allocation16_spill] sm:$0xff]  ;;  %v847_v58 = vadd.f32 %v5158_v52, %v797_v49  ;;  %v5167_v49 = vld [vmem:[#allocation79_spill] sm:$0xff] }
 0x125   : > { %5151 = vst [vmem:[#allocation139_spill] sm:$0xff] %v3698_v35  ;;  %v3720_v38 = vmul.f32 %v3002_v44, %v5154_v21  ;;  %v3728_v1 = vmul.f32 %v3080_v48, %v5154_v21  ;;  %v3736_v23 = vmul.f32 %v5156_v18, %v5154_v21  ;;  %v1048_v35 = vadd.f32 %v1032_v29, %v3550_v6 }
 0x126   : > { %5152 = vst [vmem:[#allocation140_spill] sm:$0xff] %v3704_v60  ;;  %v955_v60 = vadd.f32 %v3538_v2, %v905_v24  ;;  %v950_v21 = vadd.f32 %v3486_v20, %v900_v45  ;;  %v1264_v29 = vadd.f32 %v3532_v32, %v1213_v31  ;;  %v3759_v2 = vmul.f32 %v3301_v36, %v3630_v15  ;;  %v3771_v32 = vpop.permute.xlu2 %534 }
 0x127   : > { %v1099_v6 = vadd.f32 %v5159_v27, %v1048_v35  ;;  %5160 = vst [vmem:[#allocation99_spill] sm:$0xff] %v3755_v16  ;;  %v3767_v20 = vmul.f32 %v3086_v57, %v5163_v9  ;;  %v897_v52 = vadd.f32 %v881_v4, %v847_v58  ;;  %v3775_v31 = vmul.f32 %v3118_v0, %v5163_v9  ;;  %v5166_v35 = vld [vmem:[#allocation15_spill] sm:$0xff]  ;;  %v5168_v27 = vld [vmem:[#allocation80_spill] sm:$0xff] }
 0x128   : > { %5161 = vst [vmem:[#allocation16_spill] sm:$0xff] %v3759_v2  ;;  %v3779_v24 = vmul.f32 %v3002_v44, %v5166_v35  ;;  %v1006_v4 = vadd.f32 %v3554_v51, %v955_v60  ;;  %v3791_v50 = vmul.f32 %v3080_v48, %v5166_v35  ;;  %v1001_v9 = vadd.f32 %v3546_v11, %v950_v21  ;;  %v559_v2 = vpop.permute.xlu1 %558 }
 0x129   : > { %5162 = vst [vmem:[#allocation22_spill] sm:$0xff] %v3763_v28  ;;  %v1150_v45 = vadd.f32 %v1134_v25, %v1099_v6  ;;  %v1260_v25 = vadd.f32 %v3558_v26, %v1209_v33  ;;  %v947_v58 = vadd.f32 %v5167_v49, %v897_v52  ;;  %v1036_v28 = vmul.f32 %v3421_v7, %v3785_v43  ;;  %v5170_v26 = vld [vmem:[#allocation20_spill] sm:$0xff] }
 0x12a   : > { %5164 = vst [vmem:[#allocation26_spill] sm:$0xff] %v3767_v20  ;;  %v3801_v51 = vsel %vm449_vm0, %v5169_v8, %v559_v2  ;;  %v3805_v33 = vmul.f32 %v3086_v57, %v5170_v26  ;;  %v3809_v60 = vmul.f32 %v3118_v0, %v5170_v26  ;;  %v1346_v11 = vmul.f32 %v5156_v18, %v5166_v35  ;;  %v5173_v35 = vld [vmem:[#allocation59_spill] sm:$0xff] }
 0x12b   : > { %5165 = vst [vmem:[#allocation74_spill] sm:$0xff] %v3775_v31  ;;  %v1201_v6 = vadd.f32 %v5168_v27, %v1150_v45  ;;  %v3813_v21 = vadd.f32 %v1036_v28, %v1001_v9  ;;  %v794_v52 = vmul.f32 %v2999_v41, %v3801_v51  ;;  %v3817_v45 = vld [vmem:[#allocation7 + $0x18] ss:$0 sm:$0xff]  ;;  %v3821_v49 = vmul.f32 %v3120_v55, %v5170_v26  ;;  %v5172_v27 = vld [vmem:[#allocation27_spill] sm:$0xff] }
 0x12c   : > { %5171 = vst [vmem:[#allocation75_spill] sm:$0xff] %v3817_v45  ;;  %v3825_v8 = vmul.f32 %v3116_v34, %v5172_v27  ;;  %v1045_v16 = vmul.f32 %v3421_v7, %v3801_v51  ;;  %v1299_v28 = vmul.f32 %v3448_v22, %v3801_v51  ;;  %v3833_v9 = vmul.f32 %v5173_v35, %v5172_v27  ;;  %v5177_v57 = vld [vmem:[#allocation23_spill] sm:$0xff] }
 0x12d   : > { %v3837_v0 = vmul.f32 %v5174_v5, %v5172_v27  ;;  %v810_v26 = vadd.f32 %v794_v52, %v744_v47  ;;  %v3841_v55 = vmul.f32 %v3817_v45, %v3586_v63  ;;  %v3845_v18 = vmul.f32 %v3116_v34, %v5177_v57  ;;  %v551_v63 = vpop.permute.xlu0 %550 }
 0x12e   : > { %v3849_v48 = vmul.f32 %v3488_v10, %v3630_v15  ;;  %v1061_v44 = vadd.f32 %v1045_v16, %v1010_v54  ;;  %v1315_v31 = vadd.f32 %v1299_v28, %v1264_v29  ;;  %v3853_v20 = vmul.f32 %v5173_v35, %v5177_v57  ;;  %v5184_v10 = vld [vmem:[#allocation82_spill] sm:$0xff]  ;;  %v5186_v54 = vld [vmem:[#allocation83_spill] sm:$0xff]  ;;  %v2013_v28 = vld [vmem:[#allocation9 + $0x78] sm:$0xff] }
 0x12f   : > { %5175 = vst [vmem:[#allocation21_spill] sm:$0xff] %v3837_v0  ;;  %v5181_v0 = vld [vmem:[#allocation24_spill] sm:$0xff]  ;;  %v3862_v52 = vsel %vm449_vm0, %v559_v2, %v3700_v56  ;;  %v3867_v15 = vadd.f32 %v5184_v10, %v947_v58  ;;  %v3870_v29 = vadd.f32 %v5186_v54, %v1201_v6  ;;  %v860_v56 = vadd.f32 %v3720_v38, %v810_v26 }
 0x130   : > { %5176 = vst [vmem:[#allocation15_spill] sm:$0xff] %v3841_v55  ;;  %v3857_v47 = vmul.f32 %v3116_v34, %v5181_v0  ;;  %v3864_v55 = vpop.permute.xlu2 %500  ;;  %v3874_v16 = vmul.f32 %v5173_v35, %v5181_v0  ;;  %v1112_v2 = vadd.f32 %v3728_v1, %v1061_v44  ;;  %v3885_v58 = vmul.f32 %v5174_v5, %v5181_v0  ;;  %v652_v45 = vpop.permute.xlu1 %651  ;;  %v3894_v38 = vld [vmem:[#allocation9 + $0x70] sm:$0xff]  ;;  %v3910_v34 = vld [vmem:[#allocation9 + $0x68] sm:$0xff] }
 0x131   : > { %5178 = vst [vmem:[#allocation79_spill] sm:$0xff] %v3845_v18  ;;  %2260 = vmatpush.msra.mxu2 %v2013_v28  ;;  %2261 = vmatpush.msra.mxu3 %v2013_v28  ;;  %v785_v44 = vmul.f32 %v2999_v41, %v3785_v43  ;;  %v894_v1 = vmul.f32 %v3183_v17, %v3862_v52 }
 0x132   : > { %5179 = vst [vmem:[#allocation80_spill] sm:$0xff] %v3849_v48  ;;  %v3879_v48 = vsel %vm449_vm0, %v3714_v42, %v551_v63  ;;  %v1366_v42 = vadd.f32 %v3736_v23, %v1315_v31  ;;  %v1147_v26 = vmul.f32 %v3299_v61, %v3862_v52  ;;  %v3908_v35 = vsel %vm449_vm0, %v551_v63, %v652_v45 }
 0x133   : > { %5180 = vst [vmem:[#allocation115_spill] sm:$0xff] %v3853_v20  ;;  %v790_v6 = vmul.f32 %v2999_v41, %v3879_v48  ;;  %v1041_v10 = vmul.f32 %v3421_v7, %v3879_v48  ;;  %v1295_v54 = vmul.f32 %v3448_v22, %v3879_v48  ;;  %2263 = vmatpush.msra.mxu2 %v3894_v38 }
 0x134   : > { %5182 = vst [vmem:[#allocation20_spill] sm:$0xff] %v3862_v52  ;;  %2264 = vmatpush.msra.mxu3 %v3894_v38  ;;  %v3915_v20 = vmul.f32 %v3448_v22, %v3785_v43  ;;  %v910_v18 = vadd.f32 %v894_v1, %v860_v56  ;;  %v1143_v45 = vmul.f32 %v3299_v61, %v3908_v35 }
 0x135   : > { %5183 = vst [vmem:[#allocation27_spill] sm:$0xff] %v3864_v55  ;;  %v1401_v55 = vmul.f32 %v3301_v36, %v3862_v52  ;;  %v806_v23 = vadd.f32 %v790_v6, %v3666_v12  ;;  %v1057_v31 = vadd.f32 %v1041_v10, %v1006_v4  ;;  %v1311_v5 = vadd.f32 %v1295_v54, %v1260_v25 }
 0x136   : > { %5185 = vst [vmem:[#allocation23_spill] sm:$0xff] %v3867_v15  ;;  %v890_v15 = vmul.f32 %v3183_v17, %v3908_v35  ;;  %2266 = vmatpush.msra.mxu2 %v3910_v34  ;;  %2267 = vmatpush.msra.mxu3 %v3910_v34  ;;  %v801_v63 = vadd.f32 %v785_v44, %v3658_v53  ;;  %v3950_v44 = vld [vmem:[#allocation9 + $0x60] sm:$0xff] }
 0x137   : > { %5187 = vst [vmem:[#allocation24_spill] sm:$0xff] %v3870_v29  ;;  %v1163_v29 = vadd.f32 %v1147_v26, %v1112_v2  ;;  %v1417_v12 = vadd.f32 %v1401_v55, %v1366_v42  ;;  %v856_v4 = vadd.f32 %v3779_v24, %v806_v23  ;;  %v1108_v25 = vadd.f32 %v3791_v50, %v1057_v31  ;;  %v642_v50 = vpop.permute.xlu0 %641 }
 0x138   : > { %5188 = vst [vmem:[#allocation82_spill] sm:$0xff] %v3879_v48  ;;  %v3928_v56 = vmul.f32 %v3450_v13, %v3785_v43  ;;  %v1362_v2 = vadd.f32 %v1346_v11, %v1311_v5  ;;  %v1397_v6 = vmul.f32 %v3301_v36, %v3908_v35  ;;  %2018 = vmatpush.msra.mxu0 %v2013_v28  ;;  %v636_v42 = vpop.permute.xlu2 %635  ;;  %v3959_v1 = vpop.permute.xlu1 %482 }
 0x139   : > { %5189 = vst [vmem:[#allocation83_spill] sm:$0xff] %v3908_v35  ;;  %v3934_v55 = vmul.f32 %v3464_v3, %v3785_v43  ;;  %v3938_v24 = vmul.f32 %v3450_v13, %v3801_v51  ;;  %v906_v10 = vadd.f32 %v890_v15, %v856_v4  ;;  %v1159_v53 = vadd.f32 %v1143_v45, %v1108_v25  ;;  %v5198_v25 = vld [vmem:[#allocation21_spill] sm:$0xff] }
 0x13a   : > { %5190 = vst [vmem:[#allocation141_spill] sm:$0xff] %v3915_v20  ;;  %2259 = vmatpush.msra.mxu1 %v2013_v28  ;;  %v960_v54 = vadd.f32 %v3724_v62, %v910_v18  ;;  %v3943_v5 = vmul.f32 %v3303_v46, %v3862_v52  ;;  %v3948_v11 = vsel %vm449_vm0, %v3769_v30, %v642_v50  ;;  %v5235_v20 = vld [vmem:[#allocation90_spill] sm:$0xff] }
 0x13b   : > { %5191 = vst [vmem:[#allocation142_spill] sm:$0xff] %v3928_v56  ;;  %v1413_v43 = vadd.f32 %v1397_v6, %v1362_v2  ;;  %2019 = vmatpush.msra.mxu0 %v3894_v38  ;;  %v1214_v15 = vadd.f32 %v3732_v19, %v1163_v29  ;;  %v1468_v28 = vadd.f32 %v3746_v14, %v1417_v12  ;;  %v3973_v29 = vld [vmem:[#allocation9 + $0x58] sm:$0xff] }
 0x13c   : > { %5192 = vst [vmem:[#allocation143_spill] sm:$0xff] %v3934_v55  ;;  %v885_v62 = vmul.f32 %v3183_v17, %v3948_v11  ;;  %v1138_v18 = vmul.f32 %v3299_v61, %v3948_v11  ;;  %2269 = vmatpush.msra.mxu2 %v3950_v44  ;;  %v3964_v30 = vmul.f32 %v3464_v3, %v3801_v51 }
 0x13d   : > { %5193 = vst [vmem:[#allocation144_spill] sm:$0xff] %v3938_v24  ;;  %v851_v26 = vadd.f32 %v3670_v59, %v801_v63  ;;  %v1103_v19 = vadd.f32 %v3680_v39, %v3813_v21  ;;  %v3971_v14 = vmul.f32 %v2989_v37, %v5177_v57  ;;  %2270 = vmatpush.msra.mxu3 %v3950_v44  ;;  %v5214_v35 = vld [vmem:[#allocation23_spill] sm:$0xff] }
 0x13e   : > { %5194 = vst [vmem:[#allocation145_spill] sm:$0xff] %v3943_v5  ;;  %v956_v23 = vadd.f32 %v3805_v33, %v906_v10  ;;  %v1210_v31 = vadd.f32 %v3809_v60, %v1159_v53  ;;  %v1464_v51 = vadd.f32 %v3821_v49, %v1413_v43  ;;  %v673_v59 = vsel %vm449_vm0, %v3771_v32, %v636_v42  ;;  %v3991_v33 = vld [vmem:[#allocation9 + $0x50] sm:$0xff]  ;;  %v5202_v53 = vld [vmem:[#allocation26_spill] sm:$0xff]  ;;  %v5217_v5 = vld [vmem:[#allocation115_spill] sm:$0xff] }
 0x13f   : > { %5195 = vst [vmem:[#allocation146_spill] sm:$0xff] %v3948_v11  ;;  %2272 = vmatpush.msra.mxu2 %v3973_v29  ;;  %v3985_v57 = vmul.f32 %v3464_v3, %v3879_v48  ;;  %v901_v39 = vadd.f32 %v885_v62, %v851_v26  ;;  %v1154_v21 = vadd.f32 %v1138_v18, %v1103_v19  ;;  %v5203_v43 = vld [vmem:[#allocation74_spill] sm:$0xff]  ;;  %v5205_v62 = vld [vmem:[#allocation25_spill] sm:$0xff]  ;;  %v5206_v19 = vld [vmem:[#allocation35_spill] sm:$0xff] }
 0x140   : > { %5196 = vst [vmem:[#allocation147_spill] sm:$0xff] %v3964_v30  ;;  %v3989_v12 = vmul.f32 %v2989_v37, %v5181_v0  ;;  %2273 = vmatpush.msra.mxu3 %v3973_v29  ;;  %v3996_v60 = vmul.f32 %v2989_v37, %v5172_v27  ;;  %v3999_v49 = vadd.f32 %v3825_v8, %v960_v54  ;;  %v4018_v8 = vld [vmem:[#allocation9 + $0x48] sm:$0xff]  ;;  %v4045_v26 = vpop.permute.xlu1 %492  ;;  %v4108_v30 = vld [vmem:[#allocation2 + $0xc0] sm:$0xff] }
 0x141   : > { %5197 = vst [vmem:[#allocation148_spill] sm:$0xff] %v3985_v57  ;;  %v4002_v4 = vadd.f32 %v3833_v9, %v1214_v15  ;;  %v4005_v45 = vadd.f32 %v5198_v25, %v1468_v28  ;;  %2275 = vmatpush.msra.mxu2 %v3991_v33  ;;  %v4010_v0 = vmul.f32 %v3301_v36, %v3948_v11  ;;  %v475_v9 = vpop.permute.xlu0 %474  ;;  %v5204_v28 = vld [vmem:[#allocation19_spill] sm:$0xff]  ;;  %v5210_v25 = vld [vmem:[#allocation30_spill] sm:$0xff]  ;;  %v5215_v57 = vld [vmem:[#allocation24_spill] sm:$0xff] }
 0x142   : > { %v4014_v63 = vmul.f32 %v3303_v46, %v3948_v11  ;;  %v882_v37 = vmul.f32 %v3183_v17, %v673_v59  ;;  %v1135_v27 = vmul.f32 %v3299_v61, %v673_v59  ;;  %5201 = vst [vmem:[#allocation150_spill] sm:$0xff] %v4018_v8  ;;  %2276 = vmatpush.msra.mxu3 %v3991_v33  ;;  %v5218_v11 = vld [vmem:[#allocation47_spill] sm:$0xff] }
 0x143   : > { %5199 = vst [vmem:[#allocation21_spill] sm:$0xff] %v4010_v0  ;;  %v1389_v2 = vmul.f32 %v3301_v36, %v673_v59  ;;  %v4023_v6 = vadd.f32 %v3857_v47, %v956_v23  ;;  %v4026_v50 = vadd.f32 %v3874_v16, %v1210_v31  ;;  %v4029_v10 = vadd.f32 %v3885_v58, %v1464_v51  ;;  %v5208_v51 = vld [vmem:[#allocation37_spill] sm:$0xff] }
 0x144   : > { %5200 = vst [vmem:[#allocation149_spill] sm:$0xff] %v4014_v63  ;;  %2278 = vmatpush.msra.mxu2 %v4018_v8  ;;  %v951_v54 = vadd.f32 %v5202_v53, %v901_v39  ;;  %v1205_v42 = vadd.f32 %v5203_v43, %v1154_v21  ;;  %v572_v15 = vsel %vm449_vm0, %v475_v9, %v3771_v32  ;;  %v5207_v32 = vld [vmem:[#allocation36_spill] sm:$0xff]  ;;  %v5209_v39 = vld [vmem:[#allocation17_spill] sm:$0xff]  ;;  %v5211_v9 = vld [vmem:[#allocation38_spill] sm:$0xff] }
 0x145   : > { %v4039_v47 = vmul.f32 %v5205_v62, %v5204_v28  ;;  %2020 = vmatpush.msra.mxu0 %v3910_v34  ;;  %v782_v16 = vmul.f32 %v2999_v41, %v572_v15  ;;  %v1033_v58 = vmul.f32 %v3421_v7, %v572_v15  ;;  %v1287_v18 = vmul.f32 %v3448_v22, %v572_v15  ;;  %v5213_v43 = vld [vmem:[#allocation81_spill] sm:$0xff]  ;;  %v5216_v63 = vld [vmem:[#allocation79_spill] sm:$0xff] }
 0x146   : > { %v4049_v23 = vmul.f32 %v5206_v19, %v5204_v28  ;;  %2279 = vmatpush.msra.mxu3 %v4018_v8  ;;  %v4054_v31 = vmul.f32 %v5207_v32, %v5204_v28  ;;  %v4058_v59 = vmul.f32 %v5208_v51, %v5204_v28  ;;  %v4062_v21 = vmul.f32 %v5205_v62, %v5209_v39 }
 0x147   : > { %v4066_v53 = vmul.f32 %v5211_v9, %v5210_v25  ;;  %2021 = vmatpush.msra.mxu0 %v3950_v44  ;;  %v798_v15 = vadd.f32 %v782_v16, %v5213_v43  ;;  %v1049_v48 = vadd.f32 %v1033_v58, %v5214_v35  ;;  %v1303_v0 = vadd.f32 %v1287_v18, %v5215_v57  ;;  %v5220_v57 = vld [vmem:[#allocation86_spill] sm:$0xff]  ;;  %v5221_v58 = vld [vmem:[#allocation87_spill] sm:$0xff]  ;;  %v5222_v18 = vld [vmem:[#allocation88_spill] sm:$0xff] }
 0x148   : > { %v4074_v28 = vmul.f32 %v5206_v19, %v5209_v39  ;;  %2262 = vmatpush.msra.mxu1 %v3894_v38  ;;  %v4078_v56 = vadd.f32 %v5216_v63, %v951_v54  ;;  %v4081_v24 = vadd.f32 %v5217_v5, %v1205_v42  ;;  %v4085_v55 = vmul.f32 %v5218_v11, %v5210_v25  ;;  %v5223_v54 = vld [vmem:[#allocation48_spill] sm:$0xff]  ;;  %v5225_v42 = vld [vmem:[#allocation18_spill] sm:$0xff] }
 0x149   : > { %5212 = vst [vmem:[#allocation26_spill] sm:$0xff] %v4066_v53  ;;  %v4089_v35 = vmul.f32 %v5207_v32, %v5209_v39  ;;  %2022 = vmatpush.msra.mxu0 %v3973_v29  ;;  %v848_v16 = vadd.f32 %v5220_v57, %v798_v15  ;;  %v1100_v38 = vadd.f32 %v5221_v58, %v1049_v48  ;;  %v5226_v39 = vld [vmem:[#allocation28_spill] sm:$0xff]  ;;  %v5228_v15 = vld [vmem:[#allocation46_spill] sm:$0xff]  ;;  %v4121_v58 = vpop.permute.xlu0 %542 }
 0x14a   : > { %5219 = vst [vmem:[#allocation74_spill] sm:$0xff] %v4085_v55  ;;  %v1354_v63 = vadd.f32 %v5222_v18, %v1303_v0  ;;  %v4097_v5 = vmul.f32 %v5223_v54, %v5210_v25  ;;  %2265 = vmatpush.msra.mxu1 %v3910_v34  ;;  %v4102_v43 = vmul.f32 %v5205_v62, %v5225_v42  ;;  %v4118_v25 = vld [vmem:[#allocation9 + $0x40] sm:$0xff]  ;;  %v5237_v55 = vld [vmem:[#allocation91_spill] sm:$0xff] }
 0x14b   : > { %v4106_v52 = vmul.f32 %v5211_v9, %v5226_v39  ;;  %5227 = vst [vmem:[#allocation25_spill] sm:$0xff] %v4108_v30  ;;  %v4112_v48 = vmul.f32 %v4108_v30, %v5228_v15  ;;  %v4116_v0 = vmul.f32 %v5206_v19, %v5225_v42  ;;  %2023 = vmatpush.msra.mxu0 %v3991_v33  ;;  %v5232_v42 = vld [vmem:[#allocation59_spill] sm:$0xff] }
 0x14c   : > { %5224 = vst [vmem:[#allocation19_spill] sm:$0xff] %v4097_v5  ;;  %v898_v34 = vadd.f32 %v882_v37, %v848_v16  ;;  %v1151_v62 = vadd.f32 %v1135_v27, %v1100_v38  ;;  %v1405_v57 = vadd.f32 %v1389_v2, %v1354_v63  ;;  %2281 = vmatpush.msra.mxu2 %v4118_v25  ;;  %v2407_v27 = vld [vmem:[#allocation2 + $0xb1] sm:$0xff] }
 0x14d   : > { %5229 = vst [vmem:[#allocation35_spill] sm:$0xff] %v4112_v48  ;;  %2282 = vmatpush.msra.mxu3 %v4118_v25  ;;  %v4129_v18 = vsel %vm449_vm0, %v3959_v1, %v4121_v58  ;;  %v4133_v19 = vmul.f32 %v5218_v11, %v5226_v39  ;;  %v4137_v37 = vmul.f32 %v4108_v30, %v5232_v42  ;;  %v4142_v16 = vld [vmem:[#allocation9 + $0x38] sm:$0xff]  ;;  %v4144_v38 = vld [vmem:[#allocation9 + $0x30] sm:$0xff]  ;;  %v561_v48 = vpop.permute.xlu1 %560 }
 0x14e   : > { %5230 = vst [vmem:[#allocation36_spill] sm:$0xff] %v4129_v18  ;;  %v4140_v2 = vmul.f32 %v2407_v27, %v5207_v32  ;;  %2024 = vmatpush.msra.mxu0 %v4018_v8  ;;  %v5234_v1 = vld [vmem:[#allocation89_spill] sm:$0xff]  ;;  %v4149_v5 = vadd.f32 %v5235_v20, %v1151_v62  ;;  %v4152_v53 = vadd.f32 %v5237_v55, %v1405_v57  ;;  %v5240_v32 = vld [vmem:[#allocation60_spill] sm:$0xff]  ;;  %v4172_v62 = vld [vmem:[#allocation9 + $0x28] sm:$0xff] }
 0x14f   : > { %5231 = vst [vmem:[#allocation37_spill] sm:$0xff] %v4133_v19  ;;  %v948_v63 = vadd.f32 %v5234_v1, %v898_v34  ;;  %2284 = vmatpush.msra.mxu2 %v4142_v16  ;;  %v4161_v19 = vmul.f32 %v4108_v30, %v5240_v32  ;;  %v4164_v8 = vmul.f32 %v2407_v27, %v5208_v51  ;;  %v5243_v34 = vld [vmem:[#allocation33_spill] sm:$0xff]  ;;  %v5245_v57 = vld [vmem:[#allocation27_spill] sm:$0xff]  ;;  %v662_v27 = vpop.permute.xlu2 %661 }
 0x150   : > { %5233 = vst [vmem:[#allocation17_spill] sm:$0xff] %v4137_v37  ;;  %v4156_v37 = vmul.f32 %v5223_v54, %v5226_v39  ;;  %v983_v20 = vmul.f32 %v5228_v15, %v5243_v34  ;;  %v4170_v55 = vmul.f32 %v5232_v42, %v5243_v34  ;;  %2285 = vmatpush.msra.mxu3 %v4142_v16 }
 0x151   : > { %5236 = vst [vmem:[#allocation30_spill] sm:$0xff] %v4149_v5  ;;  %v786_v54 = vmul.f32 %v2999_v41, %v4129_v18  ;;  %v1037_v39 = vmul.f32 %v3421_v7, %v4129_v18  ;;  %v585_v51 = vsel %vm449_vm0, %v5245_v57, %v561_v48  ;;  %v4184_v1 = vmul.f32 %v5240_v32, %v5243_v34  ;;  %v5247_v41 = vld [vmem:[#allocation31_spill] sm:$0xff]  ;;  %v2408_v32 = vld [vmem:[#allocation7] ss:$0 sm:$0xff] }
 0x152   : > { %5238 = vst [vmem:[#allocation38_spill] sm:$0xff] %v4152_v53  ;;  %2287 = vmatpush.msra.mxu2 %v4144_v38  ;;  %v1291_v30 = vmul.f32 %v3448_v22, %v4129_v18  ;;  %v4193_v53 = vmul.f32 %v5211_v9, %v5247_v41  ;;  %v4201_v57 = vmul.f32 %v5218_v11, %v5247_v41  ;;  %v4223_v41 = vld [vmem:[#allocation7 + $0x1] ss:$0 sm:$0xff] }
 0x153   : > { %5239 = vst [vmem:[#allocation81_spill] sm:$0xff] %v4156_v37  ;;  %2288 = vmatpush.msra.mxu3 %v4144_v38  ;;  %v4221_v11 = vmul.f32 %v3464_v3, %v4129_v18  ;;  %2268 = vmatpush.msra.mxu1 %v3950_v44  ;;  %v4237_v18 = vadd.f32 %v983_v20, %v948_v63 }
 0x154   : > { %5241 = vst [vmem:[#allocation23_spill] sm:$0xff] %v4161_v19  ;;  %v4189_v19 = vld [vmem:[#allocation9 + $0x20] sm:$0xff]  ;;  %2290 = vmatpush.msra.mxu2 %v4172_v62  ;;  %v1554_v44 = vmul.f32 %v3450_v13, %v585_v51  ;;  %2025 = vmatpush.msra.mxu0 %v4118_v25 }
 0x155   : > { %5242 = vst [vmem:[#allocation24_spill] sm:$0xff] %v4164_v8  ;;  %v5252_v8 = vld [vmem:[#allocation32_spill] sm:$0xff]  ;;  %2291 = vmatpush.msra.mxu3 %v4172_v62  ;;  %v654_v20 = vpop.permute.xlu1 %653  ;;  %2271 = vmatpush.msra.mxu1 %v3973_v29 }
 0x156   : > { %5244 = vst [vmem:[#allocation79_spill] sm:$0xff] %v4170_v55  ;;  %v5248_v55 = vld [vmem:[#allocation34_spill] sm:$0xff]  ;;  %v4209_v37 = vmul.f32 %v2408_v32, %v5252_v8  ;;  %v4213_v9 = vmul.f32 %v5228_v15, %v5252_v8  ;;  %v4231_v8 = vld [vmem:[#allocation9 + $0x18] sm:$0xff]  ;;  %2293 = vmatpush.msra.mxu2 %v4189_v19  ;;  %2026 = vmatpush.msra.mxu0 %v4142_v16 }
 0x157   : > { %5246 = vst [vmem:[#allocation115_spill] sm:$0xff] %v4184_v1  ;;  %v4197_v5 = vmul.f32 %v5228_v15, %v5248_v55  ;;  %v4205_v1 = vmul.f32 %v2408_v32, %v5243_v34  ;;  %v795_v34 = vmul.f32 %v4223_v41, %v585_v51  ;;  %v4229_v32 = vsel %vm449_vm0, %v561_v48, %v662_v27 }
 0x158   : > { %5250 = vst [vmem:[#allocation86_spill] sm:$0xff] %v4201_v57  ;;  %v802_v15 = vadd.f32 %v786_v54, %v3971_v14  ;;  %v4248_v14 = vmul.f32 %v3464_v3, %v585_v51  ;;  %2296 = vmatpush.msra.mxu2 %v4231_v8  ;;  %v1402_v27 = vmul.f32 %v3301_v36, %v4229_v32 }
 0x159   : > { %5249 = vst [vmem:[#allocation47_spill] sm:$0xff] %v4197_v5  ;;  %v4217_v5 = vmul.f32 %v5232_v42, %v5248_v55  ;;  %v1053_v42 = vadd.f32 %v1037_v39, %v4078_v56  ;;  %v553_v55 = vpop.permute.xlu0 %552  ;;  %v4250_v56 = vld [vmem:[#allocation9 + $0x10] sm:$0xff]  ;;  %v811_v54 = vadd.f32 %v795_v34, %v3996_v60  ;;  %v1656_v34 = vmul.f32 %v3303_v46, %v4229_v32 }
 0x15a   : > { %5251 = vst [vmem:[#allocation87_spill] sm:$0xff] %v4205_v1  ;;  %v1046_v1 = vmul.f32 %v3421_v7, %v585_v51  ;;  %v4244_v48 = vsel %vm449_vm0, %v4045_v26, %v553_v55  ;;  %v895_v26 = vmul.f32 %v3183_v17, %v4229_v32  ;;  %2299 = vmatpush.msra.mxu2 %v4250_v56 }
 0x15b   : > { %5253 = vst [vmem:[#allocation88_spill] sm:$0xff] %v4209_v37  ;;  %v1307_v37 = vadd.f32 %v1291_v30, %v4081_v24  ;;  %v791_v63 = vmul.f32 %v4223_v41, %v4244_v48  ;;  %v1042_v24 = vmul.f32 %v3421_v7, %v4244_v48  ;;  %v1296_v30 = vmul.f32 %v3448_v22, %v4244_v48 }
 0x15c   : > { %5254 = vst [vmem:[#allocation48_spill] sm:$0xff] %v4217_v5  ;;  %v1062_v39 = vadd.f32 %v1046_v1, %v3999_v49  ;;  %v1550_v49 = vmul.f32 %v3450_v13, %v4244_v48  ;;  %v1570_v1 = vadd.f32 %v1554_v44, %v4005_v45  ;;  %v4283_v57 = vsel %vm449_vm0, %v553_v55, %v654_v20 }
 0x15d   : > { %5255 = vst [vmem:[#allocation18_spill] sm:$0xff] %v4221_v11  ;;  %v1300_v11 = vmul.f32 %v3448_v22, %v585_v51  ;;  %v1148_v51 = vmul.f32 %v3299_v61, %v4229_v32  ;;  %v807_v3 = vadd.f32 %v791_v63, %v3989_v12  ;;  %v1058_v5 = vadd.f32 %v1042_v24, %v4023_v6 }
 0x15e   : > { %5256 = vst [vmem:[#allocation28_spill] sm:$0xff] %v4237_v18  ;;  %v1312_v18 = vadd.f32 %v1296_v30, %v4026_v50  ;;  %v1144_v50 = vmul.f32 %v3299_v61, %v4283_v57  ;;  %v861_v45 = vadd.f32 %v4039_v47, %v811_v54  ;;  %v1398_v29 = vmul.f32 %v3301_v36, %v4283_v57  ;;  %v5261_v30 = vld [vmem:[#allocation37_spill] sm:$0xff] }
 0x15f   : > { %5257 = vst [vmem:[#allocation46_spill] sm:$0xff] %v4244_v48  ;;  %v1316_v60 = vadd.f32 %v1300_v11, %v4002_v4  ;;  %v857_v12 = vadd.f32 %v4102_v43, %v807_v3  ;;  %v891_v4 = vmul.f32 %v3183_v17, %v4283_v57  ;;  %v1109_v6 = vadd.f32 %v4116_v0, %v1058_v5  ;;  %v4298_v3 = vld [vmem:[#allocation9] sm:$0xff] }
 0x160   : > { %5258 = vst [vmem:[#allocation59_spill] sm:$0xff] %v4248_v14  ;;  %v4268_v14 = vld [vmem:[#allocation9 + $0x8] sm:$0xff]  ;;  %v852_v11 = vadd.f32 %v4062_v21, %v802_v15  ;;  %v1363_v55 = vadd.f32 %v4140_v2, %v1312_v18  ;;  %2294 = vmatpush.msra.mxu3 %v4189_v19  ;;  %v1113_v5 = vadd.f32 %v4049_v23, %v1062_v39  ;;  %v5262_v39 = vld [vmem:[#allocation81_spill] sm:$0xff] }
 0x161   : > { %5259 = vst [vmem:[#allocation89_spill] sm:$0xff] %v4283_v57  ;;  %2302 = vmatpush.msra.mxu2 %v4268_v14  ;;  %v1104_v43 = vadd.f32 %v4074_v28, %v1053_v42  ;;  %v644_v0 = vpop.permute.xlu0 %643  ;;  %v907_v44 = vadd.f32 %v891_v4, %v857_v12  ;;  %v1160_v63 = vadd.f32 %v1144_v50, %v1109_v6  ;;  %v4321_v42 = vpop.permute.xlu1 %484  ;;  %v5267_v6 = vld [vmem:[#allocation30_spill] sm:$0xff]  ;;  %v5268_v50 = vld [vmem:[#allocation79_spill] sm:$0xff] }
 0x162   : > { %v1566_v47 = vadd.f32 %v1550_v49, %v4029_v10  ;;  %v1367_v21 = vadd.f32 %v4054_v31, %v1316_v60  ;;  %v4309_v18 = vsel %vm449_vm0, %v4121_v58, %v644_v0  ;;  %v1414_v2 = vadd.f32 %v1398_v29, %v1363_v55  ;;  %v4319_v31 = vpop.permute.xlu2 %536  ;;  %2274 = vmatpush.msra.mxu1 %v3991_v33  ;;  %v5270_v55 = vld [vmem:[#allocation119_spill] sm:$0xff] }
 0x163   : > { %2305 = vmatpush.msra.mxu2 %v4298_v3  ;;  %5260 = vst [vmem:[#allocation90_spill] sm:$0xff] %v4309_v18  ;;  %v1621_v23 = vadd.f32 %v4058_v59, %v1570_v1  ;;  %v886_v28 = vmul.f32 %v3183_v17, %v4309_v18  ;;  %v1139_v15 = vmul.f32 %v3299_v61, %v4309_v18  ;;  %v5263_v1 = vld [vmem:[#allocation35_spill] sm:$0xff] }
 0x164   : > { %v1393_v10 = vmul.f32 %v3301_v36, %v4309_v18  ;;  %v911_v58 = vadd.f32 %v895_v26, %v861_v45  ;;  %v1358_v24 = vadd.f32 %v4089_v35, %v1307_v37  ;;  %v957_v59 = vadd.f32 %v4106_v52, %v907_v44  ;;  %2297 = vmatpush.msra.mxu3 %v4231_v8  ;;  %v5264_v26 = vld [vmem:[#allocation17_spill] sm:$0xff]  ;;  %v5265_v35 = vld [vmem:[#allocation150_spill] sm:$0xff]  ;;  %v5266_v37 = vld [vmem:[#allocation24_spill] sm:$0xff] }
 0x165   : > { %v1211_v20 = vadd.f32 %v5261_v30, %v1160_v63  ;;  %v1164_v17 = vadd.f32 %v1148_v51, %v1113_v5  ;;  %v902_v61 = vadd.f32 %v886_v28, %v852_v11  ;;  %v1155_v54 = vadd.f32 %v1139_v15, %v1104_v43  ;;  %2027 = vmatpush.msra.mxu0 %v4144_v38  ;;  %v5271_v5 = vld [vmem:[#allocation38_spill] sm:$0xff]  ;;  %v5272_v43 = vld [vmem:[#allocation115_spill] sm:$0xff] }
 0x166   : > { %v1465_v36 = vadd.f32 %v5262_v39, %v1414_v2  ;;  %v1418_v60 = vadd.f32 %v1402_v27, %v1367_v21  ;;  %v1409_v49 = vadd.f32 %v1393_v10, %v1358_v24  ;;  %v1008_v33 = vadd.f32 %v5263_v1, %v957_v59  ;;  %2277 = vmatpush.msra.mxu1 %v5265_v35  ;;  %v5269_v27 = vld [vmem:[#allocation118_spill] sm:$0xff]  ;;  %v4349_v44 = vld [vmem:[#allocation7 + $0xa] ss:$0 sm:$0xff]  ;;  %v4357_v10 = vld [vmem:[#allocation7 + $0xf] ss:$0 sm:$0xff] }
 0x167   : > { %v1262_v12 = vadd.f32 %v5264_v26, %v1211_v20  ;;  %v4333_v52 = vadd.f32 %v1656_v34, %v1621_v23  ;;  %v1617_v4 = vadd.f32 %v5266_v37, %v1566_v47  ;;  %v1652_v51 = vmul.f32 %v3303_v46, %v4283_v57  ;;  %2300 = vmatpush.msra.mxu3 %v4250_v56  ;;  %v4347_v34 = vld [vmem:[#allocation2 + $0x70] sm:$0xff]  ;;  %v5274_v63 = vld [vmem:[#allocation26_spill] sm:$0xff]  ;;  %v5276_v23 = vld [vmem:[#allocation23_spill] sm:$0xff] }
 0x168   : > { %v1253_v45 = vadd.f32 %v5268_v50, %v5267_v6  ;;  %v1059_v11 = vadd.f32 %v5269_v27, %v1008_v33  ;;  %v4345_v0 = vadd.f32 %v5272_v43, %v5271_v5  ;;  %5273 = vst [vmem:[#allocation91_spill] sm:$0xff] %v4347_v34  ;;  %v1241_v46 = vmul.f32 %v4349_v44, %v4347_v34  ;;  %v5275_v21 = vld [vmem:[#allocation74_spill] sm:$0xff]  ;;  %v5277_v59 = vld [vmem:[#allocation19_spill] sm:$0xff]  ;;  %v5282_v27 = vld [vmem:[#allocation96_spill] sm:$0xff] }
 0x169   : > { %v1313_v29 = vadd.f32 %v5270_v55, %v1262_v12  ;;  %2028 = vmatpush.msra.mxu0 %v4172_v62  ;;  %v952_v47 = vadd.f32 %v5274_v63, %v902_v61  ;;  %v1206_v2 = vadd.f32 %v5275_v21, %v1155_v54  ;;  %v1516_v28 = vadd.f32 %v5276_v23, %v1465_v36  ;;  %v477_v15 = vpop.permute.xlu0 %476  ;;  %v5278_v20 = vld [vmem:[#allocation42_spill] sm:$0xff]  ;;  %v5279_v1 = vld [vmem:[#allocation43_spill] sm:$0xff]  ;;  %v4371_v36 = vld [vmem:[#allocation2 + $0xf2] sm:$0xff]  ;;  %v503_v35 = vpop.permute.xlu1 %502 }
 0x16a   : > { %v1495_v24 = vmul.f32 %v4357_v10, %v4347_v34  ;;  %2280 = vmatpush.msra.mxu1 %v4118_v25  ;;  %v1460_v30 = vadd.f32 %v5277_v59, %v1409_v49  ;;  %v1110_v39 = vadd.f32 %v5278_v20, %v1059_v11  ;;  %v573_v61 = vsel %vm449_vm0, %v477_v15, %v4319_v31  ;;  %v4373_v26 = vld [vmem:[#allocation7 + $0xe] ss:$0 sm:$0xff]  ;;  %v2415_v49 = vld [vmem:[#allocation2 + $0x100] sm:$0xff]  ;;  %v5283_v55 = vld [vmem:[#allocation120_spill] sm:$0xff] }
 0x16b   : > { %v1364_v33 = vadd.f32 %v5279_v1, %v1313_v29  ;;  %2303 = vmatpush.msra.mxu3 %v4268_v14  ;;  %v4369_v54 = vadd.f32 %v1652_v51, %v1617_v4  ;;  %5280 = vst [vmem:[#allocation60_spill] sm:$0xff] %v4371_v36  ;;  %v1453_v25 = vmul.f32 %v4373_v26, %v4371_v36  ;;  %v5281_v6 = vld [vmem:[#allocation95_spill] sm:$0xff]  ;;  %v5284_v43 = vld [vmem:[#allocation133_spill] sm:$0xff]  ;;  %v5288_v1 = vld [vmem:[#allocation86_spill] sm:$0xff] }
 0x16c   : > { %v1504_v12 = vmul.f32 %v2415_v49, %v4357_v10  ;;  %v961_v37 = vadd.f32 %v4193_v53, %v911_v58  ;;  %2029 = vmatpush.msra.mxu0 %v4189_v19  ;;  %v1161_v50 = vadd.f32 %v5281_v6, %v1110_v39  ;;  %v783_v51 = vmul.f32 %v4223_v41, %v573_v61  ;;  %v4392_v58 = vpop.permute.xlu2 %562  ;;  %v5285_v21 = vld [vmem:[#allocation57_spill] sm:$0xff]  ;;  %v5287_v20 = vld [vmem:[#allocation47_spill] sm:$0xff]  ;;  %v4518_v34 = vld [vmem:[#allocation7 + $0x12] ss:$0 sm:$0xff] }
 0x16d   : > { %v4382_v4 = vadd.f32 %v5282_v27, %v1364_v33  ;;  %v1034_v11 = vmul.f32 %v3421_v7, %v573_v61  ;;  %2283 = vmatpush.msra.mxu1 %v4142_v16  ;;  %v4388_v29 = vadd.f32 %v5283_v55, %v1516_v28  ;;  %v1288_v5 = vmul.f32 %v3448_v22, %v573_v61  ;;  %v5289_v6 = vld [vmem:[#allocation63_spill] sm:$0xff] }
 0x16e   : > { %v1003_v53 = vadd.f32 %v4213_v9, %v952_v47  ;;  %v1707_v63 = vmul.f32 %v4371_v36, %v5284_v43  ;;  %2306 = vmatpush.msra.mxu3 %v4298_v3  ;;  %v1212_v23 = vadd.f32 %v5285_v21, %v1161_v50  ;;  %v1257_v15 = vadd.f32 %v1241_v46, %v1206_v2  ;;  %v5286_v9 = vld [vmem:[#allocation102_spill] sm:$0xff]  ;;  %v5290_v46 = vld [vmem:[#allocation87_spill] sm:$0xff] }
 0x16f   : > { %v1511_v59 = vadd.f32 %v1495_v24, %v1460_v30  ;;  %v586_v16 = vsel %vm449_vm0, %v503_v35, %v4392_v58  ;;  %2030 = vmatpush.msra.mxu0 %v4231_v8  ;;  %v1542_v28 = vmul.f32 %v3450_v13, %v573_v61  ;;  %v1758_v47 = vmul.f32 %v2415_v49, %v5286_v9  ;;  %v5291_v24 = vld [vmem:[#allocation28_spill] sm:$0xff]  ;;  %v5295_v21 = vld [vmem:[#allocation107_spill] sm:$0xff] }
 0x170   : > { %v1012_v39 = vadd.f32 %v5287_v20, %v961_v37  ;;  %v1215_v33 = vadd.f32 %v5288_v1, %v1164_v17  ;;  %2286 = vmatpush.msra.mxu1 %v4144_v38  ;;  %v1263_v50 = vadd.f32 %v5289_v6, %v1212_v23  ;;  %v799_v2 = vadd.f32 %v783_v51, %v5290_v46  ;;  %v5292_v38 = vld [vmem:[#allocation127_spill] sm:$0xff]  ;;  %v4427_v51 = vld [vmem:[#allocation7 + $0x2] ss:$0 sm:$0xff]  ;;  %v4442_v1 = vld [vmem:[#allocation7 + $0x7] ss:$0 sm:$0xff] }
 0x171   : > { %v1050_v30 = vadd.f32 %v1034_v11, %v5291_v24  ;;  %v1469_v27 = vadd.f32 %v1453_v25, %v1418_v60  ;;  %2031 = vmatpush.msra.mxu0 %v4250_v56  ;;  %v1304_v35 = vadd.f32 %v1288_v5, %v1253_v45  ;;  %v4411_v55 = vpop.permute.xlu0 %544  ;;  %v1047_v61 = vmul.f32 %v3421_v7, %v586_v16  ;;  %v2416_v25 = vld [vmem:[#allocation2 + $0x31] sm:$0xff]  ;;  %v4449_v6 = vld [vmem:[#allocation7 + $0x4] ss:$0 sm:$0xff]  ;;  %v4455_v24 = vld [vmem:[#allocation7 + $0x5] ss:$0 sm:$0xff] }
 0x172   : > { %v1301_v49 = vmul.f32 %v3448_v22, %v586_v16  ;;  %v1723_v17 = vadd.f32 %v1707_v63, %v4333_v52  ;;  %2289 = vmatpush.msra.mxu1 %v4172_v62  ;;  %v4418_v37 = vadd.f32 %v5292_v38, %v1263_v50  ;;  %v4424_v60 = vsel %vm449_vm0, %v4321_v42, %v4411_v55  ;;  %v5294_v5 = vld [vmem:[#allocation48_spill] sm:$0xff]  ;;  %v4453_v46 = vld [vmem:[#allocation2 + $0x40] sm:$0xff] }
 0x173   : > { %5293 = vst [vmem:[#allocation33_spill] sm:$0xff] %v4424_v60  ;;  %v1555_v45 = vmul.f32 %v3450_v13, %v586_v16  ;;  %v833_v11 = vmul.f32 %v4427_v51, %v2416_v25  ;;  %2032 = vmatpush.msra.mxu0 %v4268_v14  ;;  %v787_v62 = vmul.f32 %v4223_v41, %v4424_v60  ;;  %v4514_v48 = vld [vmem:[#allocation2 + $0x102] sm:$0xff] }
 0x174   : > { %v1038_v52 = vmul.f32 %v3421_v7, %v4424_v60  ;;  %v1266_v63 = vadd.f32 %v5294_v5, %v1215_v33  ;;  %v1809_v42 = vmul.f32 %v5295_v21, %v586_v16  ;;  %2292 = vmatpush.msra.mxu1 %v4189_v19  ;;  %v1292_v23 = vmul.f32 %v3448_v22, %v4424_v60  ;;  %v2420_v19 = vld [vmem:[#allocation2 + $0x32] sm:$0xff] }
 0x175   : > { %v1546_v9 = vmul.f32 %v3450_v13, %v4424_v60  ;;  %v1520_v20 = vadd.f32 %v1504_v12, %v1469_v27  ;;  %v1085_v41 = vmul.f32 %v4442_v1, %v2416_v25  ;;  %2033 = vmatpush.msra.mxu0 %v4298_v3  ;;  %v4447_v7 = vadd.f32 %v1542_v28, %v4345_v0  ;;  %v5296_v28 = vld [vmem:[#allocation88_spill] sm:$0xff] }
 0x176   : > { %v1063_v33 = vadd.f32 %v1047_v61, %v1012_v39  ;;  %v1774_v16 = vadd.f32 %v1758_v47, %v1723_v17  ;;  %v933_v22 = vmul.f32 %v2420_v19, %v4449_v6  ;;  %2295 = vmatpush.msra.mxu1 %v4231_v8  ;;  %v1317_v13 = vadd.f32 %v1301_v49, %v1266_v63  ;;  %v4466_v61 = vld [vmem:[#allocation7 + $0xc] ss:$0 sm:$0xff]  ;;  %v664_v49 = vpop.permute.xlu2 %663  ;;  %v4492_v63 = vld [vmem:[#allocation7 + $0x11] ss:$0 sm:$0xff] }
 0x177   : > { %v1571_v12 = vadd.f32 %v1555_v45, %v1520_v20  ;;  %v849_v50 = vadd.f32 %v833_v11, %v799_v2  ;;  %v984_v0 = vmul.f32 %v4455_v24, %v4453_v46  ;;  %v4460_v39 = vadd.f32 %v787_v62, %v5296_v28  ;;  %v4474_v45 = vld [vmem:[#allocation2 + $0x101] sm:$0xff]  ;;  %v4478_v11 = vld [vmem:[#allocation7 + $0x9] ss:$0 sm:$0xff] }
 0x178   : > { %v4462_v47 = vadd.f32 %v1038_v52, %v1003_v53  ;;  %v4464_v27 = vadd.f32 %v1809_v42, %v1774_v16  ;;  %v1339_v8 = vmul.f32 %v4466_v61, %v2416_v25  ;;  %2298 = vmatpush.msra.mxu1 %v4250_v56  ;;  %v4470_v2 = vadd.f32 %v1292_v23, %v1257_v15  ;;  %v4502_v20 = vld [vmem:[#allocation7 + $0x8] ss:$0 sm:$0xff] }
 0x179   : > { %v4472_v17 = vadd.f32 %v1546_v9, %v1511_v59  ;;  %v1101_v38 = vadd.f32 %v1085_v41, %v1050_v30  ;;  %v1098_v53 = vmul.f32 %v4474_v45, %v4442_v1  ;;  %v1187_v62 = vmul.f32 %v4478_v11, %v2420_v19  ;;  %v638_v15 = vpop.permute.xlu0 %637  ;;  %v4499_v9 = vld [vmem:[#allocation7 + $0x3] ss:$0 sm:$0xff]  ;;  %v4505_v41 = vld [vmem:[#allocation7 + $0xd] ss:$0 sm:$0xff] }
 0x17a   : > { %v1238_v52 = vmul.f32 %v4453_v46, %v4349_v44  ;;  %v1441_v5 = vmul.f32 %v2420_v19, %v4373_v26  ;;  %v1492_v56 = vmul.f32 %v4453_v46, %v4357_v10  ;;  %2301 = vmatpush.msra.mxu1 %v4268_v14  ;;  %v674_v59 = vsel %vm449_vm0, %v4319_v31, %v638_v15 }
 0x17b   : > { %v1352_v30 = vmul.f32 %v4474_v45, %v4466_v61  ;;  %v1606_v21 = vmul.f32 %v4492_v63, %v4474_v45  ;;  %v687_v42 = vsel %vm449_vm0, %v4392_v58, %v664_v49  ;;  %v1355_v23 = vadd.f32 %v1339_v8, %v1304_v35 }
 0x17c   : > { %v883_v14 = vmul.f32 %v4499_v9, %v674_v59  ;;  %v1136_v31 = vmul.f32 %v4502_v20, %v674_v59  ;;  %v1390_v16 = vmul.f32 %v4505_v41, %v674_v59  ;;  %2304 = vmatpush.msra.mxu1 %v4298_v3  ;;  %v1593_v28 = vmul.f32 %v4492_v63, %v2416_v25 }
 0x17d   : > { %v4511_v15 = vmul.f32 %v2420_v19, %v5284_v43  ;;  %v1114_v58 = vadd.f32 %v1098_v53, %v1063_v33  ;;  %v1149_v35 = vmul.f32 %v4502_v20, %v687_v42  ;;  %v1200_v60 = vmul.f32 %v4514_v48, %v4478_v11 }
 0x17e   : > { %v899_v8 = vadd.f32 %v883_v14, %v849_v50  ;;  %v1152_v49 = vadd.f32 %v1136_v31, %v1101_v38  ;;  %v1406_v57 = vadd.f32 %v1390_v16, %v1355_v23  ;;  %v1644_v3 = vmul.f32 %v4518_v34, %v674_v59  ;;  %v4528_v31 = vld [vmem:[#allocation2 + $0xb2] sm:$0xff] }
 0x17f   : > { %v1368_v18 = vadd.f32 %v1352_v30, %v1317_v13  ;;  %v1622_v25 = vadd.f32 %v1606_v21, %v1571_v12  ;;  %v1403_v19 = vmul.f32 %v4505_v41, %v687_v42  ;;  %v1657_v50 = vmul.f32 %v4518_v34, %v687_v42 }
 0x180   : > { %v949_v36 = vadd.f32 %v933_v22, %v899_v8  ;;  %v1203_v33 = vadd.f32 %v1187_v62, %v1152_v49  ;;  %v1457_v53 = vadd.f32 %v1441_v5, %v1406_v57  ;;  %v1609_v38 = vadd.f32 %v1593_v28, %v4447_v7  ;;  %v4532_v22 = vld [vmem:[#allocation7 + $0x14] ss:$0 sm:$0xff]  ;;  %v5297_v57 = vld [vmem:[#allocation25_spill] sm:$0xff]  ;;  %v5298_v28 = vld [vmem:[#allocation123_spill] sm:$0xff] }
 0x181   : > { %v4526_v23 = vmul.f32 %v4514_v48, %v4373_v26  ;;  %v1165_v14 = vadd.f32 %v1149_v35, %v1114_v58  ;;  %v1703_v13 = vmul.f32 %v4528_v31, %v5284_v43  ;;  %v1754_v62 = vmul.f32 %v4532_v22, %v5297_v57  ;;  %v5299_v35 = vld [vmem:[#allocation124_spill] sm:$0xff]  ;;  %v2438_v57 = vld [vmem:[#allocation2 + $0xc2] sm:$0xff] }
 0x182   : > { %v1000_v12 = vadd.f32 %v984_v0, %v949_v36  ;;  %v1254_v59 = vadd.f32 %v1238_v52, %v1203_v33  ;;  %v1508_v30 = vadd.f32 %v1492_v56, %v1457_v53  ;;  %v1660_v5 = vadd.f32 %v1644_v3, %v1609_v38  ;;  %v5300_v36 = vld [vmem:[#allocation125_spill] sm:$0xff]  ;;  %v4546_v56 = vld [vmem:[#allocation7 + $0x17] ss:$0 sm:$0xff]  ;;  %v2435_v33 = vld [vmem:[#allocation2 + $0xc1] sm:$0xff]  ;;  %v646_v53 = vpop.permute.xlu1 %645 }
 0x183   : > { %v4538_v7 = vmul.f32 %v4514_v48, %v5284_v43  ;;  %v1419_v21 = vadd.f32 %v1403_v19, %v1368_v18  ;;  %v1719_v16 = vadd.f32 %v1703_v13, %v4369_v54  ;;  %v1673_v52 = vadd.f32 %v1657_v50, %v1622_v25  ;;  %v4551_v43 = vld [vmem:[#allocation7 + $0x16] ss:$0 sm:$0xff]  ;;  %v5301_v38 = vld [vmem:[#allocation45_spill] sm:$0xff] }
 0x184   : > { %v1051_v58 = vadd.f32 %v5298_v28, %v1000_v12  ;;  %v1305_v8 = vadd.f32 %v5299_v35, %v1254_v59  ;;  %v4544_v0 = vadd.f32 %v5300_v36, %v1508_v30  ;;  %v4549_v49 = vmul.f32 %v4546_v56, %v687_v42  ;;  %v4554_v54 = vld [vmem:[#allocation2 + $0x71] sm:$0xff] }
 0x185   : > { %v1770_v3 = vadd.f32 %v1754_v62, %v1719_v16  ;;  %v1856_v18 = vmul.f32 %v4551_v43, %v2435_v33  ;;  %v837_v19 = vmul.f32 %v4554_v54, %v4427_v51  ;;  %v5302_v25 = vld [vmem:[#allocation49_spill] sm:$0xff]  ;;  %v1216_v12 = vadd.f32 %v1200_v60, %v1165_v14  ;;  %v5304_v62 = vld [vmem:[#allocation75_spill] sm:$0xff]  ;;  %v4574_v14 = vld [vmem:[#allocation2 + $0x80] sm:$0xff] }
 0x186   : > { %v1102_v13 = vadd.f32 %v5301_v38, %v1051_v58  ;;  %v1356_v50 = vadd.f32 %v5302_v25, %v1305_v8  ;;  %v1089_v42 = vmul.f32 %v4554_v54, %v4442_v1  ;;  %v5303_v59 = vld [vmem:[#allocation121_spill] sm:$0xff]  ;;  %v1958_v16 = vmul.f32 %v2438_v57, %v5304_v62  ;;  %v5305_v58 = vld [vmem:[#allocation99_spill] sm:$0xff]  ;;  %v5306_v8 = vld [vmem:[#allocation16_spill] sm:$0xff] }
 0x187   : > { %v1821_v30 = vadd.f32 %v5303_v59, %v1770_v3  ;;  %v4564_v28 = vld [vmem:[#allocation2 + $0x72] sm:$0xff]  ;;  %v1343_v51 = vmul.f32 %v4554_v54, %v4466_v61  ;;  %v988_v1 = vmul.f32 %v4574_v14, %v4455_v24  ;;  %v4581_v3 = vsel %vm449_vm0, %v4411_v55, %v646_v53 }
 0x188   : > { %v937_v35 = vmul.f32 %v4564_v28, %v4449_v6  ;;  %v1153_v36 = vadd.f32 %v5305_v58, %v1102_v13  ;;  %v4572_v60 = vadd.f32 %v5306_v8, %v1356_v50  ;;  %v1191_v6 = vmul.f32 %v4564_v28, %v4478_v11  ;;  %v5307_v13 = vld [vmem:[#allocation61_spill] sm:$0xff]  ;;  %v5308_v53 = vld [vmem:[#allocation116_spill] sm:$0xff] }
 0x189   : > { %v1872_v33 = vadd.f32 %v1856_v18, %v1821_v30  ;;  %v853_v61 = vadd.f32 %v837_v19, %v4460_v39  ;;  %v887_v38 = vmul.f32 %v4499_v9, %v4581_v3  ;;  %v1445_v50 = vmul.f32 %v4564_v28, %v4373_v26  ;;  %v5309_v19 = vld [vmem:[#allocation68_spill] sm:$0xff] }
 0x18a   : > { %v1204_v25 = vadd.f32 %v5307_v13, %v1153_v36  ;;  %v1105_v24 = vadd.f32 %v1089_v42, %v4462_v47  ;;  %v1140_v55 = vmul.f32 %v4502_v20, %v4581_v3  ;;  %v1359_v11 = vadd.f32 %v1343_v51, %v4470_v2  ;;  %v5310_v26 = vld [vmem:[#allocation44_spill] sm:$0xff]  ;;  %v5311_v2 = vld [vmem:[#allocation141_spill] sm:$0xff] }
 0x18b   : > { %v1923_v18 = vadd.f32 %v5308_v53, %v1872_v33  ;;  %v903_v59 = vadd.f32 %v887_v38, %v853_v61  ;;  %v1394_v39 = vmul.f32 %v4505_v41, %v4581_v3  ;;  %v1496_v30 = vmul.f32 %v4574_v14, %v4357_v10  ;;  %v4603_v8 = vld [vmem:[#allocation7 + $0x13] ss:$0 sm:$0xff]  ;;  %v5312_v13 = vld [vmem:[#allocation97_spill] sm:$0xff] }
 0x18c   : > { %v1255_v9 = vadd.f32 %v5309_v19, %v1204_v25  ;;  %v1156_v58 = vadd.f32 %v1140_v55, %v1105_v24  ;;  %v1618_v47 = vadd.f32 %v5310_v26, %v4388_v29  ;;  %v1704_v33 = vmul.f32 %v4603_v8, %v2438_v57  ;;  %v2442_v29 = vld [vmem:[#allocation2 + $0xd0] sm:$0xff]  ;;  %v5316_v26 = vld [vmem:[#allocation101_spill] sm:$0xff] }
 0x18d   : > { %v1974_v42 = vadd.f32 %v1958_v16, %v1923_v18  ;;  %v953_v36 = vadd.f32 %v937_v35, %v903_v59  ;;  %v1410_v20 = vadd.f32 %v1394_v39, %v1359_v11  ;;  %v1242_v61 = vmul.f32 %v4574_v14, %v4349_v44  ;;  %v505_v39 = vpop.permute.xlu0 %504 }
 0x18e   : > { %v4607_v51 = vadd.f32 %v5311_v2, %v1255_v9  ;;  %v1207_v38 = vadd.f32 %v1191_v6, %v1156_v58  ;;  %v1669_v10 = vadd.f32 %v5312_v13, %v1618_v47  ;;  %v1755_v16 = vmul.f32 %v2442_v29, %v4532_v22  ;;  %v5313_v6 = vld [vmem:[#allocation112_spill] sm:$0xff]  ;;  %v5319_v2 = vld [vmem:[#allocation105_spill] sm:$0xff] }
 0x18f   : > { %v1990_v25 = vmax.f32 %v1974_v42, 0.0  ;;  %v1004_v24 = vadd.f32 %v988_v1, %v953_v36  ;;  %v1461_v55 = vadd.f32 %v1445_v50, %v1410_v20  ;;  %v1711_v35 = vadd.f32 %v4511_v15, %v1660_v5  ;;  %v565_v50 = vpop.permute.xlu1 %564  ;;  %v2443_v15 = vld [vmem:[#allocation2 + $0xd1] sm:$0xff]  ;;  %v5317_v42 = vld [vmem:[#allocation131_spill] sm:$0xff] }
 0x190   : > { %v1470_v53 = vadd.f32 %v4526_v23, %v1419_v21  ;;  %v1724_v57 = vadd.f32 %v4538_v7, %v1673_v52  ;;  %v1720_v18 = vadd.f32 %v1704_v33, %v1669_v10  ;;  %v1597_v44 = vmul.f32 %v4554_v54, %v4492_v63  ;;  %v5314_v7 = vld [vmem:[#allocation39_spill] sm:$0xff]  ;;  %v5315_v52 = vld [vmem:[#allocation114_spill] sm:$0xff]  ;;  %v5318_v20 = vld [vmem:[#allocation104_spill] sm:$0xff] }
 0x191   : > { %2058 = vmatmul.f32.vlgmr.msra.gmra.mxu2 %v1990_v25  ;;  %v1055_v59 = vadd.f32 %v5313_v6, %v1004_v24  ;;  %v1512_v11 = vadd.f32 %v1496_v30, %v1461_v55  ;;  %v1860_v1 = vmul.f32 %v4551_v43, %v4474_v45  ;;  %v1258_v19 = vadd.f32 %v1242_v61, %v1207_v38  ;;  %v666_v45 = vpop.permute.xlu2 %665  ;;  %v2444_v25 = vld [vmem:[#allocation7 + $0xb] ss:$0 sm:$0xff]  ;;  %v4637_v55 = vld [vmem:[#allocation7 + $0x10] ss:$0 sm:$0xff] }
 0x192   : > { %v1771_v9 = vadd.f32 %v1755_v16, %v1720_v18  ;;  %v1857_v23 = vmul.f32 %v2443_v15, %v4551_v43  ;;  %v1962_v5 = vmul.f32 %v4514_v48, %v5304_v62  ;;  %v1267_v47 = vadd.f32 %v5316_v26, %v1216_v12  ;;  %v5320_v48 = vld [vmem:[#allocation92_spill] sm:$0xff]  ;;  %v5321_v12 = vld [vmem:[#allocation113_spill] sm:$0xff]  ;;  %v5322_v6 = vld [vmem:[#allocation55_spill] sm:$0xff] }
 0x193   : > { %v1106_v21 = vadd.f32 %v5314_v7, %v1055_v59  ;;  %v4626_v58 = vadd.f32 %v5315_v52, %v1512_v11  ;;  %v1876_v30 = vadd.f32 %v1860_v1, %v4464_v27  ;;  %v1521_v33 = vadd.f32 %v5318_v20, %v1470_v53  ;;  %v2446_v18 = vld [vmem:[#allocation2 + $0xd2] sm:$0xff]  ;;  %v5329_v20 = vld [vmem:[#allocation14_spill] sm:$0xff] }
 0x194   : > { %v1822_v36 = vadd.f32 %v5317_v42, %v1771_v9  ;;  %v1775_v61 = vadd.f32 %v5319_v2, %v1724_v57  ;;  %v587_v38 = vsel %vm449_vm0, %v505_v39, %v565_v50  ;;  %v1309_v29 = vadd.f32 %v5321_v12, %v1258_v19  ;;  %v5323_v39 = vld [vmem:[#allocation50_spill] sm:$0xff]  ;;  %v5324_v19 = vld [vmem:[#allocation137_spill] sm:$0xff]  ;;  %v5327_v26 = vld [vmem:[#allocation100_spill] sm:$0xff] }
 0x195   : > { %v1157_v13 = vadd.f32 %v5320_v48, %v1106_v21  ;;  %v1927_v10 = vadd.f32 %v4549_v49, %v1876_v30  ;;  %v1302_v24 = vmul.f32 %v2444_v25, %v587_v38  ;;  %v1556_v27 = vmul.f32 %v4637_v55, %v587_v38  ;;  %v507_v12 = vpop.permute.xlu0 %506 }
 0x196   : > { %v1873_v16 = vadd.f32 %v1857_v23, %v1822_v36  ;;  %v1959_v53 = vmul.f32 %v2446_v18, %v5304_v62  ;;  %v688_v57 = vsel %vm449_vm0, %v565_v50, %v666_v45  ;;  %v4647_v9 = vadd.f32 %v5323_v39, %v4544_v0  ;;  %v5325_v62 = vld [vmem:[#allocation65_spill] sm:$0xff]  ;;  %v5326_v50 = vld [vmem:[#allocation98_spill] sm:$0xff] }
 0x197   : > { %v1208_v59 = vadd.f32 %v5322_v6, %v1157_v13  ;;  %v1978_v11 = vadd.f32 %v1962_v5, %v1927_v10  ;;  %v1318_v1 = vadd.f32 %v1302_v24, %v1267_v47  ;;  %v1572_v49 = vadd.f32 %v1556_v27, %v1521_v33  ;;  %v5328_v47 = vld [vmem:[#allocation40_spill] sm:$0xff]  ;;  %v2448_v24 = vld [vmem:[#allocation2 + $0x41] sm:$0xff] }
 0x198   : > { %v1648_v15 = vmul.f32 %v4518_v34, %v4581_v3  ;;  %v1924_v23 = vadd.f32 %v5324_v19, %v1873_v16  ;;  %v1404_v7 = vmul.f32 %v4505_v41, %v688_v57  ;;  %v1360_v45 = vadd.f32 %v5328_v47, %v1309_v29  ;;  %v4663_v41 = vld [vmem:[#allocation7 + $0x15] ss:$0 sm:$0xff]  ;;  %v5331_v29 = vld [vmem:[#allocation62_spill] sm:$0xff] }
 0x199   : > { %v1259_v21 = vadd.f32 %v5325_v62, %v1208_v59  ;;  %v1994_v52 = vmax.f32 %v1978_v11, 0.0  ;;  %v1369_v30 = vadd.f32 %v5326_v50, %v1318_v1  ;;  %v1623_v5 = vadd.f32 %v5327_v26, %v1572_v49  ;;  %v5332_v6 = vld [vmem:[#allocation134_spill] sm:$0xff]  ;;  %v5333_v11 = vld [vmem:[#allocation71_spill] sm:$0xff]  ;;  %v5336_v19 = vld [vmem:[#allocation64_spill] sm:$0xff] }
 0x19a   : > { %v1613_v42 = vadd.f32 %v1597_v44, %v4472_v17  ;;  %v1975_v0 = vadd.f32 %v1959_v53, %v1924_v23  ;;  %v1746_v36 = vmul.f32 %v4532_v22, %v4453_v46  ;;  %v1810_v2 = vmul.f32 %v4663_v41, %v587_v38  ;;  %v5330_v44 = vld [vmem:[#allocation58_spill] sm:$0xff]  ;;  %v567_v46 = vpop.permute.xlu1 %566  ;;  %v5338_v26 = vld [vmem:[#allocation129_spill] sm:$0xff] }
 0x19b   : > { %v4661_v33 = vadd.f32 %v5329_v20, %v1259_v21  ;;  %2070 = vmatmul.f32.vlgmr.msra.gmra.mxu3 %v1994_v52  ;;  %v1420_v48 = vadd.f32 %v1404_v7, %v1369_v30  ;;  %v1658_v13 = vmul.f32 %v4518_v34, %v688_v57  ;;  %v1848_v17 = vmul.f32 %v2448_v24, %v4551_v43  ;;  %v5335_v39 = vld [vmem:[#allocation126_spill] sm:$0xff]  ;;  %v5340_v20 = vld [vmem:[#allocation80_spill] sm:$0xff] }
 0x19c   : > { %v1991_v10 = vmax.f32 %v1975_v0, 0.0  ;;  %v1762_v25 = vadd.f32 %v1746_v36, %v1711_v35  ;;  %v1466_v27 = vadd.f32 %v5330_v44, %v4382_v4  ;;  %v4672_v16 = vadd.f32 %v5331_v29, %v4572_v60  ;;  %v5334_v35 = vld [vmem:[#allocation93_spill] sm:$0xff]  ;;  %v5337_v62 = vld [vmem:[#allocation110_spill] sm:$0xff] }
 0x19d   : > { %v1664_v53 = vadd.f32 %v1648_v15, %v1613_v42  ;;  %v1471_v38 = vadd.f32 %v5332_v6, %v1420_v48  ;;  %v1674_v59 = vadd.f32 %v1658_v13, %v1623_v5  ;;  %v4677_v1 = vadd.f32 %v5333_v11, %v4607_v51  ;;  %v2449_v50 = vld [vmem:[#allocation2 + $0x42] sm:$0xff]  ;;  %v4688_v51 = vld [vmem:[#allocation7 + $0x18] ss:$0 sm:$0xff] }
 0x19e   : > { %v4680_v49 = vadd.f32 %v5334_v35, %v1360_v45  ;;  %2061 = vmatmul.f32.gmra.mxu2 %v1991_v10  ;;  %v1813_v4 = vadd.f32 %v5335_v39, %v1762_v25  ;;  %v1517_v23 = vadd.f32 %v5336_v19, %v1466_v27  ;;  %v1826_v7 = vadd.f32 %v1810_v2, %v1775_v61  ;;  %v668_v45 = vpop.permute.xlu2 %667  ;;  %v5339_v42 = vld [vmem:[#allocation135_spill] sm:$0xff]  ;;  %v5341_v48 = vld [vmem:[#allocation54_spill] sm:$0xff]  ;;  %v2454_v19 = vld [vmem:[#allocation2 + $0x112] sm:$0xff] }
 0x19f   : > { %v1912_v60 = vmul.f32 %v4546_v56, %v688_v57  ;;  %v1522_v15 = vadd.f32 %v5337_v62, %v1471_v38  ;;  %v588_v21 = vsel %vm449_vm0, %v507_v12, %v567_v46  ;;  %v1950_v30 = vmul.f32 %v4688_v51, %v2449_v50  ;;  %v2451_v10 = vld [vmem:[#allocation2 + $0xe0] sm:$0xff]  ;;  %v5344_v35 = vld [vmem:[#allocation103_spill] sm:$0xff] }
 0x1a0   : > { %v1864_v52 = vadd.f32 %v1848_v17, %v1813_v4  ;;  %v1568_v5 = vadd.f32 %v5338_v26, %v1517_v23  ;;  %v1557_v47 = vmul.f32 %v4637_v55, %v588_v21  ;;  %v1725_v61 = vadd.f32 %v5339_v42, %v1674_v59  ;;  %v2452_v17 = vld [vmem:[#allocation2 + $0xe1] sm:$0xff]  ;;  %v5343_v59 = vld [vmem:[#allocation108_spill] sm:$0xff] }
 0x1a1   : > { %v1705_v57 = vmul.f32 %v2446_v18, %v4603_v8  ;;  %v1699_v0 = vmul.f32 %v4603_v8, %v4564_v28  ;;  %v1750_v36 = vmul.f32 %v4574_v14, %v4532_v22  ;;  %v1756_v25 = vmul.f32 %v2451_v10, %v4532_v22  ;;  %v2453_v12 = vld [vmem:[#allocation2 + $0x81] sm:$0xff] }
 0x1a2   : > { %v1915_v2 = vadd.f32 %v5340_v20, %v1864_v52  ;;  %v1619_v13 = vadd.f32 %v5341_v48, %v1568_v5  ;;  %v1573_v24 = vadd.f32 %v1557_v47, %v1522_v15  ;;  %v1858_v44 = vmul.f32 %v2452_v17, %v4551_v43  ;;  %v5342_v14 = vld [vmem:[#allocation130_spill] sm:$0xff]  ;;  %v5346_v26 = vld [vmem:[#allocation111_spill] sm:$0xff] }
 0x1a3   : > { %v689_v18 = vsel %vm449_vm0, %v567_v46, %v668_v45  ;;  %v1715_v27 = vadd.f32 %v1699_v0, %v1664_v53  ;;  %v1852_v29 = vmul.f32 %v2453_v12, %v4551_v43  ;;  %v1877_v39 = vadd.f32 %v5344_v35, %v1826_v7  ;;  %v5345_v62 = vld [vmem:[#allocation22_spill] sm:$0xff]  ;;  %v5347_v45 = vld [vmem:[#allocation117_spill] sm:$0xff]  ;;  %v2455_v7 = vld [vmem:[#allocation2 + $0x50] sm:$0xff] }
 0x1a4   : > { %v1966_v6 = vadd.f32 %v1950_v30, %v1915_v2  ;;  %v1670_v38 = vadd.f32 %v5342_v14, %v1619_v13  ;;  %v1624_v11 = vadd.f32 %v5343_v59, %v1573_v24  ;;  %v1963_v23 = vmul.f32 %v2454_v19, %v4688_v51  ;;  %v5348_v2 = vld [vmem:[#allocation29_spill] sm:$0xff]  ;;  %v2456_v48 = vld [vmem:[#allocation2 + $0x82] sm:$0xff] }
 0x1a5   : > { %v1766_v4 = vadd.f32 %v1750_v36, %v1715_v27  ;;  %v1661_v15 = vadd.f32 %v5345_v62, %v4647_v9  ;;  %v1696_v46 = vmul.f32 %v2449_v50, %v4603_v8  ;;  %v1776_v5 = vadd.f32 %v5346_v26, %v1725_v61  ;;  %v5349_v24 = vld [vmem:[#allocation53_spill] sm:$0xff]  ;;  %v5350_v27 = vld [vmem:[#allocation147_spill] sm:$0xff] }
 0x1a6   : > { %v1982_v53 = vmax.f32 %v1966_v6, 0.0  ;;  %v1721_v52 = vadd.f32 %v1705_v57, %v1670_v38  ;;  %v1928_v30 = vadd.f32 %v1912_v60, %v1877_v39  ;;  %v1659_v47 = vmul.f32 %v4518_v34, %v689_v18  ;;  %v2457_v60 = vld [vmem:[#allocation2 + $0x51] sm:$0xff]  ;;  %v5352_v39 = vld [vmem:[#allocation143_spill] sm:$0xff] }
 0x1a7   : > { %v1817_v42 = vadd.f32 %v5347_v45, %v1766_v4  ;;  %v1712_v0 = vadd.f32 %v1696_v46, %v1661_v15  ;;  %v1747_v36 = vmul.f32 %v2455_v7, %v4532_v22  ;;  %v1903_v9 = vmul.f32 %v4546_v56, %v5348_v2  ;;  %v5351_v38 = vld [vmem:[#allocation20_spill] sm:$0xff]  ;;  %v2458_v62 = vld [vmem:[#allocation2 + $0xe2] sm:$0xff]  ;;  %v5357_v2 = vld [vmem:[#allocation41_spill] sm:$0xff] }
 0x1a8   : > { %2034 = vmatmul.f32.vlgmr.msra.gmra.mxu0 %v1982_v53  ;;  %v1772_v20 = vadd.f32 %v1756_v25, %v1721_v52  ;;  %v1954_v50 = vmul.f32 %v2456_v48, %v4688_v51  ;;  %v1979_v57 = vadd.f32 %v1963_v23, %v1928_v30  ;;  %v1849_v10 = vmul.f32 %v2457_v60, %v4551_v43  ;;  %v5354_v46 = vld [vmem:[#allocation146_spill] sm:$0xff]  ;;  %v509_v53 = vpop.permute.xlu0 %508 }
 0x1a9   : > { %v1868_v13 = vadd.f32 %v1852_v29, %v1817_v42  ;;  %v1763_v61 = vadd.f32 %v1747_v36, %v1712_v0  ;;  %v1365_v17 = vadd.f32 %v5349_v24, %v4418_v37  ;;  %v1811_v6 = vmul.f32 %v4663_v41, %v588_v21  ;;  %v5353_v29 = vld [vmem:[#allocation128_spill] sm:$0xff]  ;;  %v5355_v42 = vld [vmem:[#allocation70_spill] sm:$0xff] }
 0x1aa   : > { %v1823_v12 = vadd.f32 %v5350_v27, %v1772_v20  ;;  %v1675_v25 = vadd.f32 %v1659_v47, %v1624_v11  ;;  %v1995_v14 = vmax.f32 %v1979_v57, 0.0  ;;  %v1909_v59 = vmul.f32 %v4546_v56, %v5351_v38  ;;  %v569_v11 = vpop.permute.xlu1 %568  ;;  %v2459_v47 = vld [vmem:[#allocation2 + $0x52] sm:$0xff]  ;;  %v5359_v24 = vld [vmem:[#allocation94_spill] sm:$0xff] }
 0x1ab   : > { %v1919_v35 = vadd.f32 %v1903_v9, %v1868_v13  ;;  %v1814_v4 = vadd.f32 %v5352_v39, %v1763_v61  ;;  %v1416_v19 = vadd.f32 %v5353_v29, %v1365_v17  ;;  %v1960_v15 = vmul.f32 %v2458_v62, %v4688_v51  ;;  %v5356_v36 = vld [vmem:[#allocation140_spill] sm:$0xff]  ;;  %v5358_v13 = vld [vmem:[#allocation77_spill] sm:$0xff] }
 0x1ac   : > { %v1874_v23 = vadd.f32 %v1858_v44, %v1823_v12  ;;  %v1913_v37 = vmul.f32 %v4546_v56, %v689_v18  ;;  %2073 = vmatmul.f32.gmra.mxu3 %v1995_v14  ;;  %v1900_v21 = vmul.f32 %v4546_v56, %v5354_v46  ;;  %v1951_v45 = vmul.f32 %v2459_v47, %v4688_v51  ;;  %v5360_v12 = vld [vmem:[#allocation144_spill] sm:$0xff]  ;;  %v2462_v46 = vld [vmem:[#allocation2 + $0x122] sm:$0xff] }
 0x1ad   : > { %v1970_v52 = vadd.f32 %v1954_v50, %v1919_v35  ;;  %v1865_v30 = vadd.f32 %v1849_v10, %v1814_v4  ;;  %v1467_v0 = vadd.f32 %v5355_v42, %v1416_v19  ;;  %v1827_v44 = vadd.f32 %v1811_v6, %v1776_v5  ;;  %v2461_v14 = vld [vmem:[#allocation2 + $0x90] sm:$0xff]  ;;  %v670_v4 = vpop.permute.xlu2 %669  ;;  %v5363_v42 = vld [vmem:[#allocation69_spill] sm:$0xff] }
 0x1ae   : > { %v1925_v7 = vadd.f32 %v1909_v59, %v1874_v23  ;;  %v1726_v20 = vadd.f32 %v5356_v36, %v1675_v25  ;;  %v1614_v18 = vadd.f32 %v5357_v2, %v4626_v58  ;;  %v589_v50 = vsel %vm449_vm0, %v509_v53, %v569_v11  ;;  %v2460_v25 = vld [vmem:[#allocation2 + $0xf0] sm:$0xff] }
 0x1af   : > { %v1986_v9 = vmax.f32 %v1970_v52, 0.0  ;;  %v1916_v57 = vadd.f32 %v1900_v21, %v1865_v30  ;;  %v1518_v61 = vadd.f32 %v5358_v13, %v1467_v0  ;;  %v1706_v10 = vmul.f32 %v2458_v62, %v4603_v8  ;;  %v5361_v23 = vld [vmem:[#allocation76_spill] sm:$0xff]  ;;  %v5362_v62 = vld [vmem:[#allocation109_spill] sm:$0xff]  ;;  %v5366_v13 = vld [vmem:[#allocation142_spill] sm:$0xff] }
 0x1b0   : > { %v1976_v60 = vadd.f32 %v1960_v15, %v1925_v7  ;;  %v1665_v17 = vadd.f32 %v5359_v24, %v1614_v18  ;;  %v1700_v27 = vmul.f32 %v2456_v48, %v4603_v8  ;;  %v1757_v58 = vmul.f32 %v2460_v25, %v4532_v22  ;;  %v2463_v53 = vld [vmem:[#allocation2 + $0xf1] sm:$0xff] }
 0x1b1   : > { %2046 = vmatmul.f32.vlgmr.msra.gmra.mxu1 %v1986_v9  ;;  %v1967_v5 = vadd.f32 %v1951_v45, %v1916_v57  ;;  %v1569_v6 = vadd.f32 %v5360_v12, %v1518_v61  ;;  %v1751_v38 = vmul.f32 %v2461_v14, %v4532_v22  ;;  %v1777_v35 = vadd.f32 %v5346_v26, %v1726_v20  ;;  %v2464_v45 = vld [vmem:[#allocation2 + $0x91] sm:$0xff]  ;;  %v5365_v9 = vld [vmem:[#allocation138_spill] sm:$0xff] }
 0x1b2   : > { %v1992_v59 = vmax.f32 %v1976_v60, 0.0  ;;  %v1812_v39 = vmul.f32 %v4663_v41, %v589_v50  ;;  %v1716_v29 = vadd.f32 %v1700_v27, %v1665_v17  ;;  %v1878_v15 = vadd.f32 %v5362_v62, %v1827_v44  ;;  %v5364_v7 = vld [vmem:[#allocation145_spill] sm:$0xff]  ;;  %v5367_v50 = vld [vmem:[#allocation56_spill] sm:$0xff]  ;;  %v5374_v62 = vld [vmem:[#allocation59_spill] sm:$0xff] }
 0x1b3   : > { %v1983_v19 = vmax.f32 %v1967_v5, 0.0  ;;  %v1620_v48 = vadd.f32 %v5361_v23, %v1569_v6  ;;  %v1964_v21 = vmul.f32 %v2462_v46, %v4688_v51  ;;  %v1859_v52 = vmul.f32 %v2463_v53, %v4551_v43  ;;  %v2465_v27 = vld [vmem:[#allocation2 + $0x92] sm:$0xff]  ;;  %v5370_v6 = vld [vmem:[#allocation66_spill] sm:$0xff] }
 0x1b4   : > { %2064 = vmatmul.f32.gmra.mxu2 %v1992_v59  ;;  %v1767_v30 = vadd.f32 %v1751_v38, %v1716_v29  ;;  %v1853_v26 = vmul.f32 %v2464_v45, %v4551_v43  ;;  %v1509_v0 = vadd.f32 %v5363_v42, %v4672_v16  ;;  %v1910_v44 = vmul.f32 %v4546_v56, %v4229_v32  ;;  %v5368_v16 = vld [vmem:[#allocation132_spill] sm:$0xff]  ;;  %v5373_v23 = vld [vmem:[#allocation122_spill] sm:$0xff] }
 0x1b5   : > { %2037 = vmatmul.f32.gmra.mxu0 %v1983_v19  ;;  %v1671_v36 = vadd.f32 %v5364_v7, %v1620_v48  ;;  %v690_v20 = vsel %vm449_vm0, %v569_v11, %v670_v4  ;;  %v1929_v2 = vadd.f32 %v1913_v37, %v1878_v15  ;;  %v1828_v18 = vadd.f32 %v1812_v39, %v1777_v35  ;;  %v5371_v39 = vld [vmem:[#allocation149_spill] sm:$0xff]  ;;  %v5372_v29 = vld [vmem:[#allocation136_spill] sm:$0xff] }
 0x1b6   : > { %v1818_v57 = vadd.f32 %v5365_v9, %v1767_v30  ;;  %v1560_v61 = vadd.f32 %v5366_v13, %v1509_v0  ;;  %v1462_v60 = vadd.f32 %v5367_v50, %v4680_v49  ;;  %v1904_v17 = vmul.f32 %v4546_v56, %v5368_v16  ;;  %v2466_v49 = vld [vmem:[#allocation2 + $0x60] sm:$0xff]  ;;  %v5375_v46 = vld [vmem:[#allocation60_spill] sm:$0xff]  ;;  %v5379_v50 = vld [vmem:[#allocation139_spill] sm:$0xff] }
 0x1b7   : > { %v1722_v24 = vadd.f32 %v1706_v10, %v1671_v36  ;;  %v1955_v5 = vmul.f32 %v2465_v27, %v4688_v51  ;;  %v1980_v32 = vadd.f32 %v1964_v21, %v1929_v2  ;;  %v1697_v37 = vmul.f32 %v2459_v47, %v4603_v8  ;;  %v5376_v21 = vld [vmem:[#allocation21_spill] sm:$0xff]  ;;  %v2467_v36 = vld [vmem:[#allocation2 + $0x61] sm:$0xff]  ;;  %v5381_v16 = vld [vmem:[#allocation36_spill] sm:$0xff] }
 0x1b8   : > { %v1869_v12 = vadd.f32 %v1853_v26, %v1818_v57  ;;  %v1611_v11 = vadd.f32 %v5369_v40, %v1560_v61  ;;  %v1513_v25 = vadd.f32 %v5370_v6, %v1462_v60  ;;  %v1914_v38 = vmul.f32 %v4546_v56, %v690_v20  ;;  %v5377_v26 = vld [vmem:[#allocation52_spill] sm:$0xff]  ;;  %v2468_v2 = vld [vmem:[#allocation2 + $0xa0] sm:$0xff] }
 0x1b9   : > { %v1773_v14 = vadd.f32 %v1757_v58, %v1722_v24  ;;  %v1996_v59 = vmax.f32 %v1980_v32, 0.0  ;;  %v1748_v10 = vmul.f32 %v2466_v49, %v4532_v22  ;;  %v1879_v48 = vadd.f32 %v5373_v23, %v1828_v18  ;;  %v5378_v9 = vld [vmem:[#allocation78_spill] sm:$0xff]  ;;  %v5380_v24 = vld [vmem:[#allocation15_spill] sm:$0xff] }
 0x1ba   : > { %v1920_v35 = vadd.f32 %v1904_v17, %v1869_v12  ;;  %v1662_v4 = vadd.f32 %v5371_v39, %v1611_v11  ;;  %v1564_v19 = vadd.f32 %v5372_v29, %v1513_v25  ;;  %v1961_v47 = vmul.f32 %v4688_v51, %v5375_v46  ;;  %v5383_v32 = vld [vmem:[#allocation51_spill] sm:$0xff]  ;;  %v5384_v40 = vld [vmem:[#allocation90_spill] sm:$0xff] }
 0x1bb   : > { %v1824_v15 = vadd.f32 %v5374_v62, %v1773_v14  ;;  %2076 = vmatmul.f32.gmra.mxu3 %v1996_v59  ;;  %v1701_v58 = vmul.f32 %v2465_v27, %v4603_v8  ;;  %v1408_v53 = vadd.f32 %v5376_v21, %v4677_v1  ;;  %v1930_v0 = vadd.f32 %v1914_v38, %v1879_v48  ;;  %v2469_v39 = vld [vmem:[#allocation2 + $0x62] sm:$0xff]  ;;  %v5387_v48 = vld [vmem:[#allocation85_spill] sm:$0xff] }
 0x1bc   : > { %v1971_v30 = vadd.f32 %v1955_v5, %v1920_v35  ;;  %v1713_v45 = vadd.f32 %v1697_v37, %v1662_v4  ;;  %v1615_v42 = vadd.f32 %v5377_v26, %v1564_v19  ;;  %v1850_v20 = vmul.f32 %v2467_v36, %v4551_v43  ;;  %v5382_v5 = vld [vmem:[#allocation84_spill] sm:$0xff]  ;;  %v5385_v37 = vld [vmem:[#allocation18_spill] sm:$0xff]  ;;  %v5388_v46 = vld [vmem:[#allocation67_spill] sm:$0xff] }
 0x1bd   : > { %v1875_v7 = vadd.f32 %v1859_v52, %v1824_v15  ;;  %v1752_v18 = vmul.f32 %v2468_v2, %v4532_v22  ;;  %v1459_v57 = vadd.f32 %v5378_v9, %v1408_v53  ;;  %v1981_v1 = vadd.f32 %v5380_v24, %v1930_v0  ;;  %v2470_v29 = vld [vmem:[#allocation2 + $0xa1] sm:$0xff]  ;;  %v5389_v53 = vld [vmem:[#allocation148_spill] sm:$0xff]  ;;  %v5392_v36 = vld [vmem:[#allocation73_spill] sm:$0xff] }
 0x1be   : > { %v1987_v13 = vmax.f32 %v1971_v30, 0.0  ;;  %v1764_v61 = vadd.f32 %v1748_v10, %v1713_v45  ;;  %v1666_v60 = vadd.f32 %v5379_v50, %v1615_v42  ;;  %v1545_v17 = vmul.f32 %v4637_v55, %v5381_v16  ;;  %v5386_v10 = vld [vmem:[#allocation106_spill] sm:$0xff]  ;;  %v5391_v0 = vld [vmem:[#allocation91_spill] sm:$0xff] }
 0x1bf   : > { %v1926_v27 = vadd.f32 %v1910_v44, %v1875_v7  ;;  %v1510_v52 = vadd.f32 %v5382_v5, %v1459_v57  ;;  %v1361_v12 = vadd.f32 %v5383_v32, %v4661_v33  ;;  %v1647_v11 = vmul.f32 %v4518_v34, %v5384_v40  ;;  %v5390_v45 = vld [vmem:[#allocation82_spill] sm:$0xff]  ;;  %v5393_v9 = vld [vmem:[#allocation83_spill] sm:$0xff] }
 0x1c0   : > { %2049 = vmatmul.f32.gmra.mxu1 %v1987_v13  ;;  %v1815_v6 = vadd.f32 %v5385_v37, %v1764_v61  ;;  %v1717_v25 = vadd.f32 %v1701_v58, %v1666_v60  ;;  %v1997_v14 = vmax.f32 %v1981_v1, 0.0  ;;  %v1901_v59 = vmul.f32 %v4546_v56, %v5384_v40  ;;  %v2471_v13 = vld [vmem:[#allocation2 + $0xa2] sm:$0xff]  ;;  %v5394_v60 = vld [vmem:[#allocation33_spill] sm:$0xff] }
 0x1c1   : > { %v1977_v38 = vadd.f32 %v1961_v47, %v1926_v27  ;;  %v1561_v49 = vadd.f32 %v1545_v17, %v1510_v52  ;;  %v1412_v44 = vadd.f32 %v5386_v10, %v1361_v12  ;;  %v1952_v4 = vmul.f32 %v2469_v39, %v4688_v51  ;;  %v2473_v10 = vld [vmem:[#allocation2 + $0xb1] sm:$0xff] }
 0x1c2   : > { %v1866_v35 = vadd.f32 %v1850_v20, %v1815_v6  ;;  %v1768_v33 = vadd.f32 %v1752_v18, %v1717_v25  ;;  %v1854_v19 = vmul.f32 %v2470_v29, %v4551_v43  ;;  %v1698_v15 = vmul.f32 %v2469_v39, %v4603_v8 }
 0x1c3   : > { %v1993_v23 = vmax.f32 %v1977_v38, 0.0  ;;  %2079 = vmatmul.f32.gmra.mxu3 %v1997_v14  ;;  %v1612_v62 = vadd.f32 %v5387_v48, %v1561_v49  ;;  %v1463_v47 = vadd.f32 %v5388_v46, %v1412_v44  ;;  %v1600_v58 = vmul.f32 %v2470_v29, %v4492_v63  ;;  %v2091_v48 = vld [vmem:[%s2780_s12 + $0x40] sm:$0xff] }
 0x1c4   : > { %v1917_v21 = vadd.f32 %v1901_v59, %v1866_v35  ;;  %v1819_v30 = vadd.f32 %v5389_v53, %v1768_v33  ;;  %v1549_v26 = vmul.f32 %v4637_v55, %v5390_v45  ;;  %v1749_v7 = vmul.f32 %v4532_v22, %v5391_v0  ;;  %v2083_v45 = vld [vmem:[%s2780_s12] sm:$0xff] }
 0x1c5   : > { %2067 = vmatmul.f32.gmra.mxu2 %v1993_v23  ;;  %v1663_v42 = vadd.f32 %v1647_v11, %v1612_v62  ;;  %v1514_v20 = vadd.f32 %v5392_v36, %v1463_v47  ;;  %v1905_v57 = vmul.f32 %v4546_v56, %v5393_v9  ;;  %v1956_v63 = vmul.f32 %v2471_v13, %v4688_v51  ;;  %v2472_v11 = vld [vmem:[#allocation2 + $0xb0] sm:$0xff]  ;;  %v2092_v47 = vld [vmem:[%s2780_s12 + $0x48] sm:$0xff] }
 0x1c6   : > { %v1968_v2 = vadd.f32 %v1952_v4, %v1917_v21  ;;  %v1870_v18 = vadd.f32 %v1854_v19, %v1819_v30  ;;  %v1651_v55 = vmul.f32 %v4518_v34, %v5393_v9  ;;  %v1800_v24 = vmul.f32 %v4663_v41, %v5394_v60  ;;  %v2093_v60 = vld [vmem:[%s2780_s12 + $0x50] sm:$0xff] }
 0x1c7   : > { %v1714_v61 = vadd.f32 %v1698_v15, %v1663_v42  ;;  %v1565_v50 = vadd.f32 %v1549_v26, %v1514_v20  ;;  %v1851_v27 = vmul.f32 %v4554_v54, %v4551_v43  ;;  %v1702_v52 = vmul.f32 %v2471_v13, %v4603_v8  ;;  %v5395_v54 = vld [vmem:[#allocation46_spill] sm:$0xff]  ;;  %v2084_v13 = vld [vmem:[%s2780_s12 + $0x8] sm:$0xff] }
 0x1c8   : > { %v1984_v1 = vmax.f32 %v1968_v2, 0.0  ;;  %v1921_v16 = vadd.f32 %v1905_v57, %v1870_v18  ;;  %v1753_v37 = vmul.f32 %v2472_v11, %v4532_v22  ;;  %v1902_v25 = vmul.f32 %v4546_v56, %v4581_v3  ;;  %v5396_v3 = vld [vmem:[#allocation89_spill] sm:$0xff]  ;;  %v2096_v2 = vld [vmem:[%s2780_s12 + $0x68] sm:$0xff] }
 0x1c9   : > { %v1765_v17 = vadd.f32 %v1749_v7, %v1714_v61  ;;  %v1616_v5 = vadd.f32 %v1600_v58, %v1565_v50  ;;  %v1953_v14 = vmul.f32 %v4688_v51, %v4564_v28  ;;  %v1804_v8 = vmul.f32 %v4663_v41, %v5395_v54  ;;  %v2087_v7 = vld [vmem:[%s2780_s12 + $0x20] sm:$0xff] }
 0x1ca   : > { %2040 = vmatmul.f32.gmra.mxu0 %v1984_v1  ;;  %v1972_v32 = vadd.f32 %v1956_v63, %v1921_v16  ;;  %v1855_v44 = vmul.f32 %v2473_v10, %v4551_v43  ;;  %v1906_v28 = vmul.f32 %v4546_v56, %v5396_v3  ;;  %v1957_v33 = vmul.f32 %v4688_v51, %v4528_v31  ;;  %v4836_v43 = vld [vmem:[%s4927_s3] ss:$0 sm:$0xff]  ;;  %v2086_v3 = vld [vmem:[%s2780_s12 + $0x18] sm:$0xff] }
 0x1cb   : > { %v1816_v12 = vadd.f32 %v1800_v24, %v1765_v17  ;;  %v1667_v40 = vadd.f32 %v1651_v55, %v1616_v5  ;;  %v2095_v51 = vld [vmem:[%s2780_s12 + $0x60] sm:$0xff]  ;;  %v2088_v17 = vld [vmem:[%s2780_s12 + $0x28] sm:$0xff] }
 0x1cc   : > { %v1988_v34 = vmax.f32 %v1972_v32, 0.0 }
 0x1cd   : > { %v1867_v6 = vadd.f32 %v1851_v27, %v1816_v12  ;;  %v1718_v38 = vadd.f32 %v1702_v52, %v1667_v40  ;;  %v2097_v52 = vld [vmem:[%s2780_s12 + $0x70] sm:$0xff] }
 0x1ce   : > { %2052 = vmatmul.f32.gmra.mxu1 %v1988_v34 }
 0x1cf   : > { %v1918_v59 = vadd.f32 %v1902_v25, %v1867_v6  ;;  %v1769_v49 = vadd.f32 %v1753_v37, %v1718_v38  ;;  %v2098_v37 = vld [vmem:[%s2780_s12 + $0x78] sm:$0xff]  ;;  %v2085_v6 = vld [vmem:[%s2780_s12 + $0x10] sm:$0xff] }
 0x1d0   : > { %v2094_v38 = vld [vmem:[%s2780_s12 + $0x58] sm:$0xff] }
 0x1d1   : > { %v1969_v22 = vadd.f32 %v1953_v14, %v1918_v59  ;;  %v1820_v35 = vadd.f32 %v1804_v8, %v1769_v49 }
 0x1d3   : > { %v1985_v39 = vmax.f32 %v1969_v22, 0.0  ;;  %v1871_v4 = vadd.f32 %v1855_v44, %v1820_v35  ;;  %v2089_v22 = vld [vmem:[%s2780_s12 + $0x30] sm:$0xff] }
 0x1d5   : > { %2043 = vmatmul.f32.gmra.mxu0 %v1985_v39  ;;  %v1922_v41 = vadd.f32 %v1906_v28, %v1871_v4 }
 0x1d7   : > { %v1973_v29 = vadd.f32 %v1957_v33, %v1922_v41 }
 0x1d9   : > { %v1989_v19 = vmax.f32 %v1973_v29, 0.0  ;;  %v2090_v29 = vld [vmem:[%s2780_s12 + $0x38] sm:$0xff] }
 0x1db   : > { %2055 = vmatmul.f32.gmra.mxu1 %v1989_v19 }
 0x214   : > { %v2059_v23 = vpop.f32.mrf.mxu2 }
 0x215   : > { %v2060_v62 = vadd.f32 %v4836_v43, %v2059_v23 }
 0x217   : > { %v2107_v56 = vadd.f32 %v2091_v48, %v2060_v62 }
 0x219   : > { %2123 = vst [vmem:[%s4842_s7 + $0x40] sm:$0xff] %v2107_v56 }
 0x21e   : > { %v2071_v31 = vpop.f32.mrf.mxu3 }
 0x21f   : > { %v2072_v15 = vadd.f32 %v4836_v43, %v2071_v31 }
 0x221   : > { %v2062_v46 = vpop.f32.mrf.mxu2  ;;  %v2111_v58 = vadd.f32 %v2095_v51, %v2072_v15 }
 0x222   : > { %v2063_v21 = vadd.f32 %v4836_v43, %v2062_v46 }
 0x223   : > { %2127 = vst [vmem:[%s4842_s7 + $0x60] sm:$0xff] %v2111_v58 }
 0x224   : > { %v2108_v53 = vadd.f32 %v2092_v47, %v2063_v21 }
 0x225   : > { %v2035_v30 = vpop.f32.mrf.mxu0 }
 0x226   : > { %2124 = vst [vmem:[%s4842_s7 + $0x48] sm:$0xff] %v2108_v53  ;;  %v2036_v26 = vadd.f32 %v4836_v43, %v2035_v30 }
 0x228   : > { %v2099_v42 = vadd.f32 %v2083_v45, %v2036_v26 }
 0x22a   : > { %2115 = vst [vmem:[%s4842_s7] sm:$0xff] %v2099_v42 }
 0x22e   : > { %v2047_v0 = vpop.f32.mrf.mxu1 }
 0x22f   : > { %v2048_v36 = vadd.f32 %v4836_v43, %v2047_v0  ;;  %v2074_v20 = vpop.f32.mrf.mxu3 }
 0x230   : > { %v2075_v18 = vadd.f32 %v4836_v43, %v2074_v20 }
 0x231   : > { %v2103_v9 = vadd.f32 %v2087_v7, %v2048_v36 }
 0x232   : > { %v2038_v57 = vpop.f32.mrf.mxu0  ;;  %v2112_v63 = vadd.f32 %v2096_v2, %v2075_v18 }
 0x233   : > { %2119 = vst [vmem:[%s4842_s7 + $0x20] sm:$0xff] %v2103_v9  ;;  %v2039_v61 = vadd.f32 %v4836_v43, %v2038_v57 }
 0x234   : > { %2128 = vst [vmem:[%s4842_s7 + $0x68] sm:$0xff] %v2112_v63 }
 0x235   : > { %v2100_v50 = vadd.f32 %v2084_v13, %v2039_v61 }
 0x237   : > { %v2065_v55 = vpop.f32.mrf.mxu2  ;;  %2116 = vst [vmem:[%s4842_s7 + $0x8] sm:$0xff] %v2100_v50 }
 0x238   : > { %v2066_v24 = vadd.f32 %v4836_v43, %v2065_v55 }
 0x23a   : > { %v2109_v1 = vadd.f32 %v2093_v60, %v2066_v24 }
 0x23c   : > { %2125 = vst [vmem:[%s4842_s7 + $0x50] sm:$0xff] %v2109_v1 }
 0x23d   : > { %v2050_v16 = vpop.f32.mrf.mxu1 }
 0x23e   : > { %v2051_v27 = vadd.f32 %v4836_v43, %v2050_v16  ;;  %v2077_v5 = vpop.f32.mrf.mxu3 }
 0x23f   : > { %v2078_v32 = vadd.f32 %v4836_v43, %v2077_v5 }
 0x240   : > { %v2104_v12 = vadd.f32 %v2088_v17, %v2051_v27 }
 0x241   : > { %v2113_v40 = vadd.f32 %v2097_v52, %v2078_v32 }
 0x242   : > { %2120 = vst [vmem:[%s4842_s7 + $0x28] sm:$0xff] %v2104_v12 }
 0x243   : > { %2129 = vst [vmem:[%s4842_s7 + $0x70] sm:$0xff] %v2113_v40 }
 0x246   : > { %v2080_v11 = vpop.f32.mrf.mxu3 }
 0x247   : > { %v2041_v34 = vpop.f32.mrf.mxu0  ;;  %v2081_v25 = vadd.f32 %v4836_v43, %v2080_v11 }
 0x248   : > { %v2068_v14 = vpop.f32.mrf.mxu2  ;;  %v2042_v54 = vadd.f32 %v4836_v43, %v2041_v34 }
 0x249   : > { %v2069_v8 = vadd.f32 %v4836_v43, %v2068_v14  ;;  %v2114_v59 = vadd.f32 %v2098_v37, %v2081_v25 }
 0x24a   : > { %v2101_v49 = vadd.f32 %v2085_v6, %v2042_v54 }
 0x24b   : > { %v2110_v10 = vadd.f32 %v2094_v38, %v2069_v8  ;;  %v2053_v44 = vpop.f32.mrf.mxu1  ;;  %2130 = vst [vmem:[%s4842_s7 + $0x78] sm:$0xff] %v2114_v59 }
 0x24c   : > { %2117 = vst [vmem:[%s4842_s7 + $0x10] sm:$0xff] %v2101_v49  ;;  %v2054_v35 = vadd.f32 %v4836_v43, %v2053_v44 }
 0x24d   : > { %2126 = vst [vmem:[%s4842_s7 + $0x58] sm:$0xff] %v2110_v10 }
 0x24e   : > { %v2105_v39 = vadd.f32 %v2089_v22, %v2054_v35 }
 0x250   : > { %2121 = vst [vmem:[%s4842_s7 + $0x30] sm:$0xff] %v2105_v39 }
 0x252   : > { %v2044_v4 = vpop.f32.mrf.mxu0 }
 0x253   : > { %v2045_v28 = vadd.f32 %v4836_v43, %v2044_v4 }
 0x255   : > { %v2102_v33 = vadd.f32 %v2086_v3, %v2045_v28 }
 0x257   : > { %2118 = vst [vmem:[%s4842_s7 + $0x18] sm:$0xff] %v2102_v33 }
 0x258   : > { %v2056_v41 = vpop.f32.mrf.mxu1 }
 0x259   : > { %v2057_v19 = vadd.f32 %v4836_v43, %v2056_v41 }
 0x25b   : > { %v2106_v23 = vadd.f32 %v2090_v29, %v2057_v19 }
 0x25d   : > { %2122 = vst [vmem:[%s4842_s7 + $0x38] sm:$0xff] %v2106_v23 }
 0x25e   : > { %2591 = shalt.err (!%p2588_p10)
}
 0x25f   : > { %s2642_s20 = smov 128   ;;  %s2643_s21 = smov 8  }
 0x260   : > { %2317 = dma.vmem_to_hbm [thread:$0]  (%p2741_p3), %s2145_s24, 2048, %s2147_s23, %s2132_s19, %s2642_s20, %s2642_s20, %s2643_s21  }
 0x261 PF: > { %s2161_s6 = sand.u32 1, %s2622_s15   ;;  %p5397_p12 = scmp.ge.s32.totalorder %s2634_s18, 2 }
 0x262   : > { %s2162_s7 = scalar_lea.sflag [#allocation6], %s2161_s6 }
 0x263   : > { %p2331_p13 = pnand %p5397_p12, %p2704_p6 }
 0x265   : > { %p2332_p0 = pneg %p2331_p13 }
 0x267   : > { %2617 = dma.done.wait (%p2332_p0), %s2162_s7, 2048  }
 0x268   : > { %2619 = vsyncadd (%p2332_p0), %s2162_s7, 4294965248  ;;  %p18_p5 = scmp.ge.s32.totalorder %s2731_s10, 4   ;;  %s5398_s15 = smov %s2626_s16 }
 0x269   : > { %s5399_s16 = smov %s2630_s17  ;;  %s5400_s17 = smov %s2747_s14 }
 0x26a   : > { %s5401_s18 = smov %s2731_s10  ;;  %20 = sbr.rel (!%p18_p5) target bundleno = 6 (0x6), region = 115 }
 0x26f   :  { %2168 = vsyncpa [#allocation5], 1 }
 0x270   :  { %2170 = vsyncpa [#allocation5 + $0x1], 1 }
 0x271   :  { %2171 = vsyncpa [#allocation8], 1 }
 0x272   :  { %2172 = vsyncpa [#allocation6], 1 }
 0x273   :  { %2174 = vsyncpa [#allocation6 + $0x1], 1 }

</bundles_post_ra>
